<compile_context>
chip_gen: v7x
topology: tpu7x:2x2x1
jax: 0.10.0
libtpu: 0.0.40
codegen_flags: <defaults>
</compile_context>

<pallas_src>
import jax
import jax.numpy as jnp
from jax import lax
from jax.experimental import pallas as pl
from jax.experimental.pallas import tpu as pltpu


# f32 elems (per H*W) kept live in VMEM for ONE (n, c) slab per grid step:
# double-buffered input blocks (86*H*W) + output block (64*H*W), plus a
# generous ~8x (8H,8W)-sized allowance for live in-kernel temporaries.
_PER_SLAB_F32_ELEMS = 2 * (86 + 64) + 8 * 64     # x H*W elems; x4 -> bytes


def _upsample_matrix(in_size: int) -> jnp.ndarray:
    """(2*in_size, in_size) bilinear x2 interpolation matrix with PyTorch
    nn.Upsample(mode='bilinear', align_corners=False) semantics
    (half-pixel centers, source index clamped at 0)."""
    out_size = 2 * in_size
    i = jnp.arange(out_size, dtype=jnp.float32)
    src = jnp.maximum((i + 0.5) * 0.5 - 0.5, 0.0)
    i0 = jnp.floor(src).astype(jnp.int32)
    i1 = jnp.minimum(i0 + 1, in_size - 1)
    w1 = src - i0.astype(jnp.float32)
    w0 = 1.0 - w1
    u = jnp.zeros((out_size, in_size), dtype=jnp.float32)
    rows = jnp.arange(out_size)
    u = u.at[rows, i0].add(w0)
    u = u.at[rows, i1].add(w1)
    return u


def _check_upsample_matrix_pytorch_parity():
    """Non-circular parity check: hard-coded torch.nn.Upsample(scale_factor=2,
    mode='bilinear', align_corners=False) interpolation weights for
    in_size=4, precomputed with PyTorch (boundary rows included)."""
    expected = jnp.array(
        [[1.00, 0.00, 0.00, 0.00],
         [0.75, 0.25, 0.00, 0.00],
         [0.25, 0.75, 0.00, 0.00],
         [0.00, 0.75, 0.25, 0.00],
         [0.00, 0.25, 0.75, 0.00],
         [0.00, 0.00, 0.75, 0.25],
         [0.00, 0.00, 0.25, 0.75],
         [0.00, 0.00, 0.00, 1.00]], dtype=jnp.float32)
    assert jnp.allclose(_upsample_matrix(4), expected, atol=1e-6), \
        "bilinear matrix does not match PyTorch align_corners=False weights"


def _cascade_kernel(s1_ref, s2_ref, s3_ref, s4_ref, s5_ref,
                    uh2_ref, uwt2_ref, uh3_ref, uwt3_ref, uh4_ref, uwt4_ref,
                    out_ref):
    """One grid step processes BC (n, c) slabs: (BC, H, W) -> (BC, 8H, 8W)."""
    f32 = jnp.float32
    bc = s1_ref.shape[0]

    def up(x, uh_ref, uwt_ref):
        # x: (bc, hin, win) -> (bc, 2*hin, 2*win), bilinear x2 (separable).
        _, hin, win = x.shape
        p = uh_ref.shape[0]          # 2 * hin
        wout = uwt_ref.shape[1]      # 2 * win
        # H axis: ONE batched MXU matmul.  uh is broadcast once per stage
        # (cheap vreg replication); no jnp.stack / concatenate copies and no
        # unrolled per-slab Python loop.  Contracting dims are in the native
        # MXU layout (lhs K on lanes, rhs K on sublanes) -> no transposes.
        uh_b = jnp.broadcast_to(uh_ref[...], (bc, p, hin))
        t = lax.dot_general(
            uh_b, x,
            dimension_numbers=(((2,), (1,)), ((0,), (0,))),
            preferred_element_type=f32)                     # (bc, 2*hin, win)
        # W axis: ONE fused MXU matmul, M = bc * 2*hin (fills the MXU M dim),
        # against the pre-transposed (win, 2*win) matrix.  The reshape pair is
        # a free view when 2*hin % 8 == 0 (true whenever H % 4 == 0; otherwise
        # correct but pays a relayout).
        y = jnp.dot(t.reshape(bc * p, win), uwt_ref[...],
                    preferred_element_type=f32)             # (bc*2hin, 2*win)
        return y.reshape(bc, p, wout)

    x = s1_ref[...] + s2_ref[...]                   # (bc,  H,  W)
    x = up(x, uh2_ref, uwt2_ref) + s3_ref[...]      # (bc, 2H, 2W)
    x = up(x, uh3_ref, uwt3_ref) + s4_ref[...]      # (bc, 4H, 4W)
    x = up(x, uh4_ref, uwt4_ref) + s5_ref[...]      # (bc, 8H, 8W)
    out_ref[...] = x.astype(out_ref.dtype)


def _chip_vmem_info():
    """(vmem_capacity_bytes, is_small_vmem).  Small VMEM (~64 MiB/TC) implies a
    v7x-like dual-TensorCore part: tighter budget + even grid preferred."""
    vmem = 128 * 1024 * 1024
    try:
        info = pltpu.get_tpu_info()
        v = getattr(info, "vmem_capacity_bytes", None)
        if v:
            vmem = int(v)
    except Exception:
        pass
    return vmem, vmem < (100 << 20)


def _pick_block_channels(nc, h, w, budget_bytes, prefer_even_grid):
    """Pick the channel batch BC and the (possibly padded) NC.

    Returns (bc, padded_nc).  Prefers divisors of nc (no padding); pads nc up
    when its divisor structure would force a tiny BC.  With prefer_even_grid
    (dual-TensorCore chips) the grid length is kept even so megacore sharding
    under dimension_semantics=("parallel",) stays balanced."""
    per_slab = _PER_SLAB_F32_ELEMS * h * w * 4
    cap = int(max(1, min(nc, budget_bytes // per_slab)))

    def grid_len(bc, n):
        return -(-n // bc)

    divs = [d for d in range(1, cap + 1) if nc % d == 0]
    best_div = max(divs)

    if best_div * 2 >= cap or best_div == nc:
        bc, n = best_div, nc                 # divisor structure is fine
    else:
        bc = cap                             # awkward NC: pad rather than shrink BC
        n = grid_len(bc, nc) * bc

    if prefer_even_grid and n > 1:
        if grid_len(bc, n) == 1:
            # grid of 1 leaves one TensorCore idle -> shrink BC for 2+ steps.
            even = [d for d in range(1, bc) if n % d == 0 and (n // d) % 2 == 0]
            if even:
                bc = max(even)
        g = grid_len(bc, n)
        if g % 2 != 0 and g > 1:
            n = (g + 1) * bc                 # one dummy step balances the TCs
    return bc, n


def cascade_module(s1, s2, s3, s4, s5, *, block_channels=None):
    """s1, s2: (N,C,H,W); s3: (N,C,2H,2W); s4: (N,C,4H,4W); s5: (N,C,8H,8W)."""
    N, C, H, W = s1.shape
    assert s2.shape == (N, C, H, W)
    assert s3.shape == (N, C, 2 * H, 2 * W)
    assert s4.shape == (N, C, 4 * H, 4 * W)
    assert s5.shape == (N, C, 8 * H, 8 * W)

    NC = N * C
    vmem_cap, small_vmem = _chip_vmem_info()
    # Generation-aware budget: big blocks (grid 1 OK) on 128 MiB single-TC
    # chips; tighter budget + even grid on 64 MiB dual-TC chips.
    budget = min(24 << 20, vmem_cap // 3) if small_vmem else min(64 << 20, vmem_cap // 2)

    if block_channels is None:
        BC, NC_pad = _pick_block_channels(NC, H, W, budget, small_vmem)
    else:
        BC = int(block_channels)
        NC_pad = (-(-NC // BC)) * BC

    s1f = s1.reshape(NC, H, W)
    s2f = s2.reshape(NC, H, W)
    s3f = s3.reshape(NC, 2 * H, 2 * W)
    s4f = s4.reshape(NC, 4 * H, 4 * W)
    s5f = s5.reshape(NC, 8 * H, 8 * W)
    if NC_pad != NC:
        pad = NC_pad - NC
        padnc = lambda x: jnp.pad(x, ((0, pad), (0, 0), (0, 0)))
        s1f, s2f, s3f, s4f, s5f = map(padnc, (s1f, s2f, s3f, s4f, s5f))

    # H-side matrices (2h, h); W-side matrices pre-transposed to (w, 2w) so
    # the kernel never transposes a constant.
    uh2, uwt2 = _upsample_matrix(H), _upsample_matrix(W).T
    uh3, uwt3 = _upsample_matrix(2 * H), _upsample_matrix(2 * W).T
    uh4, uwt4 = _upsample_matrix(4 * H), _upsample_matrix(4 * W).T
    const_elems = sum(int(m.size) for m in (uh2, uwt2, uh3, uwt3, uh4, uwt4))

    # vmem_limit derived from the actual block bytes (consistent with the
    # picker budget), clamped to the detected chip capacity.
    block_bytes = _PER_SLAB_F32_ELEMS * BC * H * W * 4
    const_bytes = 2 * 4 * const_elems          # constants are double-buffered too
    vmem_limit = max(block_bytes + const_bytes + (4 << 20), 32 << 20)
    vmem_limit = min(vmem_limit, int(vmem_cap * 0.9))

    def slab_spec(h, w):
        # Block covers full spatial dims -> (8,128) divisibility rule satisfied.
        return pl.BlockSpec((BC, h, w), lambda i: (i, 0, 0))

    def const_spec(shape):
        # Constant block index: fetched once, stays resident across the grid.
        return pl.BlockSpec(shape, lambda i: (0, 0))

    # Advisory cost estimate (memory-bound op: ~150*H*W*4 bytes per channel).
    flops = 0
    hin, win = H, W
    for _ in range(3):
        flops += NC_pad * (2 * (2 * hin) * hin * win            # H-side matmuls
                           + 2 * (2 * hin) * win * (2 * win))   # W-side matmul
        hin, win = 2 * hin, 2 * win
    bytes_accessed = 4 * (NC_pad * 150 * H * W + const_elems)
    cost = pl.CostEstimate(flops=int(flops), transcendentals=0,
                           bytes_accessed=int(bytes_accessed))

    out = pl.pallas_call(
        _cascade_kernel,
        out_shape=jax.ShapeDtypeStruct((NC_pad, 8 * H, 8 * W), s5.dtype),
        grid_spec=pltpu.PrefetchScalarGridSpec(
            num_scalar_prefetch=0,
            grid=(NC_pad // BC,),
            in_specs=[
                slab_spec(H, W),
                slab_spec(H, W),
                slab_spec(2 * H, 2 * W),
                slab_spec(4 * H, 4 * W),
                slab_spec(8 * H, 8 * W),
                const_spec(uh2.shape), const_spec(uwt2.shape),
                const_spec(uh3.shape), const_spec(uwt3.shape),
                const_spec(uh4.shape), const_spec(uwt4.shape),
            ],
            out_specs=slab_spec(8 * H, 8 * W),
        ),
        # s5 (input 4) and the output share shape/dtype and the same block
        # index per step -> alias to avoid a second (NC,8H,8W) HBM buffer.
        input_output_aliases={4: 0},
        compiler_params=pltpu.CompilerParams(
            dimension_semantics=("parallel",),
            vmem_limit_bytes=int(vmem_limit),
        ),
        cost_estimate=cost,
    )(s1f, s2f, s3f, s4f, s5f, uh2, uwt2, uh3, uwt3, uh4, uwt4)

    if NC_pad != NC:
        out = out[:NC]
    return out.reshape(N, C, 8 * H, 8 * W)


def _cascade_reference(s1, s2, s3, s4, s5):
    """Pure-JAX reference (matrices separately validated against PyTorch)."""
    def up(x):
        h, w = x.shape[-2], x.shape[-1]
        uh, uw = _upsample_matrix(h), _upsample_matrix(w)
        return jnp.einsum('ph,nchw,qw->ncpq', uh, x, uw)
    x = s1 + s2
    x = up(x) + s3
    x = up(x) + s4
    x = up(x) + s5
    return x


if __name__ == "__main__":
    _check_upsample_matrix_pytorch_parity()

    key = jax.random.PRNGKey(0)
    k1, k2, k3, k4, k5 = jax.random.split(key, 5)
    N, C, H, W = 2, 4, 16, 16
    s1 = jax.random.normal(k1, (N, C, H, W), dtype=jnp.float32)
    s2 = jax.random.normal(k2, (N, C, H, W), dtype=jnp.float32)
    s3 = jax.random.normal(k3, (N, C, 2 * H, 2 * W), dtype=jnp.float32)
    s4 = jax.random.normal(k4, (N, C, 4 * H, 4 * W), dtype=jnp.float32)
    s5 = jax.random.normal(k5, (N, C, 8 * H, 8 * W), dtype=jnp.float32)

    out = cascade_module(s1, s2, s3, s4, s5)
    out = jax.block_until_ready(out)

    ref = _cascade_reference(s1, s2, s3, s4, s5)
    assert out.shape == (N, C, 8 * H, 8 * W)
    assert jnp.allclose(out, ref, atol=1e-4, rtol=1e-4)

    print("KERNEL_OK")
</pallas_src>

<mosaic_0001>
module attributes {stable_mosaic.version = 11 : i64} {
  func.func @_cascade_kernel(%arg0: i32, %arg1: memref<8x16x16xf32, #tpu.memory_space<vmem>>, %arg2: memref<8x16x16xf32, #tpu.memory_space<vmem>>, %arg3: memref<8x32x32xf32, #tpu.memory_space<vmem>>, %arg4: memref<8x64x64xf32, #tpu.memory_space<vmem>>, %arg5: memref<8x128x128xf32, #tpu.memory_space<vmem>>, %arg6: memref<32x16xf32, #tpu.memory_space<vmem>>, %arg7: memref<16x32xf32, #tpu.memory_space<vmem>>, %arg8: memref<64x32xf32, #tpu.memory_space<vmem>>, %arg9: memref<32x64xf32, #tpu.memory_space<vmem>>, %arg10: memref<128x64xf32, #tpu.memory_space<vmem>>, %arg11: memref<64x128xf32, #tpu.memory_space<vmem>>, %arg12: memref<8x128x128xf32, #tpu.memory_space<vmem>>) attributes {dimension_semantics = [#tpu.dimension_semantics<parallel>], iteration_bounds = array<i64: 1>, scalar_prefetch = 0 : i64, scratch_operands = 0 : i64, tpu.core_type = #tpu.core_type<tc>, window_params = [{transform_indices = @transform_0, window_bounds = array<i64: 8, 16, 16>}, {transform_indices = @transform_1, window_bounds = array<i64: 8, 16, 16>}, {transform_indices = @transform_2, window_bounds = array<i64: 8, 32, 32>}, {transform_indices = @transform_3, window_bounds = array<i64: 8, 64, 64>}, {transform_indices = @transform_4, window_bounds = array<i64: 8, 128, 128>}, {pipeline_mode = #tpu.pipeline_mode<synchronous>, transform_indices = @transform_5, window_bounds = array<i64: 32, 16>}, {pipeline_mode = #tpu.pipeline_mode<synchronous>, transform_indices = @transform_6, window_bounds = array<i64: 16, 32>}, {pipeline_mode = #tpu.pipeline_mode<synchronous>, transform_indices = @transform_7, window_bounds = array<i64: 64, 32>}, {pipeline_mode = #tpu.pipeline_mode<synchronous>, transform_indices = @transform_8, window_bounds = array<i64: 32, 64>}, {pipeline_mode = #tpu.pipeline_mode<synchronous>, transform_indices = @transform_9, window_bounds = array<i64: 128, 64>}, {pipeline_mode = #tpu.pipeline_mode<synchronous>, transform_indices = @transform_10, window_bounds = array<i64: 64, 128>}, {transform_indices = @transform_11, window_bounds = array<i64: 8, 128, 128>}]} {
    %c0 = arith.constant 0 : index
    %c0_0 = arith.constant 0 : index
    %c0_1 = arith.constant 0 : index
    %0 = vector.load %arg1[%c0, %c0_0, %c0_1] : memref<8x16x16xf32, #tpu.memory_space<vmem>>, vector<8x16x16xf32>
    %c0_2 = arith.constant 0 : index
    %c0_3 = arith.constant 0 : index
    %c0_4 = arith.constant 0 : index
    %1 = vector.load %arg2[%c0_2, %c0_3, %c0_4] : memref<8x16x16xf32, #tpu.memory_space<vmem>>, vector<8x16x16xf32>
    %2 = arith.addf %0, %1 : vector<8x16x16xf32>
    %c0_5 = arith.constant 0 : index
    %c0_6 = arith.constant 0 : index
    %3 = vector.load %arg6[%c0_5, %c0_6] : memref<32x16xf32, #tpu.memory_space<vmem>>, vector<32x16xf32>
    %4 = vector.shape_cast %3 : vector<32x16xf32> to vector<1x32x16xf32>
    %5 = vector.broadcast %4 : vector<1x32x16xf32> to vector<8x32x16xf32>
    %cst = arith.constant dense<0.000000e+00> : vector<8x32x16xf32>
    %6 = tpu.matmul %5, %2, %cst {dimension_numbers = #tpu.dot_dimension_numbers<[2], [1], [1], [2], [0, 0, 0, 1, 1, 2], [0], [0]>} : vector<8x32x16xf32>, vector<8x16x16xf32>, vector<8x32x16xf32> -> vector<8x32x16xf32>
    %7 = vector.shape_cast %6 : vector<8x32x16xf32> to vector<256x16xf32>
    %c0_7 = arith.constant 0 : index
    %c0_8 = arith.constant 0 : index
    %8 = vector.load %arg7[%c0_7, %c0_8] : memref<16x32xf32, #tpu.memory_space<vmem>>, vector<16x32xf32>
    %cst_9 = arith.constant dense<0.000000e+00> : vector<256x32xf32>
    %9 = tpu.matmul %7, %8, %cst_9 {dimension_numbers = #tpu.dot_dimension_numbers<[1], [0], [0], [1], [0, 0, 1, 1], [], []>} : vector<256x16xf32>, vector<16x32xf32>, vector<256x32xf32> -> vector<256x32xf32>
    %10 = vector.shape_cast %9 : vector<256x32xf32> to vector<8x32x32xf32>
    %c0_10 = arith.constant 0 : index
    %c0_11 = arith.constant 0 : index
    %c0_12 = arith.constant 0 : index
    %11 = vector.load %arg3[%c0_10, %c0_11, %c0_12] : memref<8x32x32xf32, #tpu.memory_space<vmem>>, vector<8x32x32xf32>
    %12 = arith.addf %10, %11 : vector<8x32x32xf32>
    %c0_13 = arith.constant 0 : index
    %c0_14 = arith.constant 0 : index
    %13 = vector.load %arg8[%c0_13, %c0_14] : memref<64x32xf32, #tpu.memory_space<vmem>>, vector<64x32xf32>
    %14 = vector.shape_cast %13 : vector<64x32xf32> to vector<1x64x32xf32>
    %15 = vector.broadcast %14 : vector<1x64x32xf32> to vector<8x64x32xf32>
    %cst_15 = arith.constant dense<0.000000e+00> : vector<8x64x32xf32>
    %16 = tpu.matmul %15, %12, %cst_15 {dimension_numbers = #tpu.dot_dimension_numbers<[2], [1], [1], [2], [0, 0, 0, 1, 1, 2], [0], [0]>} : vector<8x64x32xf32>, vector<8x32x32xf32>, vector<8x64x32xf32> -> vector<8x64x32xf32>
    %17 = vector.shape_cast %16 : vector<8x64x32xf32> to vector<512x32xf32>
    %c0_16 = arith.constant 0 : index
    %c0_17 = arith.constant 0 : index
    %18 = vector.load %arg9[%c0_16, %c0_17] : memref<32x64xf32, #tpu.memory_space<vmem>>, vector<32x64xf32>
    %cst_18 = arith.constant dense<0.000000e+00> : vector<512x64xf32>
    %19 = tpu.matmul %17, %18, %cst_18 {dimension_numbers = #tpu.dot_dimension_numbers<[1], [0], [0], [1], [0, 0, 1, 1], [], []>} : vector<512x32xf32>, vector<32x64xf32>, vector<512x64xf32> -> vector<512x64xf32>
    %20 = vector.shape_cast %19 : vector<512x64xf32> to vector<8x64x64xf32>
    %c0_19 = arith.constant 0 : index
    %c0_20 = arith.constant 0 : index
    %c0_21 = arith.constant 0 : index
    %21 = vector.load %arg4[%c0_19, %c0_20, %c0_21] : memref<8x64x64xf32, #tpu.memory_space<vmem>>, vector<8x64x64xf32>
    %22 = arith.addf %20, %21 : vector<8x64x64xf32>
    %c0_22 = arith.constant 0 : index
    %c0_23 = arith.constant 0 : index
    %23 = vector.load %arg10[%c0_22, %c0_23] : memref<128x64xf32, #tpu.memory_space<vmem>>, vector<128x64xf32>
    %24 = vector.shape_cast %23 : vector<128x64xf32> to vector<1x128x64xf32>
    %25 = vector.broadcast %24 : vector<1x128x64xf32> to vector<8x128x64xf32>
    %cst_24 = arith.constant dense<0.000000e+00> : vector<8x128x64xf32>
    %26 = tpu.matmul %25, %22, %cst_24 {dimension_numbers = #tpu.dot_dimension_numbers<[2], [1], [1], [2], [0, 0, 0, 1, 1, 2], [0], [0]>} : vector<8x128x64xf32>, vector<8x64x64xf32>, vector<8x128x64xf32> -> vector<8x128x64xf32>
    %27 = vector.shape_cast %26 : vector<8x128x64xf32> to vector<1024x64xf32>
    %c0_25 = arith.constant 0 : index
    %c0_26 = arith.constant 0 : index
    %28 = vector.load %arg11[%c0_25, %c0_26] : memref<64x128xf32, #tpu.memory_space<vmem>>, vector<64x128xf32>
    %cst_27 = arith.constant dense<0.000000e+00> : vector<1024x128xf32>
    %29 = tpu.matmul %27, %28, %cst_27 {dimension_numbers = #tpu.dot_dimension_numbers<[1], [0], [0], [1], [0, 0, 1, 1], [], []>} : vector<1024x64xf32>, vector<64x128xf32>, vector<1024x128xf32> -> vector<1024x128xf32>
    %30 = vector.shape_cast %29 : vector<1024x128xf32> to vector<8x128x128xf32>
    %c0_28 = arith.constant 0 : index
    %c0_29 = arith.constant 0 : index
    %c0_30 = arith.constant 0 : index
    %31 = vector.load %arg5[%c0_28, %c0_29, %c0_30] : memref<8x128x128xf32, #tpu.memory_space<vmem>>, vector<8x128x128xf32>
    %32 = arith.addf %30, %31 : vector<8x128x128xf32>
    %c0_31 = arith.constant 0 : index
    %c0_32 = arith.constant 0 : index
    %c0_33 = arith.constant 0 : index
    %33 = vector.load %arg12[%c0_31, %c0_32, %c0_33] : memref<8x128x128xf32, #tpu.memory_space<vmem>>, vector<8x128x128xf32>
    tpu.vector_store %arg12[%c0_31, %c0_32, %c0_33], %32 {strides = array<i32>} : memref<8x128x128xf32, #tpu.memory_space<vmem>>, vector<8x128x128xf32>,
    return
  }
  func.func @transform_0(%arg0: i32) -> (i32, i32, i32) {
    %c0_i32 = arith.constant 0 : i32
    %c0_i32_0 = arith.constant 0 : i32
    %c0_i32_1 = arith.constant 0 : i32
    return %arg0, %c0_i32, %c0_i32_0 : i32, i32, i32
  }
  func.func @transform_1(%arg0: i32) -> (i32, i32, i32) {
    %c0_i32 = arith.constant 0 : i32
    %c0_i32_0 = arith.constant 0 : i32
    %c0_i32_1 = arith.constant 0 : i32
    return %arg0, %c0_i32, %c0_i32_0 : i32, i32, i32
  }
  func.func @transform_2(%arg0: i32) -> (i32, i32, i32) {
    %c0_i32 = arith.constant 0 : i32
    %c0_i32_0 = arith.constant 0 : i32
    %c0_i32_1 = arith.constant 0 : i32
    return %arg0, %c0_i32, %c0_i32_0 : i32, i32, i32
  }
  func.func @transform_3(%arg0: i32) -> (i32, i32, i32) {
    %c0_i32 = arith.constant 0 : i32
    %c0_i32_0 = arith.constant 0 : i32
    %c0_i32_1 = arith.constant 0 : i32
    return %arg0, %c0_i32, %c0_i32_0 : i32, i32, i32
  }
  func.func @transform_4(%arg0: i32) -> (i32, i32, i32) {
    %c0_i32 = arith.constant 0 : i32
    %c0_i32_0 = arith.constant 0 : i32
    %c0_i32_1 = arith.constant 0 : i32
    return %arg0, %c0_i32, %c0_i32_0 : i32, i32, i32
  }
  func.func @transform_5(%arg0: i32) -> (i32, i32) {
    %c0_i32 = arith.constant 0 : i32
    %c0_i32_0 = arith.constant 0 : i32
    %c0_i32_1 = arith.constant 0 : i32
    return %c0_i32, %c0_i32_0 : i32, i32
  }
  func.func @transform_6(%arg0: i32) -> (i32, i32) {
    %c0_i32 = arith.constant 0 : i32
    %c0_i32_0 = arith.constant 0 : i32
    %c0_i32_1 = arith.constant 0 : i32
    return %c0_i32, %c0_i32_0 : i32, i32
  }
  func.func @transform_7(%arg0: i32) -> (i32, i32) {
    %c0_i32 = arith.constant 0 : i32
    %c0_i32_0 = arith.constant 0 : i32
    %c0_i32_1 = arith.constant 0 : i32
    return %c0_i32, %c0_i32_0 : i32, i32
  }
  func.func @transform_8(%arg0: i32) -> (i32, i32) {
    %c0_i32 = arith.constant 0 : i32
    %c0_i32_0 = arith.constant 0 : i32
    %c0_i32_1 = arith.constant 0 : i32
    return %c0_i32, %c0_i32_0 : i32, i32
  }
  func.func @transform_9(%arg0: i32) -> (i32, i32) {
    %c0_i32 = arith.constant 0 : i32
    %c0_i32_0 = arith.constant 0 : i32
    %c0_i32_1 = arith.constant 0 : i32
    return %c0_i32, %c0_i32_0 : i32, i32
  }
  func.func @transform_10(%arg0: i32) -> (i32, i32) {
    %c0_i32 = arith.constant 0 : i32
    %c0_i32_0 = arith.constant 0 : i32
    %c0_i32_1 = arith.constant 0 : i32
    return %c0_i32, %c0_i32_0 : i32, i32
  }
  func.func @transform_11(%arg0: i32) -> (i32, i32, i32) {
    %c0_i32 = arith.constant 0 : i32
    %c0_i32_0 = arith.constant 0 : i32
    %c0_i32_1 = arith.constant 0 : i32
    return %arg0, %c0_i32, %c0_i32_0 : i32, i32, i32
  }
}

</mosaic_0001>

<bundles_post_ra>
// kernel: tpu_custom_call.1
= control target key start
LH: loop header
LB: loop body
LE: loop exit
PB: predicated region body
PF: predicated region fallthrough
CT: control target
= control target key end

     0   :  { %16 = vsyncpa [#allocation3], 0  ;;  %s9256_s0 = inlined_call_operand.vmem [shape: f32[8,16,16], index: 0, kind: input, shape index: {}]   ;;  %s9257_s1 = inlined_call_operand.vmem [shape: f32[8,16,16], index: 1, kind: input, shape index: {}]   ;;  %s9258_s2 = inlined_call_operand.vmem [shape: f32[8,32,32], index: 2, kind: input, shape index: {}]   ;;  %s9259_s3 = inlined_call_operand.vmem [shape: f32[8,64,64], index: 3, kind: input, shape index: {}]   ;;  %s9260_s4 = inlined_call_operand.hbm [shape: f32[8,128,128], index: 4, kind: input, shape index: {}, may-alias: {4,11}]   ;;  %s9261_s5 = inlined_call_operand.vmem [shape: f32[32,16], index: 5, kind: input, shape index: {}]   ;;  %s9262_s6 = inlined_call_operand.vmem [shape: f32[16,32], index: 6, kind: input, shape index: {}]   ;;  %s9263_s7 = inlined_call_operand.vmem [shape: f32[64,32], index: 7, kind: input, shape index: {}]   ;;  %s9264_s8 = inlined_call_operand.vmem [shape: f32[32,64], index: 8, kind: input, shape index: {}]   ;;  %s9265_s9 = inlined_call_operand.vmem [shape: f32[128,64], index: 9, kind: input, shape index: {}]   ;;  %s9266_s10 = inlined_call_operand.vmem [shape: f32[64,128], index: 10, kind: input, shape index: {}]   ;;  %s9267_s11 = inlined_call_operand.hbm [shape: f32[8,128,128], index: 11, kind: output, shape index: {}, may-alias: {4,11}]  }
   0x1   :  { %17 = vsyncpa [#allocation4], 0  ;;  %s7740_s17 = smov [#allocation2]   ;;  %s7692_s21 = scalar_lea.hbm %s9260_s4, 16384 }
   0x2   :  { %s31_s18 = sshll.u32 %s7740_s17, 4  ;;  %p7693_p0 = scmp.ne.s32.totalorder %s9260_s4, %s7692_s21  ;;  %s32_s18 = int_to_ptr.vmem [resolvable:$true] %s31_s18 }
   0x3   :  { %p7696_p1 = scmp.lt.u32.totalorder %s7692_s21, %s9260_s4 }
   0x5   :  { %p7698_p2 = pnand %p7696_p1, %p7693_p0 }
   0x7   :  { %7701 = shalt.err (!%p7698_p2)
}
   0x8   :  { %s7702_s26 = scalar_lea.vmem %s32_s18, 16384  ;;  %p7707_p4 = scmp.lt.s32.totalorder %s32_s18, %s32_s18 }
   0x9   :  { %p7703_p3 = scmp.ne.s32.totalorder %s32_s18, %s7702_s26  ;;  %p7708_p5 = scmp.lt.s32.totalorder %s7702_s26, %s7702_s26 }
   0xb   :  { %p7709_p6 = por %p7708_p5, %p7707_p4 }
   0xd   :  { %p7710_p7 = pnand %p7709_p6, %p7703_p3 }
   0xf   :  { %7713 = shalt.err (!%p7710_p7)
}
  0x10   :  { %s7741_s27 = smov 128   ;;  %s7742_s28 = smov 8  }
  0x11   :  { %37 = dma.hbm_to_vmem [thread:$0]  %s9260_s4, 16384, %s32_s18, [#allocation3], %s7741_s27, %s7741_s27, %s7742_s28  }
  0x12   :  { %7736 = dma.done.wait [#allocation3], 16384  }
  0x13   :  { %7737 = vsyncadd [#allocation3], 4294950912  ;;  %vm105_vm0 = vcmask 130048   ;;  %v53_v0 = vld [vmem:[%s9256_s0] sm:$0xff]  ;;  %v54_v1 = vld [vmem:[%s9256_s0 + $0x8] sm:$0xff]  ;;  %vm1193_vm1 = vcmask 261120  }
  0x14   :  { %v69_v2 = vld [vmem:[%s9257_s1] sm:$0xff]  ;;  %v70_v3 = vld [vmem:[%s9257_s1 + $0x8] sm:$0xff]  ;;  %v55_v7 = vld [vmem:[%s9256_s0 + $0x10] sm:$0xff]  ;;  %vm2783_vm2 = vcmask 523264  }
  0x15   :  { %v85_v4 = vadd.f32 %v69_v2, %v53_v0  ;;  %v7834_v5 = vld [vmem:[%s9261_s5] sm:$0xff]  ;;  %v86_v6 = vadd.f32 %v70_v3, %v54_v1  ;;  %v56_v8 = vld [vmem:[%s9256_s0 + $0x18] sm:$0xff]  ;;  %v71_v9 = vld [vmem:[%s9257_s1 + $0x10] sm:$0xff] }
  0x16   :  { %6516 = vmatprep.mubr.msk.f32.mxu0 %vm105_vm0, %v7834_v5  ;;  %6526 = vmatprep.mubr.msk.f32.mxu1 %vm105_vm0, %v7834_v5  ;;  %v72_v10 = vld [vmem:[%s9257_s1 + $0x18] sm:$0xff]  ;;  %v87_v12 = vadd.f32 %v71_v9, %v55_v7  ;;  %v57_v14 = vld [vmem:[%s9256_s0 + $0x20] sm:$0xff]  ;;  %v58_v15 = vld [vmem:[%s9256_s0 + $0x28] sm:$0xff] }
  0x17   :  { %v7436_v11 = vpack.c.bf16 %v86_v6, %v85_v4  ;;  %v88_v13 = vadd.f32 %v72_v10, %v56_v8  ;;  %v73_v16 = vld [vmem:[%s9257_s1 + $0x20] sm:$0xff]  ;;  %v7864_v17 = vld [vmem:[%s9261_s5 + $0x8] sm:$0xff]  ;;  %v59_v20 = vld [vmem:[%s9256_s0 + $0x30] sm:$0xff] }
  0x18   :  { %v74_v18 = vld [vmem:[%s9257_s1 + $0x28] sm:$0xff]  ;;  %v89_v19 = vadd.f32 %v73_v16, %v57_v14  ;;  %v60_v21 = vld [vmem:[%s9256_s0 + $0x38] sm:$0xff]  ;;  %v7878_v22 = vld [vmem:[%s9261_s5 + $0x10] sm:$0xff] }
  0x19   :  { %7437 = vmatprep.subr.bf16.mxu0 %v7436_v11  ;;  %v7440_v23 = vpack.c.bf16 %v88_v13, %v87_v12  ;;  %v90_v24 = vadd.f32 %v74_v18, %v58_v15  ;;  %v75_v25 = vld [vmem:[%s9257_s1 + $0x30] sm:$0xff]  ;;  %v76_v26 = vld [vmem:[%s9257_s1 + $0x38] sm:$0xff]  ;;  %v61_v27 = vld [vmem:[%s9256_s0 + $0x40] sm:$0xff] }
  0x1a   :  { %7439 = vmatpush3.bf16.msra.mxu0 %v7436_v11  ;;  %v91_v28 = vadd.f32 %v75_v25, %v59_v20  ;;  %v92_v29 = vadd.f32 %v76_v26, %v60_v21  ;;  %v62_v30 = vld [vmem:[%s9256_s0 + $0x48] sm:$0xff]  ;;  %v77_v31 = vld [vmem:[%s9257_s1 + $0x40] sm:$0xff]  ;;  %v63_v36 = vld [vmem:[%s9256_s0 + $0x50] sm:$0xff] }
  0x1b   :  { %v78_v32 = vld [vmem:[%s9257_s1 + $0x48] sm:$0xff]  ;;  %7441 = vmatprep.subr.bf16.mxu1 %v7440_v23  ;;  %v7444_v33 = vpack.c.bf16 %v90_v24, %v89_v19  ;;  %v93_v34 = vadd.f32 %v77_v31, %v61_v27  ;;  %v64_v37 = vld [vmem:[%s9256_s0 + $0x58] sm:$0xff]  ;;  %v79_v38 = vld [vmem:[%s9257_s1 + $0x50] sm:$0xff] }
  0x1c   :  { %v94_v35 = vadd.f32 %v78_v32, %v62_v30  ;;  %v7910_v39 = vld [vmem:[%s9261_s5 + $0x18] sm:$0xff]  ;;  %7443 = vmatpush3.bf16.msra.mxu1 %v7440_v23  ;;  %v7448_v40 = vpack.c.bf16 %v92_v29, %v91_v28  ;;  %v95_v42 = vadd.f32 %v79_v38, %v63_v36  ;;  %v65_v43 = vld [vmem:[%s9256_s0 + $0x60] sm:$0xff]  ;;  %v66_v44 = vld [vmem:[%s9256_s0 + $0x68] sm:$0xff] }
  0x1d   :  { %v80_v41 = vld [vmem:[%s9257_s1 + $0x58] sm:$0xff]  ;;  %6517 = vmatmul.mubr.msk.f32.vlgmr.msra.gmra.mrb[0].mxu0 %vm105_vm0, %v7864_v17  ;;  %7445 = vmatprep.subr.bf16.mxu0 %v7444_v33  ;;  %v81_v47 = vld [vmem:[%s9257_s1 + $0x60] sm:$0xff]  ;;  %v82_v48 = vld [vmem:[%s9257_s1 + $0x68] sm:$0xff] }
  0x1e   :  { %v7452_v45 = vpack.c.bf16 %v94_v35, %v93_v34  ;;  %v96_v46 = vadd.f32 %v80_v41, %v64_v37  ;;  %v67_v49 = vld [vmem:[%s9256_s0 + $0x70] sm:$0xff]  ;;  %6519 = vmatprep.mubr.msk.f32.mxu0 %vm105_vm0, %v7878_v22  ;;  %7447 = vmatpush3.bf16.msra.mxu0 %v7444_v33  ;;  %v68_v50 = vld [vmem:[%s9256_s0 + $0x78] sm:$0xff]  ;;  %v97_v54 = vadd.f32 %v81_v47, %v65_v43  ;;  %v798_v60 = vld [vmem:[%s9262_s6] sm:$0xff] }
  0x1f   :  { %v83_v51 = vld [vmem:[%s9257_s1 + $0x70] sm:$0xff]  ;;  %v84_v52 = vld [vmem:[%s9257_s1 + $0x78] sm:$0xff]  ;;  %6527 = vmatmul.mubr.msk.f32.vlgmr.msra.gmra.mrb[0].mxu1 %vm105_vm0, %v7864_v17  ;;  %7449 = vmatprep.subr.bf16.mxu1 %v7448_v40  ;;  %v98_v55 = vadd.f32 %v82_v48, %v66_v44  ;;  %v799_v61 = vld [vmem:[%s9262_s6 + $0x8] sm:$0xff] }
  0x20   :  { %v7456_v53 = vpack.c.bf16 %v96_v46, %v95_v42  ;;  %6529 = vmatprep.mubr.msk.f32.mxu1 %vm105_vm0, %v7878_v22  ;;  %7451 = vmatpush3.bf16.msra.mxu1 %v7448_v40  ;;  %v99_v56 = vadd.f32 %v83_v51, %v67_v49  ;;  %v100_v57 = vadd.f32 %v84_v52, %v68_v50  ;;  %v8040_v31 = vld [vmem:[%s9263_s7] sm:$0xff]  ;;  %v1122_v32 = vld [vmem:[%s9258_s2 + $0x8] sm:$0xff]  ;;  %v1124_v38 = vld [vmem:[%s9258_s2 + $0x18] sm:$0xff] }
  0x21   :  { %6520 = vmatmul.mubr.msk.f32.gmra.mrb[2].mxu0 %vm105_vm0, %v7910_v39  ;;  %7453 = vmatprep.subr.bf16.mxu0 %v7452_v45  ;;  %v7460_v58 = vpack.c.bf16 %v98_v55, %v97_v54  ;;  %v7468_v62 = vpack.c.bf16 %v799_v61, %v798_v60  ;;  %v1121_v33 = vld [vmem:[%s9258_s2] sm:$0xff]  ;;  %v1128_v52 = vld [vmem:[%s9258_s2 + $0x38] sm:$0xff]  ;;  %v1127_v54 = vld [vmem:[%s9258_s2 + $0x30] sm:$0xff] }
  0x22   :  { %6536 = vmatprep.mubr.msk.f32.mxu0 %vm105_vm0, %v7834_v5  ;;  %7457 = vmatprep.subr.bf16.mxu1 %v7456_v53  ;;  %v7464_v59 = vpack.c.bf16 %v100_v57, %v99_v56  ;;  %v1125_v46 = vld [vmem:[%s9258_s2 + $0x20] sm:$0xff]  ;;  %v8078_v55 = vld [vmem:[%s9263_s7 + $0x10] sm:$0xff]  ;;  %v1130_v61 = vld [vmem:[%s9258_s2 + $0x48] sm:$0xff] }
  0x23   :  { %6530 = vmatmul.mubr.msk.f32.gmra.mrb[2].mxu1 %vm105_vm0, %v7910_v39 }
  0x24   :  { %6546 = vmatprep.mubr.msk.f32.mxu1 %vm105_vm0, %v7834_v5 }
  0x25   :  { %6537 = vmatmul.mubr.msk.f32.vlgmr.msra.gmra.mrb[4].mxu0 %vm105_vm0, %v7864_v17 }
  0x26   :  { %6539 = vmatprep.mubr.msk.f32.mxu0 %vm105_vm0, %v7878_v22  ;;  %7455 = vmatpush3.bf16.msra.mxu0 %v7452_v45  ;;  %v1126_v45 = vld [vmem:[%s9258_s2 + $0x28] sm:$0xff] }
  0x27   :  { %6547 = vmatmul.mubr.msk.f32.vlgmr.msra.gmra.mrb[4].mxu1 %vm105_vm0, %v7864_v17  ;;  %7461 = vmatprep.subr.bf16.mxu0 %v7460_v58 }
  0x28   :  { %6549 = vmatprep.mubr.msk.f32.mxu1 %vm105_vm0, %v7878_v22  ;;  %7459 = vmatpush3.bf16.msra.mxu1 %v7456_v53  ;;  %v8070_v53 = vld [vmem:[%s9263_s7 + $0x8] sm:$0xff] }
  0x29   :  { %6540 = vmatmul.mubr.msk.f32.gmra.mrb[6].mxu0 %vm105_vm0, %v7910_v39  ;;  %7465 = vmatprep.subr.bf16.mxu1 %v7464_v59 }
  0x2a   :  { %6556 = vmatprep.mubr.msk.f32.mxu0 %vm105_vm0, %v7834_v5 }
  0x2b   :  { %6550 = vmatmul.mubr.msk.f32.gmra.mrb[6].mxu1 %vm105_vm0, %v7910_v39 }
  0x2c   :  { %6566 = vmatprep.mubr.msk.f32.mxu1 %vm105_vm0, %v7834_v5 }
  0x2d   :  { %6557 = vmatmul.mubr.msk.f32.vlgmr.msra.gmra.mrb[8].mxu0 %vm105_vm0, %v7864_v17 }
  0x2e   :  { %6559 = vmatprep.mubr.msk.f32.mxu0 %vm105_vm0, %v7878_v22  ;;  %7463 = vmatpush3.bf16.msra.mxu0 %v7460_v58 }
  0x2f   :  { %6567 = vmatmul.mubr.msk.f32.vlgmr.msra.gmra.mrb[8].mxu1 %vm105_vm0, %v7864_v17  ;;  %7469 = vmatprep.subr.bf16.mxu0 %v7468_v62 }
  0x30   :  { %6569 = vmatprep.mubr.msk.f32.mxu1 %vm105_vm0, %v7878_v22  ;;  %7467 = vmatpush3.bf16.msra.mxu1 %v7464_v59 }
  0x31   :  { %6560 = vmatmul.mubr.msk.f32.gmra.mrb[10].mxu0 %vm105_vm0, %v7910_v39 }
  0x32   :  { %6576 = vmatprep.mubr.msk.f32.mxu0 %vm105_vm0, %v7834_v5 }
  0x33   :  { %6570 = vmatmul.mubr.msk.f32.gmra.mrb[10].mxu1 %vm105_vm0, %v7910_v39 }
  0x34   :  { %6586 = vmatprep.mubr.msk.f32.mxu1 %vm105_vm0, %v7834_v5 }
  0x35   :  { %6577 = vmatmul.mubr.msk.f32.vlgmr.msra.gmra.mrb[12].mxu0 %vm105_vm0, %v7864_v17 }
  0x36   :  { %6579 = vmatprep.mubr.msk.f32.mxu0 %vm105_vm0, %v7878_v22  ;;  %7471 = vmatpush3.bf16.msra.mxu0 %v7468_v62  ;;  %v8090_v62 = vld [vmem:[%s9263_s7 + $0x18] sm:$0xff] }
  0x37   :  { %6587 = vmatmul.mubr.msk.f32.vlgmr.msra.gmra.mrb[12].mxu1 %vm105_vm0, %v7864_v17 }
  0x38   :  { %6589 = vmatprep.mubr.msk.f32.mxu1 %vm105_vm0, %v7878_v22 }
  0x39   :  { %6580 = vmatmul.mubr.msk.f32.gmra.mrb[14].mxu0 %vm105_vm0, %v7910_v39 }
  0x3b   :  { %6590 = vmatmul.mubr.msk.f32.gmra.mrb[14].mxu1 %vm105_vm0, %v7910_v39  ;;  %v1123_v39 = vld [vmem:[%s9258_s2 + $0x10] sm:$0xff] }
  0x3c   :  { %6652 = vmatprep.mubr.msk.f32.mxu1 %vm1193_vm1, %v8040_v31 }
  0xf0   :  { %v6518_v63 = vpop.f32.mrb[0].mxu0 }
  0xf1   :  { %v184_v0 = vpop.f32.mrb[1].mxu0 }
  0xf2   :  { %6596 = vmatprep.mubr.msk.f32.mxu0 %vm105_vm0, %v184_v0  ;;  %v6528_v1 = vpop.f32.mrb[0].mxu1  ;;  %v8098_v0 = vld [vmem:[%s9263_s7 + $0x20] sm:$0xff] }
  0xf3   :  { %6597 = vmatmul.mubr.msk.f32.vlgmr.msra.gmra.mrb[16].mxu0 %vm105_vm0, %v6518_v63  ;;  %v269_v2 = vpop.f32.mrb[1].mxu1  ;;  %v1129_v63 = vld [vmem:[%s9258_s2 + $0x40] sm:$0xff] }
  0xf4   :  { %v6521_v3 = vpop.f32.mrb[2].mxu0 }
  0xf5   :  { %v194_v4 = vpop.f32.mrb[3].mxu0 }
  0xf6   :  { %6599 = vmatprep.mubr.msk.f32.mxu0 %vm105_vm0, %v194_v4  ;;  %v6531_v5 = vpop.f32.mrb[2].mxu1 }
  0xf7   :  { %6600 = vmatmul.mubr.msk.f32.gmra.mrb[18].mxu0 %vm105_vm0, %v6521_v3  ;;  %v279_v6 = vpop.f32.mrb[3].mxu1 }
  0xf8   :  { %6602 = vmatprep.mubr.msk.f32.mxu0 %vm105_vm0, %v269_v2  ;;  %v6538_v7 = vpop.f32.mrb[4].mxu0 }
  0xf9   :  { %v354_v8 = vpop.f32.mrb[5].mxu0 }
  0xfa   :  { %v6548_v9 = vpop.f32.mrb[4].mxu1 }
  0xfb   :  { %6603 = vmatmul.mubr.msk.f32.gmra.mrb[20].mxu0 %vm105_vm0, %v6528_v1  ;;  %v439_v10 = vpop.f32.mrb[5].mxu1 }
  0xfc   :  { %6605 = vmatprep.mubr.msk.f32.mxu0 %vm105_vm0, %v279_v6  ;;  %v6541_v11 = vpop.f32.mrb[6].mxu0  ;;  %v1132_v6 = vld [vmem:[%s9258_s2 + $0x58] sm:$0xff] }
  0xfd   :  { %v364_v12 = vpop.f32.mrb[7].mxu0 }
  0xfe   :  { %v6551_v13 = vpop.f32.mrb[6].mxu1 }
  0xff   :  { %6606 = vmatmul.mubr.msk.f32.gmra.mrb[22].mxu0 %vm105_vm0, %v6531_v5  ;;  %v449_v14 = vpop.f32.mrb[7].mxu1 }
 0x100   :  { %6608 = vmatprep.mubr.msk.f32.mxu0 %vm105_vm0, %v354_v8  ;;  %v6558_v15 = vpop.f32.mrb[8].mxu0  ;;  %v1131_v8 = vld [vmem:[%s9258_s2 + $0x50] sm:$0xff] }
 0x101   :  { %v524_v16 = vpop.f32.mrb[9].mxu0 }
 0x102   :  { %v6568_v17 = vpop.f32.mrb[8].mxu1 }
 0x103   :  { %6609 = vmatmul.mubr.msk.f32.gmra.mrb[24].mxu0 %vm105_vm0, %v6538_v7  ;;  %v609_v18 = vpop.f32.mrb[9].mxu1  ;;  %v8110_v7 = vld [vmem:[%s9263_s7 + $0x28] sm:$0xff] }
 0x104   :  { %6611 = vmatprep.mubr.msk.f32.mxu0 %vm105_vm0, %v364_v12  ;;  %v6561_v19 = vpop.f32.mrb[10].mxu0 }
 0x105   :  { %v534_v20 = vpop.f32.mrb[11].mxu0 }
 0x106   :  { %v6571_v21 = vpop.f32.mrb[10].mxu1 }
 0x107   :  { %6612 = vmatmul.mubr.msk.f32.gmra.mrb[26].mxu0 %vm105_vm0, %v6541_v11  ;;  %v619_v22 = vpop.f32.mrb[11].mxu1 }
 0x108   :  { %6614 = vmatprep.mubr.msk.f32.mxu0 %vm105_vm0, %v439_v10  ;;  %v6578_v23 = vpop.f32.mrb[12].mxu0 }
 0x109   :  { %v694_v24 = vpop.f32.mrb[13].mxu0 }
 0x10a   :  { %v6588_v25 = vpop.f32.mrb[12].mxu1 }
 0x10b   :  { %6615 = vmatmul.mubr.msk.f32.gmra.mrb[28].mxu0 %vm105_vm0, %v6548_v9  ;;  %v779_v26 = vpop.f32.mrb[13].mxu1  ;;  %v8118_v9 = vld [vmem:[%s9263_s7 + $0x30] sm:$0xff] }
 0x10c   :  { %6617 = vmatprep.mubr.msk.f32.mxu0 %vm105_vm0, %v449_v14  ;;  %v6581_v27 = vpop.f32.mrb[14].mxu0 }
 0x10d   :  { %v704_v28 = vpop.f32.mrb[15].mxu0 }
 0x10e   :  { %v6591_v29 = vpop.f32.mrb[14].mxu1 }
 0x10f   :  { %6618 = vmatmul.mubr.msk.f32.gmra.mrb[30].mxu0 %vm105_vm0, %v6551_v13  ;;  %v789_v30 = vpop.f32.mrb[15].mxu1 }
 0x110   :  { %6620 = vmatprep.mubr.msk.f32.mxu0 %vm105_vm0, %v524_v16  ;;  %v8130_v16 = vld [vmem:[%s9263_s7 + $0x38] sm:$0xff] }
 0x113   :  { %6621 = vmatmul.mubr.msk.f32.gmra.mrb[32].mxu0 %vm105_vm0, %v6558_v15  ;;  %v1134_v15 = vld [vmem:[%s9258_s2 + $0x68] sm:$0xff] }
 0x114   :  { %6623 = vmatprep.mubr.msk.f32.mxu0 %vm105_vm0, %v534_v20 }
 0x117   :  { %6624 = vmatmul.mubr.msk.f32.gmra.mrb[34].mxu0 %vm105_vm0, %v6561_v19 }
 0x118   :  { %6626 = vmatprep.mubr.msk.f32.mxu0 %vm105_vm0, %v609_v18 }
 0x11b   :  { %6627 = vmatmul.mubr.msk.f32.gmra.mrb[36].mxu0 %vm105_vm0, %v6568_v17  ;;  %v1133_v17 = vld [vmem:[%s9258_s2 + $0x60] sm:$0xff] }
 0x11c   :  { %6629 = vmatprep.mubr.msk.f32.mxu0 %vm105_vm0, %v619_v22 }
 0x11f   :  { %6630 = vmatmul.mubr.msk.f32.gmra.mrb[38].mxu0 %vm105_vm0, %v6571_v21 }
 0x120   :  { %6632 = vmatprep.mubr.msk.f32.mxu0 %vm105_vm0, %v694_v24  ;;  %v1135_v24 = vld [vmem:[%s9258_s2 + $0x70] sm:$0xff] }
 0x123   :  { %6633 = vmatmul.mubr.msk.f32.gmra.mrb[40].mxu0 %vm105_vm0, %v6578_v23  ;;  %v1136_v23 = vld [vmem:[%s9258_s2 + $0x78] sm:$0xff] }
 0x124   :  { %6635 = vmatprep.mubr.msk.f32.mxu0 %vm105_vm0, %v704_v28 }
 0x127   :  { %6636 = vmatmul.mubr.msk.f32.gmra.mrb[42].mxu0 %vm105_vm0, %v6581_v27 }
 0x128   :  { %6638 = vmatprep.mubr.msk.f32.mxu0 %vm105_vm0, %v779_v26 }
 0x12b   :  { %6639 = vmatmul.mubr.msk.f32.gmra.mrb[44].mxu0 %vm105_vm0, %v6588_v25 }
 0x12c   :  { %6641 = vmatprep.mubr.msk.f32.mxu0 %vm105_vm0, %v789_v30  ;;  %v1138_v30 = vld [vmem:[%s9258_s2 + $0x88] sm:$0xff] }
 0x12f   :  { %6642 = vmatmul.mubr.msk.f32.gmra.mrb[46].mxu0 %vm105_vm0, %v6591_v29 }
 0x130   :  { %6732 = vmatprep.mubr.msk.f32.mxu0 %vm1193_vm1, %v8040_v31 }
 0x1c6   :  { %v6598_v34 = vpop.f32.mrb[16].mxu0 }
 0x1c7   :  { %v1154_v35 = vadd.f32 %v6598_v34, %v1122_v32  ;;  %v962_v36 = vpop.f32.mrb[17].mxu0  ;;  %v1137_v32 = vld [vmem:[%s9258_s2 + $0x80] sm:$0xff] }
 0x1c8   :  { %v1153_v37 = vadd.f32 %v1121_v33, %v962_v36 }
 0x1ca   :  { %v7472_v40 = vpack.c.bf16 %v1154_v35, %v1153_v37  ;;  %v6601_v41 = vpop.f32.mrb[18].mxu0 }
 0x1cb   :  { %v1156_v42 = vadd.f32 %v6601_v41, %v1124_v38  ;;  %v972_v43 = vpop.f32.mrb[19].mxu0  ;;  %v1140_v38 = vld [vmem:[%s9258_s2 + $0x98] sm:$0xff] }
 0x1cc   :  { %v1155_v44 = vadd.f32 %v1123_v39, %v972_v43  ;;  %7473 = vmatprep.subr.bf16.mxu1 %v7472_v40  ;;  %v1139_v39 = vld [vmem:[%s9258_s2 + $0x90] sm:$0xff] }
 0x1cd   :  { %7475 = vmatpush3.bf16.msra.mxu1 %v7472_v40 }
 0x1ce   :  { %v7476_v47 = vpack.c.bf16 %v1156_v42, %v1155_v44  ;;  %v6604_v48 = vpop.f32.mrb[20].mxu0 }
 0x1cf   :  { %v1158_v49 = vadd.f32 %v6604_v48, %v1126_v45  ;;  %v982_v50 = vpop.f32.mrb[21].mxu0  ;;  %v1142_v45 = vld [vmem:[%s9258_s2 + $0xa8] sm:$0xff] }
 0x1d0   :  { %7477 = vmatprep.subr.bf16.mxu1 %v7476_v47  ;;  %v1157_v51 = vadd.f32 %v1125_v46, %v982_v50  ;;  %v1141_v46 = vld [vmem:[%s9258_s2 + $0xa0] sm:$0xff] }
 0x1d1   :  { %7479 = vmatpush3.bf16.msra.mxu1 %v7476_v47 }
 0x1d2   :  { %v7480_v56 = vpack.c.bf16 %v1158_v49, %v1157_v51  ;;  %v6607_v57 = vpop.f32.mrb[22].mxu0 }
 0x1d3   :  { %v1160_v58 = vadd.f32 %v6607_v57, %v1128_v52  ;;  %v992_v59 = vpop.f32.mrb[23].mxu0  ;;  %v1144_v52 = vld [vmem:[%s9258_s2 + $0xb8] sm:$0xff] }
 0x1d4   :  { %6653 = vmatmul.mubr.msk.f32.vlgmr.msra.gmra.mrb[16].mxu1 %vm1193_vm1, %v8070_v53  ;;  %v1159_v60 = vadd.f32 %v1127_v54, %v992_v59  ;;  %7481 = vmatprep.subr.bf16.mxu1 %v7480_v56  ;;  %v1143_v54 = vld [vmem:[%s9258_s2 + $0xb0] sm:$0xff] }
 0x1d5   :  { %6655 = vmatprep.mubr.msk.f32.mxu1 %vm1193_vm1, %v8078_v55  ;;  %7483 = vmatpush3.bf16.msra.mxu1 %v7480_v56 }
 0x1d6   :  { %v7484_v1 = vpack.c.bf16 %v1160_v58, %v1159_v60  ;;  %v6610_v2 = vpop.f32.mrb[24].mxu0 }
 0x1d7   :  { %v1162_v3 = vadd.f32 %v6610_v2, %v1130_v61  ;;  %v1002_v4 = vpop.f32.mrb[25].mxu0  ;;  %v1146_v61 = vld [vmem:[%s9258_s2 + $0xc8] sm:$0xff] }
 0x1d8   :  { %6656 = vmatmul.mubr.msk.f32.gmra.mrb[18].mxu1 %vm1193_vm1, %v8090_v62  ;;  %7485 = vmatprep.subr.bf16.mxu1 %v7484_v1  ;;  %v1161_v5 = vadd.f32 %v1129_v63, %v1002_v4  ;;  %v1145_v63 = vld [vmem:[%s9258_s2 + $0xc0] sm:$0xff] }
 0x1d9   :  { %6658 = vmatprep.mubr.msk.f32.mxu1 %vm1193_vm1, %v8098_v0  ;;  %7487 = vmatpush3.bf16.msra.mxu1 %v7484_v1 }
 0x1da   :  { %v7488_v10 = vpack.c.bf16 %v1162_v3, %v1161_v5  ;;  %v6613_v11 = vpop.f32.mrb[26].mxu0 }
 0x1db   :  { %v1164_v12 = vadd.f32 %v6613_v11, %v1132_v6  ;;  %v1012_v13 = vpop.f32.mrb[27].mxu0  ;;  %v1148_v6 = vld [vmem:[%s9258_s2 + $0xd8] sm:$0xff] }
 0x1dc   :  { %6659 = vmatmul.mubr.msk.f32.gmra.mrb[20].mxu1 %vm1193_vm1, %v8110_v7  ;;  %v1163_v14 = vadd.f32 %v1131_v8, %v1012_v13  ;;  %7489 = vmatprep.subr.bf16.mxu1 %v7488_v10  ;;  %v1147_v8 = vld [vmem:[%s9258_s2 + $0xd0] sm:$0xff] }
 0x1dd   :  { %6661 = vmatprep.mubr.msk.f32.mxu1 %vm1193_vm1, %v8118_v9 }
 0x1de   :  { %v7492_v18 = vpack.c.bf16 %v1164_v12, %v1163_v14  ;;  %v6616_v19 = vpop.f32.mrb[28].mxu0 }
 0x1df   :  { %v1166_v20 = vadd.f32 %v6616_v19, %v1134_v15  ;;  %v1022_v21 = vpop.f32.mrb[29].mxu0  ;;  %v1150_v15 = vld [vmem:[%s9258_s2 + $0xe8] sm:$0xff] }
 0x1e0   :  { %6662 = vmatmul.mubr.msk.f32.gmra.mrb[22].mxu1 %vm1193_vm1, %v8130_v16  ;;  %v1165_v22 = vadd.f32 %v1133_v17, %v1022_v21  ;;  %v1149_v17 = vld [vmem:[%s9258_s2 + $0xe0] sm:$0xff] }
 0x1e1   :  { %6672 = vmatprep.mubr.msk.f32.mxu1 %vm1193_vm1, %v8040_v31 }
 0x1e2   :  { %v7496_v25 = vpack.c.bf16 %v1166_v20, %v1165_v22  ;;  %v6619_v26 = vpop.f32.mrb[30].mxu0 }
 0x1e3   :  { %v1168_v27 = vadd.f32 %v6619_v26, %v1136_v23  ;;  %v1032_v28 = vpop.f32.mrb[31].mxu0  ;;  %v1152_v23 = vld [vmem:[%s9258_s2 + $0xf8] sm:$0xff] }
 0x1e4   :  { %6673 = vmatmul.mubr.msk.f32.vlgmr.msra.gmra.mrb[24].mxu1 %vm1193_vm1, %v8070_v53  ;;  %v1167_v29 = vadd.f32 %v1135_v24, %v1032_v28  ;;  %v1151_v24 = vld [vmem:[%s9258_s2 + $0xf0] sm:$0xff] }
 0x1e5   :  { %6675 = vmatprep.mubr.msk.f32.mxu1 %vm1193_vm1, %v8078_v55  ;;  %7491 = vmatpush3.bf16.msra.mxu1 %v7488_v10 }
 0x1e6   :  { %7493 = vmatprep.subr.bf16.mxu1 %v7492_v18  ;;  %v7500_v33 = vpack.c.bf16 %v1168_v27, %v1167_v29  ;;  %v6622_v34 = vpop.f32.mrb[32].mxu0 }
 0x1e7   :  { %v1170_v35 = vadd.f32 %v6622_v34, %v1138_v30  ;;  %v1042_v36 = vpop.f32.mrb[33].mxu0 }
 0x1e8   :  { %6676 = vmatmul.mubr.msk.f32.gmra.mrb[26].mxu1 %vm1193_vm1, %v8090_v62  ;;  %v1169_v37 = vadd.f32 %v1137_v32, %v1042_v36  ;;  %v2058_v32 = vld [vmem:[%s9264_s8] sm:$0xff]  ;;  %v2061_v36 = vld [vmem:[%s9264_s8 + $0x18] sm:$0xff] }
 0x1e9   :  { %6678 = vmatprep.mubr.msk.f32.mxu1 %vm1193_vm1, %v8098_v0  ;;  %7495 = vmatpush3.bf16.msra.mxu1 %v7492_v18 }
 0x1ea   :  { %7497 = vmatprep.subr.bf16.mxu1 %v7496_v25  ;;  %v7504_v40 = vpack.c.bf16 %v1170_v35, %v1169_v37  ;;  %v6625_v41 = vpop.f32.mrb[34].mxu0  ;;  %v2060_v35 = vld [vmem:[%s9264_s8 + $0x10] sm:$0xff] }
 0x1eb   :  { %v1172_v42 = vadd.f32 %v6625_v41, %v1140_v38  ;;  %v1052_v43 = vpop.f32.mrb[35].mxu0  ;;  %v7540_v37 = vpack.c.bf16 %v2061_v36, %v2060_v35 }
 0x1ec   :  { %6679 = vmatmul.mubr.msk.f32.gmra.mrb[28].mxu1 %vm1193_vm1, %v8110_v7  ;;  %v1171_v44 = vadd.f32 %v1139_v39, %v1052_v43  ;;  %7505 = vmatprep.subr.bf16.mxu0 %v7504_v40 }
 0x1ed   :  { %6681 = vmatprep.mubr.msk.f32.mxu1 %vm1193_vm1, %v8118_v9  ;;  %7507 = vmatpush3.bf16.msra.mxu0 %v7504_v40 }
 0x1ee   :  { %v7508_v47 = vpack.c.bf16 %v1172_v42, %v1171_v44  ;;  %v6628_v48 = vpop.f32.mrb[36].mxu0 }
 0x1ef   :  { %v1174_v49 = vadd.f32 %v6628_v48, %v1142_v45  ;;  %v1062_v50 = vpop.f32.mrb[37].mxu0 }
 0x1f0   :  { %6682 = vmatmul.mubr.msk.f32.gmra.mrb[30].mxu1 %vm1193_vm1, %v8130_v16  ;;  %7509 = vmatprep.subr.bf16.mxu0 %v7508_v47  ;;  %v1173_v51 = vadd.f32 %v1141_v46, %v1062_v50 }
 0x1f1   :  { %6692 = vmatprep.mubr.msk.f32.mxu1 %vm1193_vm1, %v8040_v31  ;;  %7511 = vmatpush3.bf16.msra.mxu0 %v7508_v47 }
 0x1f2   :  { %v7512_v56 = vpack.c.bf16 %v1174_v49, %v1173_v51  ;;  %v6631_v57 = vpop.f32.mrb[38].mxu0 }
 0x1f3   :  { %v1176_v58 = vadd.f32 %v6631_v57, %v1144_v52  ;;  %v1072_v59 = vpop.f32.mrb[39].mxu0 }
 0x1f4   :  { %6693 = vmatmul.mubr.msk.f32.vlgmr.msra.gmra.mrb[32].mxu1 %vm1193_vm1, %v8070_v53  ;;  %6733 = vmatmul.mubr.msk.f32.vlgmr.msra.gmra.mrb[48].mxu0 %vm1193_vm1, %v8070_v53  ;;  %v1175_v60 = vadd.f32 %v1143_v54, %v1072_v59 }
 0x1f5   :  { %6695 = vmatprep.mubr.msk.f32.mxu1 %vm1193_vm1, %v8078_v55  ;;  %7499 = vmatpush3.bf16.msra.mxu1 %v7496_v25 }
 0x1f6   :  { %7501 = vmatprep.subr.bf16.mxu1 %v7500_v33  ;;  %6735 = vmatprep.mubr.msk.f32.mxu0 %vm1193_vm1, %v8078_v55  ;;  %v7516_v1 = vpack.c.bf16 %v1176_v58, %v1175_v60  ;;  %v6634_v2 = vpop.f32.mrb[40].mxu0 }
 0x1f7   :  { %v1178_v3 = vadd.f32 %v6634_v2, %v1146_v61  ;;  %v1082_v4 = vpop.f32.mrb[41].mxu0 }
 0x1f8   :  { %6696 = vmatmul.mubr.msk.f32.gmra.mrb[34].mxu1 %vm1193_vm1, %v8090_v62  ;;  %6736 = vmatmul.mubr.msk.f32.gmra.mrb[50].mxu0 %vm1193_vm1, %v8090_v62  ;;  %v1177_v5 = vadd.f32 %v1145_v63, %v1082_v4 }
 0x1f9   :  { %6698 = vmatprep.mubr.msk.f32.mxu1 %vm1193_vm1, %v8098_v0  ;;  %7503 = vmatpush3.bf16.msra.mxu1 %v7500_v33  ;;  %v2059_v33 = vld [vmem:[%s9264_s8 + $0x8] sm:$0xff] }
 0x1fa   :  { %6738 = vmatprep.mubr.msk.f32.mxu0 %vm1193_vm1, %v8098_v0  ;;  %7513 = vmatprep.subr.bf16.mxu1 %v7512_v56  ;;  %v7520_v10 = vpack.c.bf16 %v1178_v3, %v1177_v5  ;;  %v6637_v11 = vpop.f32.mrb[42].mxu0  ;;  %v7536_v34 = vpack.c.bf16 %v2059_v33, %v2058_v32 }
 0x1fb   :  { %v1180_v12 = vadd.f32 %v6637_v11, %v1148_v6  ;;  %v1092_v13 = vpop.f32.mrb[43].mxu0 }
 0x1fc   :  { %6699 = vmatmul.mubr.msk.f32.gmra.mrb[36].mxu1 %vm1193_vm1, %v8110_v7  ;;  %6739 = vmatmul.mubr.msk.f32.gmra.mrb[52].mxu0 %vm1193_vm1, %v8110_v7  ;;  %v1179_v14 = vadd.f32 %v1147_v8, %v1092_v13 }
 0x1fd   :  { %6701 = vmatprep.mubr.msk.f32.mxu1 %vm1193_vm1, %v8118_v9  ;;  %6741 = vmatprep.mubr.msk.f32.mxu0 %vm1193_vm1, %v8118_v9 }
 0x1fe   :  { %v7524_v18 = vpack.c.bf16 %v1180_v12, %v1179_v14  ;;  %7521 = vmatprep.subr.bf16.mxu0 %v7520_v10  ;;  %v6640_v19 = vpop.f32.mrb[44].mxu0 }
 0x1ff   :  { %7523 = vmatpush3.bf16.msra.mxu0 %v7520_v10  ;;  %v1182_v20 = vadd.f32 %v6640_v19, %v1150_v15  ;;  %v1102_v21 = vpop.f32.mrb[45].mxu0 }
 0x200   :  { %6702 = vmatmul.mubr.msk.f32.gmra.mrb[38].mxu1 %vm1193_vm1, %v8130_v16  ;;  %6742 = vmatmul.mubr.msk.f32.gmra.mrb[54].mxu0 %vm1193_vm1, %v8130_v16  ;;  %v1181_v22 = vadd.f32 %v1149_v17, %v1102_v21 }
 0x201   :  { %6712 = vmatprep.mubr.msk.f32.mxu1 %vm1193_vm1, %v8040_v31  ;;  %7525 = vmatprep.subr.bf16.mxu0 %v7524_v18 }
 0x202   :  { %6772 = vmatprep.mubr.msk.f32.mxu0 %vm1193_vm1, %v8040_v31  ;;  %v7528_v25 = vpack.c.bf16 %v1182_v20, %v1181_v22  ;;  %v6643_v26 = vpop.f32.mrb[46].mxu0 }
 0x203   :  { %7527 = vmatpush3.bf16.msra.mxu0 %v7524_v18  ;;  %v1184_v27 = vadd.f32 %v6643_v26, %v1152_v23  ;;  %v1112_v28 = vpop.f32.mrb[47].mxu0 }
 0x204   :  { %6713 = vmatmul.mubr.msk.f32.vlgmr.msra.gmra.mrb[40].mxu1 %vm1193_vm1, %v8070_v53  ;;  %v1183_v29 = vadd.f32 %v1151_v24, %v1112_v28 }
 0x205   :  { %6715 = vmatprep.mubr.msk.f32.mxu1 %vm1193_vm1, %v8078_v55  ;;  %7515 = vmatpush3.bf16.msra.mxu1 %v7512_v56 }
 0x206   :  { %7517 = vmatprep.subr.bf16.mxu1 %v7516_v1  ;;  %6773 = vmatmul.mubr.msk.f32.vlgmr.msra.gmra.mrb[56].mxu0 %vm1193_vm1, %v8070_v53  ;;  %v7532_v30 = vpack.c.bf16 %v1184_v27, %v1183_v29 }
 0x207   :  { %6775 = vmatprep.mubr.msk.f32.mxu0 %vm1193_vm1, %v8078_v55 }
 0x208   :  { %6716 = vmatmul.mubr.msk.f32.gmra.mrb[42].mxu1 %vm1193_vm1, %v8090_v62 }
 0x209   :  { %6718 = vmatprep.mubr.msk.f32.mxu1 %vm1193_vm1, %v8098_v0  ;;  %7519 = vmatpush3.bf16.msra.mxu1 %v7516_v1 }
 0x20a   :  { %6776 = vmatmul.mubr.msk.f32.gmra.mrb[58].mxu0 %vm1193_vm1, %v8090_v62  ;;  %7529 = vmatprep.subr.bf16.mxu1 %v7528_v25 }
 0x20b   :  { %6778 = vmatprep.mubr.msk.f32.mxu0 %vm1193_vm1, %v8098_v0 }
 0x20c   :  { %6719 = vmatmul.mubr.msk.f32.gmra.mrb[44].mxu1 %vm1193_vm1, %v8110_v7 }
 0x20d   :  { %6721 = vmatprep.mubr.msk.f32.mxu1 %vm1193_vm1, %v8118_v9 }
 0x20e   :  { %6779 = vmatmul.mubr.msk.f32.gmra.mrb[60].mxu0 %vm1193_vm1, %v8110_v7 }
 0x20f   :  { %6781 = vmatprep.mubr.msk.f32.mxu0 %vm1193_vm1, %v8118_v9 }
 0x210   :  { %6722 = vmatmul.mubr.msk.f32.gmra.mrb[46].mxu1 %vm1193_vm1, %v8130_v16 }
 0x211   :  { %6752 = vmatprep.mubr.msk.f32.mxu1 %vm1193_vm1, %v8040_v31 }
 0x212   :  { %6782 = vmatmul.mubr.msk.f32.gmra.mrb[62].mxu0 %vm1193_vm1, %v8130_v16 }
 0x214   :  { %6753 = vmatmul.mubr.msk.f32.vlgmr.msra.gmra.mrb[48].mxu1 %vm1193_vm1, %v8070_v53 }
 0x215   :  { %6755 = vmatprep.mubr.msk.f32.mxu1 %vm1193_vm1, %v8078_v55  ;;  %7531 = vmatpush3.bf16.msra.mxu1 %v7528_v25 }
 0x216   :  { %7533 = vmatprep.subr.bf16.mxu1 %v7532_v30 }
 0x218   :  { %6756 = vmatmul.mubr.msk.f32.gmra.mrb[50].mxu1 %vm1193_vm1, %v8090_v62 }
 0x219   :  { %6758 = vmatprep.mubr.msk.f32.mxu1 %vm1193_vm1, %v8098_v0  ;;  %7535 = vmatpush3.bf16.msra.mxu1 %v7532_v30 }
 0x21a   :  { %7537 = vmatprep.subr.bf16.mxu1 %v7536_v34 }
 0x21c   :  { %6759 = vmatmul.mubr.msk.f32.gmra.mrb[52].mxu1 %vm1193_vm1, %v8110_v7 }
 0x21d   :  { %6761 = vmatprep.mubr.msk.f32.mxu1 %vm1193_vm1, %v8118_v9 }
 0x220   :  { %6762 = vmatmul.mubr.msk.f32.gmra.mrb[54].mxu1 %vm1193_vm1, %v8130_v16 }
 0x221   :  { %6792 = vmatprep.mubr.msk.f32.mxu1 %vm1193_vm1, %v8040_v31 }
 0x224   :  { %6793 = vmatmul.mubr.msk.f32.vlgmr.msra.gmra.mrb[56].mxu1 %vm1193_vm1, %v8070_v53 }
 0x225   :  { %6795 = vmatprep.mubr.msk.f32.mxu1 %vm1193_vm1, %v8078_v55  ;;  %7539 = vmatpush3.bf16.msra.mxu1 %v7536_v34 }
 0x226   :  { %7541 = vmatprep.subr.bf16.mxu1 %v7540_v37 }
 0x228   :  { %6796 = vmatmul.mubr.msk.f32.gmra.mrb[58].mxu1 %vm1193_vm1, %v8090_v62 }
 0x229   :  { %6798 = vmatprep.mubr.msk.f32.mxu1 %vm1193_vm1, %v8098_v0  ;;  %7543 = vmatpush3.bf16.msra.mxu1 %v7540_v37 }
 0x22c   :  { %6799 = vmatmul.mubr.msk.f32.gmra.mrb[60].mxu1 %vm1193_vm1, %v8110_v7 }
 0x22d   :  { %6801 = vmatprep.mubr.msk.f32.mxu1 %vm1193_vm1, %v8118_v9 }
 0x230   :  { %6802 = vmatmul.mubr.msk.f32.gmra.mrb[62].mxu1 %vm1193_vm1, %v8130_v16 }
 0x2a7   :  { %v6654_v31 = vpop.f32.mrb[16].mxu1 }
 0x2a8   :  { %v1284_v53 = vpop.f32.mrb[17].mxu1 }
 0x2a9   :  { %6812 = vmatprep.mubr.msk.f32.mxu1 %vm1193_vm1, %v1284_v53  ;;  %v2640_v53 = vld [vmem:[%s9259_s3 + $0x8] sm:$0xff] }
 0x2aa   :  { %6813 = vmatmul.mubr.msk.f32.vlgmr.msra.gmra.mrb[64].mxu1 %vm1193_vm1, %v6654_v31  ;;  %v8369_v31 = vld [vmem:[%s9265_s9] sm:$0xff] }
 0x2ab   :  { %v6657_v55 = vpop.f32.mrb[18].mxu1  ;;  %7084 = vmatprep.mubr.msk.f32.mxu0 %vm2783_vm2, %v8369_v31 }
 0x2ac   :  { %v1294_v62 = vpop.f32.mrb[19].mxu1 }
 0x2ad   :  { %6815 = vmatprep.mubr.msk.f32.mxu1 %vm1193_vm1, %v1294_v62 }
 0x2ae   :  { %6816 = vmatmul.mubr.msk.f32.gmra.mrb[66].mxu1 %vm1193_vm1, %v6657_v55  ;;  %v2639_v55 = vld [vmem:[%s9259_s3] sm:$0xff] }
 0x2af   :  { %v6660_v0 = vpop.f32.mrb[20].mxu1 }
 0x2b0   :  { %v1304_v7 = vpop.f32.mrb[21].mxu1 }
 0x2b1   :  { %6818 = vmatprep.mubr.msk.f32.mxu1 %vm1193_vm1, %v1304_v7 }
 0x2b2   :  { %6819 = vmatmul.mubr.msk.f32.gmra.mrb[68].mxu1 %vm1193_vm1, %v6660_v0 }
 0x2b3   :  { %v6663_v9 = vpop.f32.mrb[22].mxu1 }
 0x2b4   :  { %v1314_v16 = vpop.f32.mrb[23].mxu1 }
 0x2b5   :  { %6821 = vmatprep.mubr.msk.f32.mxu1 %vm1193_vm1, %v1314_v16  ;;  %v2642_v16 = vld [vmem:[%s9259_s3 + $0x18] sm:$0xff] }
 0x2b6   :  { %6822 = vmatmul.mubr.msk.f32.gmra.mrb[70].mxu1 %vm1193_vm1, %v6663_v9 }
 0x2b7   :  { %v6674_v38 = vpop.f32.mrb[24].mxu1 }
 0x2b8   :  { %v1389_v39 = vpop.f32.mrb[25].mxu1 }
 0x2b9   :  { %6824 = vmatprep.mubr.msk.f32.mxu1 %vm1193_vm1, %v1389_v39 }
 0x2ba   :  { %6825 = vmatmul.mubr.msk.f32.gmra.mrb[72].mxu1 %vm1193_vm1, %v6674_v38  ;;  %v2641_v38 = vld [vmem:[%s9259_s3 + $0x10] sm:$0xff] }
 0x2bb   :  { %v6677_v40 = vpop.f32.mrb[26].mxu1 }
 0x2bc   :  { %v1399_v41 = vpop.f32.mrb[27].mxu1 }
 0x2bd   :  { %6827 = vmatprep.mubr.msk.f32.mxu1 %vm1193_vm1, %v1399_v41 }
 0x2be   :  { %6828 = vmatmul.mubr.msk.f32.gmra.mrb[74].mxu1 %vm1193_vm1, %v6677_v40 }
 0x2bf   :  { %v6680_v42 = vpop.f32.mrb[28].mxu1 }
 0x2c0   :  { %v1409_v43 = vpop.f32.mrb[29].mxu1 }
 0x2c1   :  { %6830 = vmatprep.mubr.msk.f32.mxu1 %vm1193_vm1, %v1409_v43 }
 0x2c2   :  { %6831 = vmatmul.mubr.msk.f32.gmra.mrb[76].mxu1 %vm1193_vm1, %v6680_v42 }
 0x2c3   :  { %v6683_v44 = vpop.f32.mrb[30].mxu1 }
 0x2c4   :  { %v1419_v45 = vpop.f32.mrb[31].mxu1 }
 0x2c5   :  { %6833 = vmatprep.mubr.msk.f32.mxu1 %vm1193_vm1, %v1419_v45  ;;  %v2643_v45 = vld [vmem:[%s9259_s3 + $0x20] sm:$0xff] }
 0x2c6   :  { %6834 = vmatmul.mubr.msk.f32.gmra.mrb[78].mxu1 %vm1193_vm1, %v6683_v44  ;;  %v2644_v44 = vld [vmem:[%s9259_s3 + $0x28] sm:$0xff] }
 0x2c7   :  { %v6694_v46 = vpop.f32.mrb[32].mxu1  ;;  %v6734_v47 = vpop.f32.mrb[48].mxu0 }
 0x2c8   :  { %v1494_v48 = vpop.f32.mrb[33].mxu1  ;;  %v1704_v49 = vpop.f32.mrb[49].mxu0 }
 0x2c9   :  { %6836 = vmatprep.mubr.msk.f32.mxu1 %vm1193_vm1, %v1494_v48 }
 0x2ca   :  { %6837 = vmatmul.mubr.msk.f32.gmra.mrb[80].mxu1 %vm1193_vm1, %v6694_v46 }
 0x2cb   :  { %v6697_v50 = vpop.f32.mrb[34].mxu1  ;;  %v6737_v51 = vpop.f32.mrb[50].mxu0 }
 0x2cc   :  { %v1504_v52 = vpop.f32.mrb[35].mxu1  ;;  %v1714_v54 = vpop.f32.mrb[51].mxu0 }
 0x2cd   :  { %6839 = vmatprep.mubr.msk.f32.mxu1 %vm1193_vm1, %v1504_v52  ;;  %v2645_v52 = vld [vmem:[%s9259_s3 + $0x30] sm:$0xff] }
 0x2ce   :  { %6840 = vmatmul.mubr.msk.f32.gmra.mrb[82].mxu1 %vm1193_vm1, %v6697_v50 }
 0x2cf   :  { %v6700_v56 = vpop.f32.mrb[36].mxu1  ;;  %v6740_v57 = vpop.f32.mrb[52].mxu0 }
 0x2d0   :  { %v1514_v58 = vpop.f32.mrb[37].mxu1  ;;  %v1724_v59 = vpop.f32.mrb[53].mxu0 }
 0x2d1   :  { %6842 = vmatprep.mubr.msk.f32.mxu1 %vm1193_vm1, %v1514_v58 }
 0x2d2   :  { %6843 = vmatmul.mubr.msk.f32.gmra.mrb[84].mxu1 %vm1193_vm1, %v6700_v56 }
 0x2d3   :  { %v6703_v60 = vpop.f32.mrb[38].mxu1  ;;  %v6743_v61 = vpop.f32.mrb[54].mxu0 }
 0x2d4   :  { %v1524_v63 = vpop.f32.mrb[39].mxu1  ;;  %v1734_v1 = vpop.f32.mrb[55].mxu0 }
 0x2d5   :  { %6845 = vmatprep.mubr.msk.f32.mxu1 %vm1193_vm1, %v1524_v63 }
 0x2d6   :  { %6846 = vmatmul.mubr.msk.f32.gmra.mrb[86].mxu1 %vm1193_vm1, %v6703_v60  ;;  %v2648_v60 = vld [vmem:[%s9259_s3 + $0x48] sm:$0xff] }
 0x2d7   :  { %v6714_v2 = vpop.f32.mrb[40].mxu1 }
 0x2d8   :  { %v1599_v3 = vpop.f32.mrb[41].mxu1 }
 0x2d9   :  { %6848 = vmatprep.mubr.msk.f32.mxu1 %vm1193_vm1, %v1599_v3  ;;  %v6774_v4 = vpop.f32.mrb[56].mxu0 }
 0x2da   :  { %6849 = vmatmul.mubr.msk.f32.gmra.mrb[88].mxu1 %vm1193_vm1, %v6714_v2  ;;  %v1914_v5 = vpop.f32.mrb[57].mxu0 }
 0x2db   :  { %v6717_v6 = vpop.f32.mrb[42].mxu1 }
 0x2dc   :  { %v1609_v8 = vpop.f32.mrb[43].mxu1 }
 0x2dd   :  { %6851 = vmatprep.mubr.msk.f32.mxu1 %vm1193_vm1, %v1609_v8  ;;  %v6777_v10 = vpop.f32.mrb[58].mxu0  ;;  %v2649_v8 = vld [vmem:[%s9259_s3 + $0x50] sm:$0xff] }
 0x2de   :  { %6852 = vmatmul.mubr.msk.f32.gmra.mrb[90].mxu1 %vm1193_vm1, %v6717_v6  ;;  %v1924_v11 = vpop.f32.mrb[59].mxu0  ;;  %v8422_v6 = vld [vmem:[%s9265_s9 + $0x8] sm:$0xff] }
 0x2df   :  { %v6720_v12 = vpop.f32.mrb[44].mxu1 }
 0x2e0   :  { %v1619_v13 = vpop.f32.mrb[45].mxu1 }
 0x2e1   :  { %6854 = vmatprep.mubr.msk.f32.mxu1 %vm1193_vm1, %v1619_v13  ;;  %v6780_v14 = vpop.f32.mrb[60].mxu0 }
 0x2e2   :  { %6855 = vmatmul.mubr.msk.f32.gmra.mrb[92].mxu1 %vm1193_vm1, %v6720_v12  ;;  %v1934_v15 = vpop.f32.mrb[61].mxu0 }
 0x2e3   :  { %v6723_v17 = vpop.f32.mrb[46].mxu1 }
 0x2e4   :  { %v1629_v18 = vpop.f32.mrb[47].mxu1 }
 0x2e5   :  { %6857 = vmatprep.mubr.msk.f32.mxu1 %vm1193_vm1, %v1629_v18  ;;  %v6783_v19 = vpop.f32.mrb[62].mxu0  ;;  %v8442_v18 = vld [vmem:[%s9265_s9 + $0x18] sm:$0xff] }
 0x2e6   :  { %6858 = vmatmul.mubr.msk.f32.gmra.mrb[94].mxu1 %vm1193_vm1, %v6723_v17  ;;  %v1944_v20 = vpop.f32.mrb[63].mxu0  ;;  %v2652_v17 = vld [vmem:[%s9259_s3 + $0x68] sm:$0xff] }
 0x2e7   :  { %6860 = vmatprep.mubr.msk.f32.mxu1 %vm1193_vm1, %v1704_v49  ;;  %v6754_v21 = vpop.f32.mrb[48].mxu1 }
 0x2e8   :  { %v1809_v22 = vpop.f32.mrb[49].mxu1 }
 0x2ea   :  { %6861 = vmatmul.mubr.msk.f32.gmra.mrb[96].mxu1 %vm1193_vm1, %v6734_v47 }
 0x2eb   :  { %6863 = vmatprep.mubr.msk.f32.mxu1 %vm1193_vm1, %v1714_v54  ;;  %v6757_v23 = vpop.f32.mrb[50].mxu1 }
 0x2ec   :  { %v1819_v24 = vpop.f32.mrb[51].mxu1 }
 0x2ee   :  { %6864 = vmatmul.mubr.msk.f32.gmra.mrb[98].mxu1 %vm1193_vm1, %v6737_v51  ;;  %v2646_v51 = vld [vmem:[%s9259_s3 + $0x38] sm:$0xff] }
 0x2ef   :  { %6866 = vmatprep.mubr.msk.f32.mxu1 %vm1193_vm1, %v1724_v59  ;;  %v6760_v25 = vpop.f32.mrb[52].mxu1 }
 0x2f0   :  { %v1829_v26 = vpop.f32.mrb[53].mxu1 }
 0x2f2   :  { %6867 = vmatmul.mubr.msk.f32.gmra.mrb[100].mxu1 %vm1193_vm1, %v6740_v57 }
 0x2f3   :  { %6869 = vmatprep.mubr.msk.f32.mxu1 %vm1193_vm1, %v1734_v1  ;;  %v6763_v27 = vpop.f32.mrb[54].mxu1 }
 0x2f4   :  { %v1839_v28 = vpop.f32.mrb[55].mxu1 }
 0x2f6   :  { %6870 = vmatmul.mubr.msk.f32.gmra.mrb[102].mxu1 %vm1193_vm1, %v6743_v61  ;;  %v2647_v61 = vld [vmem:[%s9259_s3 + $0x40] sm:$0xff] }
 0x2f7   :  { %6872 = vmatprep.mubr.msk.f32.mxu1 %vm1193_vm1, %v1809_v22  ;;  %v6794_v29 = vpop.f32.mrb[56].mxu1 }
 0x2f8   :  { %v2019_v30 = vpop.f32.mrb[57].mxu1 }
 0x2fa   :  { %6873 = vmatmul.mubr.msk.f32.gmra.mrb[104].mxu1 %vm1193_vm1, %v6754_v21 }
 0x2fb   :  { %6875 = vmatprep.mubr.msk.f32.mxu1 %vm1193_vm1, %v1819_v24  ;;  %v6797_v32 = vpop.f32.mrb[58].mxu1 }
 0x2fc   :  { %v2029_v33 = vpop.f32.mrb[59].mxu1 }
 0x2fe   :  { %6876 = vmatmul.mubr.msk.f32.gmra.mrb[106].mxu1 %vm1193_vm1, %v6757_v23 }
 0x2ff   :  { %6878 = vmatprep.mubr.msk.f32.mxu1 %vm1193_vm1, %v1829_v26  ;;  %v6800_v34 = vpop.f32.mrb[60].mxu1  ;;  %v2654_v26 = vld [vmem:[%s9259_s3 + $0x78] sm:$0xff] }
 0x300   :  { %v2039_v35 = vpop.f32.mrb[61].mxu1 }
 0x302   :  { %6879 = vmatmul.mubr.msk.f32.gmra.mrb[108].mxu1 %vm1193_vm1, %v6760_v25 }
 0x303   :  { %6881 = vmatprep.mubr.msk.f32.mxu1 %vm1193_vm1, %v1839_v28  ;;  %v6803_v36 = vpop.f32.mrb[62].mxu1  ;;  %v2653_v28 = vld [vmem:[%s9259_s3 + $0x70] sm:$0xff] }
 0x304   :  { %v2049_v37 = vpop.f32.mrb[63].mxu1 }
 0x306   :  { %6882 = vmatmul.mubr.msk.f32.gmra.mrb[110].mxu1 %vm1193_vm1, %v6763_v27  ;;  %v8462_v27 = vld [vmem:[%s9265_s9 + $0x28] sm:$0xff] }
 0x307   :  { %6884 = vmatprep.mubr.msk.f32.mxu1 %vm1193_vm1, %v1914_v5  ;;  %v2650_v5 = vld [vmem:[%s9259_s3 + $0x58] sm:$0xff] }
 0x30a   :  { %6885 = vmatmul.mubr.msk.f32.gmra.mrb[112].mxu1 %vm1193_vm1, %v6774_v4 }
 0x30b   :  { %6887 = vmatprep.mubr.msk.f32.mxu1 %vm1193_vm1, %v1924_v11 }
 0x30e   :  { %6888 = vmatmul.mubr.msk.f32.gmra.mrb[114].mxu1 %vm1193_vm1, %v6777_v10  ;;  %v8430_v10 = vld [vmem:[%s9265_s9 + $0x10] sm:$0xff] }
 0x30f   :  { %6890 = vmatprep.mubr.msk.f32.mxu1 %vm1193_vm1, %v1934_v15 }
 0x312   :  { %6891 = vmatmul.mubr.msk.f32.gmra.mrb[116].mxu1 %vm1193_vm1, %v6780_v14 }
 0x313   :  { %6893 = vmatprep.mubr.msk.f32.mxu1 %vm1193_vm1, %v1944_v20  ;;  %v8450_v20 = vld [vmem:[%s9265_s9 + $0x20] sm:$0xff] }
 0x316   :  { %6894 = vmatmul.mubr.msk.f32.gmra.mrb[118].mxu1 %vm1193_vm1, %v6783_v19  ;;  %v2651_v19 = vld [vmem:[%s9259_s3 + $0x60] sm:$0xff] }
 0x317   :  { %6896 = vmatprep.mubr.msk.f32.mxu1 %vm1193_vm1, %v2019_v30 }
 0x31a   :  { %6897 = vmatmul.mubr.msk.f32.gmra.mrb[120].mxu1 %vm1193_vm1, %v6794_v29  ;;  %v8470_v29 = vld [vmem:[%s9265_s9 + $0x30] sm:$0xff] }
 0x31b   :  { %6899 = vmatprep.mubr.msk.f32.mxu1 %vm1193_vm1, %v2029_v33 }
 0x31e   :  { %6900 = vmatmul.mubr.msk.f32.gmra.mrb[122].mxu1 %vm1193_vm1, %v6797_v32 }
 0x31f   :  { %6902 = vmatprep.mubr.msk.f32.mxu1 %vm1193_vm1, %v2039_v35 }
 0x322   :  { %6903 = vmatmul.mubr.msk.f32.gmra.mrb[124].mxu1 %vm1193_vm1, %v6800_v34 }
 0x323   :  { %6905 = vmatprep.mubr.msk.f32.mxu1 %vm1193_vm1, %v2049_v37  ;;  %v8482_v37 = vld [vmem:[%s9265_s9 + $0x38] sm:$0xff] }
 0x326   :  { %6906 = vmatmul.mubr.msk.f32.gmra.mrb[126].mxu1 %vm1193_vm1, %v6803_v36  ;;  %v2656_v36 = vld [vmem:[%s9259_s3 + $0x88] sm:$0xff] }
 0x327   :  { %6924 = vmatprep.mubr.msk.f32.mxu1 %vm2783_vm2, %v8369_v31 }
 0x37d   :  { %v6814_v62 = vpop.f32.mrb[64].mxu1 }
 0x37e   :  { %v2704_v0 = vadd.f32 %v6814_v62, %v2640_v53  ;;  %v2320_v7 = vpop.f32.mrb[65].mxu1  ;;  %v2655_v53 = vld [vmem:[%s9259_s3 + $0x80] sm:$0xff] }
 0x37f   :  { %v2703_v9 = vadd.f32 %v2639_v55, %v2320_v7  ;;  %v8490_v55 = vld [vmem:[%s9265_s9 + $0x40] sm:$0xff] }
 0x381   :  { %v7544_v39 = vpack.c.bf16 %v2704_v0, %v2703_v9  ;;  %v6817_v40 = vpop.f32.mrb[66].mxu1 }
 0x382   :  { %v2706_v41 = vadd.f32 %v6817_v40, %v2642_v16  ;;  %v2330_v42 = vpop.f32.mrb[67].mxu1  ;;  %v2657_v40 = vld [vmem:[%s9259_s3 + $0x90] sm:$0xff] }
 0x383   :  { %7545 = vmatprep.subr.bf16.mxu1 %v7544_v39  ;;  %v2705_v43 = vadd.f32 %v2641_v38, %v2330_v42  ;;  %v2658_v38 = vld [vmem:[%s9259_s3 + $0x98] sm:$0xff] }
 0x384   :  { %7547 = vmatpush3.bf16.msra.mxu1 %v7544_v39  ;;  %v8502_v39 = vld [vmem:[%s9265_s9 + $0x48] sm:$0xff] }
 0x385   :  { %v7548_v46 = vpack.c.bf16 %v2706_v41, %v2705_v43  ;;  %v6820_v47 = vpop.f32.mrb[68].mxu1  ;;  %v8510_v41 = vld [vmem:[%s9265_s9 + $0x50] sm:$0xff] }
 0x386   :  { %v2708_v48 = vadd.f32 %v6820_v47, %v2644_v44  ;;  %v2340_v49 = vpop.f32.mrb[69].mxu1  ;;  %v2660_v47 = vld [vmem:[%s9259_s3 + $0xa8] sm:$0xff] }
 0x387   :  { %7549 = vmatprep.subr.bf16.mxu1 %v7548_v46  ;;  %v2707_v50 = vadd.f32 %v2643_v45, %v2340_v49  ;;  %v2659_v49 = vld [vmem:[%s9259_s3 + $0xa0] sm:$0xff] }
 0x388   :  { %7551 = vmatpush3.bf16.msra.mxu1 %v7548_v46 }
 0x389   :  { %v7552_v54 = vpack.c.bf16 %v2708_v48, %v2707_v50  ;;  %v6823_v56 = vpop.f32.mrb[70].mxu1  ;;  %v8522_v48 = vld [vmem:[%s9265_s9 + $0x58] sm:$0xff]  ;;  %v8530_v50 = vld [vmem:[%s9265_s9 + $0x60] sm:$0xff] }
 0x38a   :  { %v2710_v57 = vadd.f32 %v6823_v56, %v2646_v51  ;;  %v2350_v58 = vpop.f32.mrb[71].mxu1 }
 0x38b   :  { %v2709_v59 = vadd.f32 %v2645_v52, %v2350_v58  ;;  %7553 = vmatprep.subr.bf16.mxu1 %v7552_v54  ;;  %v2662_v58 = vld [vmem:[%s9259_s3 + $0xb8] sm:$0xff] }
 0x38c   :  { %7555 = vmatpush3.bf16.msra.mxu1 %v7552_v54 }
 0x38d   :  { %v7556_v63 = vpack.c.bf16 %v2710_v57, %v2709_v59  ;;  %v6826_v1 = vpop.f32.mrb[72].mxu1  ;;  %v8542_v59 = vld [vmem:[%s9265_s9 + $0x68] sm:$0xff] }
 0x38e   :  { %v2712_v2 = vadd.f32 %v6826_v1, %v2648_v60  ;;  %v2360_v3 = vpop.f32.mrb[73].mxu1  ;;  %v2661_v60 = vld [vmem:[%s9259_s3 + $0xb0] sm:$0xff] }
 0x38f   :  { %7557 = vmatprep.subr.bf16.mxu1 %v7556_v63  ;;  %v2711_v4 = vadd.f32 %v2647_v61, %v2360_v3  ;;  %v8550_v61 = vld [vmem:[%s9265_s9 + $0x70] sm:$0xff] }
 0x390   :  { %7559 = vmatpush3.bf16.msra.mxu1 %v7556_v63 }
 0x391   :  { %v7560_v11 = vpack.c.bf16 %v2712_v2, %v2711_v4  ;;  %v6829_v12 = vpop.f32.mrb[74].mxu1 }
 0x392   :  { %v2714_v13 = vadd.f32 %v6829_v12, %v2650_v5  ;;  %v2370_v14 = vpop.f32.mrb[75].mxu1  ;;  %v2664_v5 = vld [vmem:[%s9259_s3 + $0xc8] sm:$0xff] }
 0x393   :  { %6925 = vmatmul.mubr.msk.f32.vlgmr.msra.gmra.mrb[128].mxu1 %vm2783_vm2, %v8422_v6  ;;  %v2713_v15 = vadd.f32 %v2649_v8, %v2370_v14  ;;  %7561 = vmatprep.subr.bf16.mxu1 %v7560_v11  ;;  %v8562_v8 = vld [vmem:[%s9265_s9 + $0x78] sm:$0xff] }
 0x394   :  { %6927 = vmatprep.mubr.msk.f32.mxu1 %vm2783_vm2, %v8430_v10  ;;  %7563 = vmatpush3.bf16.msra.mxu1 %v7560_v11  ;;  %v2663_v11 = vld [vmem:[%s9259_s3 + $0xc0] sm:$0xff] }
 0x395   :  { %v7564_v21 = vpack.c.bf16 %v2714_v13, %v2713_v15  ;;  %v6832_v22 = vpop.f32.mrb[76].mxu1 }
 0x396   :  { %v2716_v23 = vadd.f32 %v6832_v22, %v2652_v17  ;;  %v2380_v24 = vpop.f32.mrb[77].mxu1 }
 0x397   :  { %6928 = vmatmul.mubr.msk.f32.gmra.mrb[130].mxu1 %vm2783_vm2, %v8442_v18  ;;  %v2715_v25 = vadd.f32 %v2651_v19, %v2380_v24  ;;  %7565 = vmatprep.subr.bf16.mxu1 %v7564_v21  ;;  %v2666_v19 = vld [vmem:[%s9259_s3 + $0xd8] sm:$0xff] }
 0x398   :  { %6930 = vmatprep.mubr.msk.f32.mxu1 %vm2783_vm2, %v8450_v20  ;;  %7567 = vmatpush3.bf16.msra.mxu1 %v7564_v21  ;;  %v2665_v21 = vld [vmem:[%s9259_s3 + $0xd0] sm:$0xff] }
 0x399   :  { %v7568_v30 = vpack.c.bf16 %v2716_v23, %v2715_v25  ;;  %v6835_v32 = vpop.f32.mrb[78].mxu1 }
 0x39a   :  { %v2718_v33 = vadd.f32 %v6835_v32, %v2654_v26  ;;  %v2390_v34 = vpop.f32.mrb[79].mxu1 }
 0x39b   :  { %6931 = vmatmul.mubr.msk.f32.gmra.mrb[132].mxu1 %vm2783_vm2, %v8462_v27  ;;  %v2717_v35 = vadd.f32 %v2653_v28, %v2390_v34  ;;  %7569 = vmatprep.subr.bf16.mxu1 %v7568_v30  ;;  %v2668_v28 = vld [vmem:[%s9259_s3 + $0xe8] sm:$0xff] }
 0x39c   :  { %6933 = vmatprep.mubr.msk.f32.mxu1 %vm2783_vm2, %v8470_v29  ;;  %7571 = vmatpush3.bf16.msra.mxu1 %v7568_v30  ;;  %v2667_v30 = vld [vmem:[%s9259_s3 + $0xe0] sm:$0xff] }
 0x39d   :  { %v7572_v62 = vpack.c.bf16 %v2718_v33, %v2717_v35  ;;  %v6838_v0 = vpop.f32.mrb[80].mxu1 }
 0x39e   :  { %v2720_v7 = vadd.f32 %v6838_v0, %v2656_v36  ;;  %v2400_v9 = vpop.f32.mrb[81].mxu1 }
 0x39f   :  { %6934 = vmatmul.mubr.msk.f32.gmra.mrb[134].mxu1 %vm2783_vm2, %v8482_v37  ;;  %7573 = vmatprep.subr.bf16.mxu1 %v7572_v62  ;;  %v2719_v16 = vadd.f32 %v2655_v53, %v2400_v9  ;;  %v2670_v53 = vld [vmem:[%s9259_s3 + $0xf8] sm:$0xff] }
 0x3a0   :  { %6936 = vmatprep.mubr.msk.f32.mxu1 %vm2783_vm2, %v8490_v55  ;;  %7575 = vmatpush3.bf16.msra.mxu1 %v7572_v62  ;;  %v2669_v62 = vld [vmem:[%s9259_s3 + $0xf0] sm:$0xff] }
 0x3a1   :  { %v7576_v42 = vpack.c.bf16 %v2720_v7, %v2719_v16  ;;  %v6841_v43 = vpop.f32.mrb[82].mxu1 }
 0x3a2   :  { %v2722_v44 = vadd.f32 %v6841_v43, %v2658_v38  ;;  %v2410_v45 = vpop.f32.mrb[83].mxu1 }
 0x3a3   :  { %6937 = vmatmul.mubr.msk.f32.gmra.mrb[136].mxu1 %vm2783_vm2, %v8502_v39  ;;  %v2721_v46 = vadd.f32 %v2657_v40, %v2410_v45  ;;  %7577 = vmatprep.subr.bf16.mxu1 %v7576_v42  ;;  %v2672_v40 = vld [vmem:[%s9259_s3 + $0x108] sm:$0xff] }
 0x3a4   :  { %6939 = vmatprep.mubr.msk.f32.mxu1 %vm2783_vm2, %v8510_v41 }
 0x3a5   :  { %v7580_v51 = vpack.c.bf16 %v2722_v44, %v2721_v46  ;;  %v6844_v52 = vpop.f32.mrb[84].mxu1 }
 0x3a6   :  { %v2724_v54 = vadd.f32 %v6844_v52, %v2660_v47  ;;  %v2420_v56 = vpop.f32.mrb[85].mxu1 }
 0x3a7   :  { %6940 = vmatmul.mubr.msk.f32.gmra.mrb[138].mxu1 %vm2783_vm2, %v8522_v48  ;;  %v2723_v57 = vadd.f32 %v2659_v49, %v2420_v56  ;;  %v2674_v49 = vld [vmem:[%s9259_s3 + $0x118] sm:$0xff] }
 0x3a8   :  { %6942 = vmatprep.mubr.msk.f32.mxu1 %vm2783_vm2, %v8530_v50 }
 0x3a9   :  { %v7584_v63 = vpack.c.bf16 %v2724_v54, %v2723_v57  ;;  %v6847_v1 = vpop.f32.mrb[86].mxu1 }
 0x3aa   :  { %v2726_v2 = vadd.f32 %v6847_v1, %v2662_v58  ;;  %v2430_v3 = vpop.f32.mrb[87].mxu1 }
 0x3ab   :  { %6943 = vmatmul.mubr.msk.f32.gmra.mrb[140].mxu1 %vm2783_vm2, %v8542_v59  ;;  %v2725_v4 = vadd.f32 %v2661_v60, %v2430_v3  ;;  %v2676_v60 = vld [vmem:[%s9259_s3 + $0x128] sm:$0xff] }
 0x3ac   :  { %6945 = vmatprep.mubr.msk.f32.mxu1 %vm2783_vm2, %v8550_v61 }
 0x3ad   :  { %v7588_v12 = vpack.c.bf16 %v2726_v2, %v2725_v4  ;;  %v6850_v13 = vpop.f32.mrb[88].mxu1 }
 0x3ae   :  { %v2728_v14 = vadd.f32 %v6850_v13, %v2664_v5  ;;  %v2440_v15 = vpop.f32.mrb[89].mxu1 }
 0x3af   :  { %6946 = vmatmul.mubr.msk.f32.gmra.mrb[142].mxu1 %vm2783_vm2, %v8562_v8  ;;  %v2727_v17 = vadd.f32 %v2663_v11, %v2440_v15  ;;  %v2678_v11 = vld [vmem:[%s9259_s3 + $0x138] sm:$0xff] }
 0x3b0   :  { %6964 = vmatprep.mubr.msk.f32.mxu1 %vm2783_vm2, %v8369_v31 }
 0x3b1   :  { %v8577_v22 = vpack.c.bf16 %v2728_v14, %v2727_v17  ;;  %v6853_v23 = vpop.f32.mrb[90].mxu1 }
 0x3b2   :  { %v2730_v24 = vadd.f32 %v6853_v23, %v2666_v19  ;;  %v2450_v25 = vpop.f32.mrb[91].mxu1  ;;  %v2679_v23 = vld [vmem:[%s9259_s3 + $0x140] sm:$0xff] }
 0x3b3   :  { %6965 = vmatmul.mubr.msk.f32.vlgmr.msra.gmra.mrb[144].mxu1 %vm2783_vm2, %v8422_v6  ;;  %v2729_v26 = vadd.f32 %v2665_v21, %v2450_v25  ;;  %v2680_v21 = vld [vmem:[%s9259_s3 + $0x148] sm:$0xff] }
 0x3b4   :  { %6967 = vmatprep.mubr.msk.f32.mxu1 %vm2783_vm2, %v8430_v10  ;;  %7579 = vmatpush3.bf16.msra.mxu1 %v7576_v42  ;;  %v2671_v42 = vld [vmem:[%s9259_s3 + $0x100] sm:$0xff] }
 0x3b5   :  { %7581 = vmatprep.subr.bf16.mxu1 %v7580_v51  ;;  %v8589_v32 = vpack.c.bf16 %v2730_v24, %v2729_v26  ;;  %v6856_v33 = vpop.f32.mrb[92].mxu1 }
 0x3b6   :  { %v2732_v34 = vadd.f32 %v6856_v33, %v2668_v28  ;;  %v2460_v35 = vpop.f32.mrb[93].mxu1  ;;  %v2682_v33 = vld [vmem:[%s9259_s3 + $0x158] sm:$0xff] }
 0x3b7   :  { %6968 = vmatmul.mubr.msk.f32.gmra.mrb[146].mxu1 %vm2783_vm2, %v8442_v18  ;;  %v2731_v36 = vadd.f32 %v2667_v30, %v2460_v35 }
 0x3b8   :  { %6970 = vmatprep.mubr.msk.f32.mxu1 %vm2783_vm2, %v8450_v20  ;;  %7583 = vmatpush3.bf16.msra.mxu1 %v7580_v51  ;;  %v2673_v51 = vld [vmem:[%s9259_s3 + $0x110] sm:$0xff] }
 0x3b9   :  { %7585 = vmatprep.subr.bf16.mxu1 %v7584_v63  ;;  %v8601_v0 = vpack.c.bf16 %v2732_v34, %v2731_v36  ;;  %v6859_v7 = vpop.f32.mrb[94].mxu1  ;;  %v2681_v34 = vld [vmem:[%s9259_s3 + $0x150] sm:$0xff] }
 0x3ba   :  { %v2734_v9 = vadd.f32 %v6859_v7, %v2670_v53  ;;  %v2470_v16 = vpop.f32.mrb[95].mxu1 }
 0x3bb   :  { %6971 = vmatmul.mubr.msk.f32.gmra.mrb[148].mxu1 %vm2783_vm2, %v8462_v27  ;;  %v2733_v38 = vadd.f32 %v2669_v62, %v2470_v16  ;;  %v2683_v16 = vld [vmem:[%s9259_s3 + $0x160] sm:$0xff] }
 0x3bc   :  { %6973 = vmatprep.mubr.msk.f32.mxu1 %vm2783_vm2, %v8470_v29  ;;  %7587 = vmatpush3.bf16.msra.mxu1 %v7584_v63  ;;  %v2675_v63 = vld [vmem:[%s9259_s3 + $0x120] sm:$0xff] }
 0x3bd   :  { %7589 = vmatprep.subr.bf16.mxu1 %v7588_v12  ;;  %v8613_v43 = vpack.c.bf16 %v2734_v9, %v2733_v38  ;;  %v6862_v44 = vpop.f32.mrb[96].mxu1  ;;  %v2684_v9 = vld [vmem:[%s9259_s3 + $0x168] sm:$0xff] }
 0x3be   :  { %v2736_v45 = vadd.f32 %v6862_v44, %v2672_v40  ;;  %v2480_v46 = vpop.f32.mrb[97].mxu1 }
 0x3bf   :  { %6974 = vmatmul.mubr.msk.f32.gmra.mrb[150].mxu1 %vm2783_vm2, %v8482_v37  ;;  %v2735_v47 = vadd.f32 %v2671_v42, %v2480_v46  ;;  %v2685_v46 = vld [vmem:[%s9259_s3 + $0x170] sm:$0xff] }
 0x3c0   :  { %6976 = vmatprep.mubr.msk.f32.mxu1 %vm2783_vm2, %v8490_v55  ;;  %7591 = vmatpush3.bf16.msra.mxu1 %v7588_v12  ;;  %v2677_v12 = vld [vmem:[%s9259_s3 + $0x130] sm:$0xff] }
 0x3c1   :  { %7593 = vmatprep.subr.bf16.mxu1 %v8577_v22  ;;  %v7608_v52 = vpack.c.bf16 %v2736_v45, %v2735_v47  ;;  %v6865_v54 = vpop.f32.mrb[98].mxu1 }
 0x3c2   :  { %v2738_v56 = vadd.f32 %v6865_v54, %v2674_v49  ;;  %v2490_v57 = vpop.f32.mrb[99].mxu1 }
 0x3c3   :  { %6977 = vmatmul.mubr.msk.f32.gmra.mrb[152].mxu1 %vm2783_vm2, %v8502_v39  ;;  %v2737_v58 = vadd.f32 %v2673_v51, %v2490_v57  ;;  %7609 = vmatprep.subr.bf16.mxu0 %v7608_v52 }
 0x3c4   :  { %6979 = vmatprep.mubr.msk.f32.mxu1 %vm2783_vm2, %v8510_v41  ;;  %7611 = vmatpush3.bf16.msra.mxu0 %v7608_v52 }
 0x3c5   :  { %v7612_v1 = vpack.c.bf16 %v2738_v56, %v2737_v58  ;;  %v6868_v2 = vpop.f32.mrb[100].mxu1  ;;  %v2687_v56 = vld [vmem:[%s9259_s3 + $0x180] sm:$0xff] }
 0x3c6   :  { %v2740_v3 = vadd.f32 %v6868_v2, %v2676_v60  ;;  %v2500_v4 = vpop.f32.mrb[101].mxu1  ;;  %v2689_v2 = vld [vmem:[%s9259_s3 + $0x190] sm:$0xff] }
 0x3c7   :  { %6980 = vmatmul.mubr.msk.f32.gmra.mrb[154].mxu1 %vm2783_vm2, %v8522_v48  ;;  %v2739_v5 = vadd.f32 %v2675_v63, %v2500_v4  ;;  %7613 = vmatprep.subr.bf16.mxu0 %v7612_v1 }
 0x3c8   :  { %6982 = vmatprep.mubr.msk.f32.mxu1 %vm2783_vm2, %v8530_v50  ;;  %7615 = vmatpush3.bf16.msra.mxu0 %v7612_v1 }
 0x3c9   :  { %v7616_v13 = vpack.c.bf16 %v2740_v3, %v2739_v5  ;;  %v6871_v14 = vpop.f32.mrb[102].mxu1 }
 0x3ca   :  { %v2742_v15 = vadd.f32 %v6871_v14, %v2678_v11  ;;  %v2510_v17 = vpop.f32.mrb[103].mxu1 }
 0x3cb   :  { %6983 = vmatmul.mubr.msk.f32.gmra.mrb[156].mxu1 %vm2783_vm2, %v8542_v59  ;;  %v2741_v19 = vadd.f32 %v2677_v12, %v2510_v17  ;;  %7617 = vmatprep.subr.bf16.mxu0 %v7616_v13 }
 0x3cc   :  { %6985 = vmatprep.mubr.msk.f32.mxu1 %vm2783_vm2, %v8550_v61  ;;  %7619 = vmatpush3.bf16.msra.mxu0 %v7616_v13  ;;  %v2691_v13 = vld [vmem:[%s9259_s3 + $0x1a0] sm:$0xff] }
 0x3cd   :  { %v7620_v24 = vpack.c.bf16 %v2742_v15, %v2741_v19  ;;  %v6874_v25 = vpop.f32.mrb[104].mxu1 }
 0x3ce   :  { %v2744_v26 = vadd.f32 %v6874_v25, %v2680_v21  ;;  %v2520_v28 = vpop.f32.mrb[105].mxu1 }
 0x3cf   :  { %6986 = vmatmul.mubr.msk.f32.gmra.mrb[158].mxu1 %vm2783_vm2, %v8562_v8  ;;  %v2743_v30 = vadd.f32 %v2679_v23, %v2520_v28  ;;  %7621 = vmatprep.subr.bf16.mxu0 %v7620_v24  ;;  %v2694_v23 = vld [vmem:[%s9259_s3 + $0x1b8] sm:$0xff] }
 0x3d0   :  { %7004 = vmatprep.mubr.msk.f32.mxu1 %vm2783_vm2, %v8369_v31  ;;  %7623 = vmatpush3.bf16.msra.mxu0 %v7620_v24  ;;  %v2693_v24 = vld [vmem:[%s9259_s3 + $0x1b0] sm:$0xff] }
 0x3d1   :  { %v8666_v35 = vpack.c.bf16 %v2744_v26, %v2743_v30  ;;  %v6877_v36 = vpop.f32.mrb[106].mxu1 }
 0x3d2   :  { %v2746_v53 = vadd.f32 %v6877_v36, %v2682_v33  ;;  %v2530_v62 = vpop.f32.mrb[107].mxu1  ;;  %v2695_v36 = vld [vmem:[%s9259_s3 + $0x1c0] sm:$0xff] }
 0x3d3   :  { %7005 = vmatmul.mubr.msk.f32.vlgmr.msra.gmra.mrb[160].mxu1 %vm2783_vm2, %v8422_v6  ;;  %v2745_v7 = vadd.f32 %v2681_v34, %v2530_v62  ;;  %7085 = vmatmul.mubr.msk.f32.vlgmr.msra.gmra.mrb[64].mxu0 %vm2783_vm2, %v8422_v6  ;;  %v2696_v34 = vld [vmem:[%s9259_s3 + $0x1c8] sm:$0xff] }
 0x3d4   :  { %7007 = vmatprep.mubr.msk.f32.mxu1 %vm2783_vm2, %v8430_v10  ;;  %7595 = vmatpush3.bf16.msra.mxu1 %v8577_v22  ;;  %v2686_v22 = vld [vmem:[%s9259_s3 + $0x178] sm:$0xff]  ;;  %v3993_v62 = vld [vmem:[%s9266_s10 + $0x8] sm:$0xff] }
 0x3d5   :  { %7597 = vmatprep.subr.bf16.mxu1 %v8589_v32  ;;  %v8682_v38 = vpack.c.bf16 %v2746_v53, %v2745_v7  ;;  %v6880_v40 = vpop.f32.mrb[108].mxu1  ;;  %7087 = vmatprep.mubr.msk.f32.mxu0 %vm2783_vm2, %v8430_v10  ;;  %v3992_v53 = vld [vmem:[%s9266_s10] sm:$0xff] }
 0x3d6   :  { %v2748_v42 = vadd.f32 %v6880_v40, %v2684_v9  ;;  %v2540_v44 = vpop.f32.mrb[109].mxu1 }
 0x3d7   :  { %7008 = vmatmul.mubr.msk.f32.gmra.mrb[162].mxu1 %vm2783_vm2, %v8442_v18  ;;  %v2747_v45 = vadd.f32 %v2683_v16, %v2540_v44  ;;  %7088 = vmatmul.mubr.msk.f32.gmra.mrb[66].mxu0 %vm2783_vm2, %v8442_v18  ;;  %v2698_v44 = vld [vmem:[%s9259_s3 + $0x1d8] sm:$0xff] }
 0x3d8   :  { %7010 = vmatprep.mubr.msk.f32.mxu1 %vm2783_vm2, %v8450_v20  ;;  %7599 = vmatpush3.bf16.msra.mxu1 %v8589_v32  ;;  %v2688_v32 = vld [vmem:[%s9259_s3 + $0x188] sm:$0xff] }
 0x3d9   :  { %7601 = vmatprep.subr.bf16.mxu1 %v8601_v0  ;;  %v8700_v47 = vpack.c.bf16 %v2748_v42, %v2747_v45  ;;  %v6883_v49 = vpop.f32.mrb[110].mxu1  ;;  %7090 = vmatprep.mubr.msk.f32.mxu0 %vm2783_vm2, %v8450_v20  ;;  %v7672_v45 = vpack.c.bf16 %v3993_v62, %v3992_v53 }
 0x3da   :  { %v2750_v51 = vadd.f32 %v6883_v49, %v2686_v22  ;;  %v2550_v52 = vpop.f32.mrb[111].mxu1  ;;  %v2697_v22 = vld [vmem:[%s9259_s3 + $0x1d0] sm:$0xff]  ;;  %v3995_v49 = vld [vmem:[%s9266_s10 + $0x18] sm:$0xff] }
 0x3db   :  { %7011 = vmatmul.mubr.msk.f32.gmra.mrb[164].mxu1 %vm2783_vm2, %v8462_v27  ;;  %v2749_v54 = vadd.f32 %v2685_v46, %v2550_v52  ;;  %7091 = vmatmul.mubr.msk.f32.gmra.mrb[68].mxu0 %vm2783_vm2, %v8462_v27  ;;  %v3994_v46 = vld [vmem:[%s9266_s10 + $0x10] sm:$0xff] }
 0x3dc   :  { %7013 = vmatprep.mubr.msk.f32.mxu1 %vm2783_vm2, %v8470_v29  ;;  %7603 = vmatpush3.bf16.msra.mxu1 %v8601_v0  ;;  %v2690_v0 = vld [vmem:[%s9259_s3 + $0x198] sm:$0xff] }
 0x3dd   :  { %7605 = vmatprep.subr.bf16.mxu1 %v8613_v43  ;;  %v8718_v57 = vpack.c.bf16 %v2750_v51, %v2749_v54  ;;  %v6886_v58 = vpop.f32.mrb[112].mxu1  ;;  %7093 = vmatprep.mubr.msk.f32.mxu0 %vm2783_vm2, %v8470_v29 }
 0x3de   :  { %v2752_v60 = vadd.f32 %v6886_v58, %v2688_v32  ;;  %v2560_v63 = vpop.f32.mrb[113].mxu1  ;;  %v2700_v58 = vld [vmem:[%s9259_s3 + $0x1e8] sm:$0xff] }
 0x3df   :  { %7014 = vmatmul.mubr.msk.f32.gmra.mrb[166].mxu1 %vm2783_vm2, %v8482_v37  ;;  %v2751_v1 = vadd.f32 %v2687_v56, %v2560_v63  ;;  %7094 = vmatmul.mubr.msk.f32.gmra.mrb[70].mxu0 %vm2783_vm2, %v8482_v37  ;;  %v2699_v63 = vld [vmem:[%s9259_s3 + $0x1e0] sm:$0xff] }
 0x3e0   :  { %7016 = vmatprep.mubr.msk.f32.mxu1 %vm2783_vm2, %v8490_v55  ;;  %7607 = vmatpush3.bf16.msra.mxu1 %v8613_v43  ;;  %v2692_v43 = vld [vmem:[%s9259_s3 + $0x1a8] sm:$0xff] }
 0x3e1   :  { %7625 = vmatprep.subr.bf16.mxu1 %v8666_v35  ;;  %v7640_v3 = vpack.c.bf16 %v2752_v60, %v2751_v1  ;;  %v6889_v4 = vpop.f32.mrb[114].mxu1  ;;  %7096 = vmatprep.mubr.msk.f32.mxu0 %vm2783_vm2, %v8490_v55  ;;  %v7676_v60 = vpack.c.bf16 %v3995_v49, %v3994_v46  ;;  %v3996_v1 = vld [vmem:[%s9266_s10 + $0x20] sm:$0xff] }
 0x3e2   :  { %v2754_v5 = vadd.f32 %v6889_v4, %v2690_v0  ;;  %v2570_v11 = vpop.f32.mrb[115].mxu1  ;;  %v3997_v0 = vld [vmem:[%s9266_s10 + $0x28] sm:$0xff] }
 0x3e3   :  { %7017 = vmatmul.mubr.msk.f32.gmra.mrb[168].mxu1 %vm2783_vm2, %v8502_v39  ;;  %v2753_v12 = vadd.f32 %v2689_v2, %v2570_v11  ;;  %7097 = vmatmul.mubr.msk.f32.gmra.mrb[72].mxu0 %vm2783_vm2, %v8502_v39  ;;  %v2702_v11 = vld [vmem:[%s9259_s3 + $0x1f8] sm:$0xff] }
 0x3e4   :  { %7019 = vmatprep.mubr.msk.f32.mxu1 %vm2783_vm2, %v8510_v41  ;;  %7099 = vmatprep.mubr.msk.f32.mxu0 %vm2783_vm2, %v8510_v41 }
 0x3e5   :  { %v7644_v14 = vpack.c.bf16 %v2754_v5, %v2753_v12  ;;  %v6892_v15 = vpop.f32.mrb[116].mxu1  ;;  %7641 = vmatprep.subr.bf16.mxu0 %v7640_v3  ;;  %v7680_v12 = vpack.c.bf16 %v3997_v0, %v3996_v1 }
 0x3e6   :  { %v2756_v17 = vadd.f32 %v6892_v15, %v2692_v43  ;;  %v2580_v19 = vpop.f32.mrb[117].mxu1  ;;  %7643 = vmatpush3.bf16.msra.mxu0 %v7640_v3  ;;  %v2701_v43 = vld [vmem:[%s9259_s3 + $0x1f0] sm:$0xff]  ;;  %s7743_s3 = smov [#allocation5]  }
 0x3e7   :  { %7020 = vmatmul.mubr.msk.f32.gmra.mrb[170].mxu1 %vm2783_vm2, %v8522_v48  ;;  %v2755_v21 = vadd.f32 %v2691_v13, %v2580_v19  ;;  %7100 = vmatmul.mubr.msk.f32.gmra.mrb[74].mxu0 %vm2783_vm2, %v8522_v48  ;;  %v3998_v13 = vld [vmem:[%s9266_s10 + $0x30] sm:$0xff] }
 0x3e8   :  { %7022 = vmatprep.mubr.msk.f32.mxu1 %vm2783_vm2, %v8530_v50  ;;  %7102 = vmatprep.mubr.msk.f32.mxu0 %vm2783_vm2, %v8530_v50 }
 0x3e9   :  { %v7648_v25 = vpack.c.bf16 %v2756_v17, %v2755_v21  ;;  %v6895_v26 = vpop.f32.mrb[118].mxu1  ;;  %7645 = vmatprep.subr.bf16.mxu0 %v7644_v14 }
 0x3ea   :  { %v2758_v28 = vadd.f32 %v6895_v26, %v2694_v23  ;;  %v2590_v30 = vpop.f32.mrb[119].mxu1  ;;  %7647 = vmatpush3.bf16.msra.mxu0 %v7644_v14  ;;  %v3999_v14 = vld [vmem:[%s9266_s10 + $0x38] sm:$0xff]  ;;  %s5478_s10 = sshll.u32 %s7743_s3, 4  ;;  %s5479_s10 = int_to_ptr.vmem [resolvable:$true] %s5478_s10 }
 0x3eb   :  { %7023 = vmatmul.mubr.msk.f32.gmra.mrb[172].mxu1 %vm2783_vm2, %v8542_v59  ;;  %v2757_v33 = vadd.f32 %v2693_v24, %v2590_v30  ;;  %7103 = vmatmul.mubr.msk.f32.gmra.mrb[76].mxu0 %vm2783_vm2, %v8542_v59  ;;  %v7684_v23 = vpack.c.bf16 %v3999_v14, %v3998_v13  ;;  %s7714_s26 = scalar_lea.vmem %s5479_s10, 16384  ;;  %p7719_p9 = scmp.lt.s32.totalorder %s5479_s10, %s5479_s10 }
 0x3ec   :  { %7025 = vmatprep.mubr.msk.f32.mxu1 %vm2783_vm2, %v8550_v61  ;;  %7105 = vmatprep.mubr.msk.f32.mxu0 %vm2783_vm2, %v8550_v61  ;;  %p7715_p8 = scmp.ne.s32.totalorder %s5479_s10, %s7714_s26  ;;  %p7720_p10 = scmp.lt.s32.totalorder %s7714_s26, %s7714_s26 }
 0x3ed   :  { %v7652_v7 = vpack.c.bf16 %v2758_v28, %v2757_v33  ;;  %v6898_v9 = vpop.f32.mrb[120].mxu1  ;;  %7649 = vmatprep.subr.bf16.mxu0 %v7648_v25 }
 0x3ee   :  { %v2760_v16 = vadd.f32 %v6898_v9, %v2696_v34  ;;  %v2600_v40 = vpop.f32.mrb[121].mxu1  ;;  %7651 = vmatpush3.bf16.msra.mxu0 %v7648_v25  ;;  %p7721_p11 = por %p7720_p10, %p7719_p9 }
 0x3ef   :  { %7026 = vmatmul.mubr.msk.f32.gmra.mrb[174].mxu1 %vm2783_vm2, %v8562_v8  ;;  %v2759_v42 = vadd.f32 %v2695_v36, %v2600_v40  ;;  %7106 = vmatmul.mubr.msk.f32.gmra.mrb[78].mxu0 %vm2783_vm2, %v8562_v8 }
 0x3f0   :  { %7044 = vmatprep.mubr.msk.f32.mxu1 %vm2783_vm2, %v8369_v31  ;;  %7653 = vmatprep.subr.bf16.mxu0 %v7652_v7  ;;  %p7722_p12 = pnand %p7721_p11, %p7715_p8 }
 0x3f1   :  { %v8804_v51 = vpack.c.bf16 %v2760_v16, %v2759_v42  ;;  %v6901_v52 = vpop.f32.mrb[122].mxu1  ;;  %7164 = vmatprep.mubr.msk.f32.mxu0 %vm2783_vm2, %v8369_v31 }
 0x3f2   :  { %v2762_v54 = vadd.f32 %v6901_v52, %v2698_v44  ;;  %v2610_v32 = vpop.f32.mrb[123].mxu1  ;;  %7655 = vmatpush3.bf16.msra.mxu0 %v7652_v7 }
 0x3f3   :  { %7045 = vmatmul.mubr.msk.f32.vlgmr.msra.gmra.mrb[176].mxu1 %vm2783_vm2, %v8422_v6  ;;  %v2761_v56 = vadd.f32 %v2697_v22, %v2610_v32  ;;  %7673 = vmatprep.subr.bf16.mxu0 %v7672_v45 }
 0x3f4   :  { %7047 = vmatprep.mubr.msk.f32.mxu1 %vm2783_vm2, %v8430_v10  ;;  %7627 = vmatpush3.bf16.msra.mxu1 %v8666_v35 }
 0x3f5   :  { %7629 = vmatprep.subr.bf16.mxu1 %v8682_v38  ;;  %v8826_v2 = vpack.c.bf16 %v2762_v54, %v2761_v56  ;;  %v6904_v3 = vpop.f32.mrb[124].mxu1  ;;  %7165 = vmatmul.mubr.msk.f32.vlgmr.msra.gmra.mrb[80].mxu0 %vm2783_vm2, %v8422_v6 }
 0x3f6   :  { %v2764_v35 = vadd.f32 %v6904_v3, %v2700_v58  ;;  %v2620_v4 = vpop.f32.mrb[125].mxu1  ;;  %7167 = vmatprep.mubr.msk.f32.mxu0 %vm2783_vm2, %v8430_v10  ;;  %7675 = vmatpush3.bf16.msra.mxu0 %v7672_v45 }
 0x3f7   :  { %7048 = vmatmul.mubr.msk.f32.gmra.mrb[178].mxu1 %vm2783_vm2, %v8442_v18  ;;  %v2763_v5 = vadd.f32 %v2699_v63, %v2620_v4  ;;  %7677 = vmatprep.subr.bf16.mxu0 %v7676_v60 }
 0x3f8   :  { %7050 = vmatprep.mubr.msk.f32.mxu1 %vm2783_vm2, %v8450_v20  ;;  %7631 = vmatpush3.bf16.msra.mxu1 %v8682_v38 }
 0x3f9   :  { %7633 = vmatprep.subr.bf16.mxu1 %v8700_v47  ;;  %v7664_v15 = vpack.c.bf16 %v2764_v35, %v2763_v5  ;;  %v6907_v17 = vpop.f32.mrb[126].mxu1  ;;  %7168 = vmatmul.mubr.msk.f32.gmra.mrb[82].mxu0 %vm2783_vm2, %v8442_v18 }
 0x3fa   :  { %v2766_v38 = vadd.f32 %v6907_v17, %v2702_v11  ;;  %v2630_v19 = vpop.f32.mrb[127].mxu1  ;;  %7170 = vmatprep.mubr.msk.f32.mxu0 %vm2783_vm2, %v8450_v20  ;;  %7679 = vmatpush3.bf16.msra.mxu0 %v7676_v60 }
 0x3fb   :  { %7051 = vmatmul.mubr.msk.f32.gmra.mrb[180].mxu1 %vm2783_vm2, %v8462_v27  ;;  %v2765_v21 = vadd.f32 %v2701_v43, %v2630_v19  ;;  %7681 = vmatprep.subr.bf16.mxu0 %v7680_v12 }
 0x3fc   :  { %7053 = vmatprep.mubr.msk.f32.mxu1 %vm2783_vm2, %v8470_v29  ;;  %7635 = vmatpush3.bf16.msra.mxu1 %v8700_v47 }
 0x3fd   :  { %7637 = vmatprep.subr.bf16.mxu1 %v8718_v57  ;;  %v7668_v24 = vpack.c.bf16 %v2766_v38, %v2765_v21  ;;  %7171 = vmatmul.mubr.msk.f32.gmra.mrb[84].mxu0 %vm2783_vm2, %v8462_v27 }
 0x3fe   :  { %7173 = vmatprep.mubr.msk.f32.mxu0 %vm2783_vm2, %v8470_v29  ;;  %7683 = vmatpush3.bf16.msra.mxu0 %v7680_v12 }
 0x3ff   :  { %7054 = vmatmul.mubr.msk.f32.gmra.mrb[182].mxu1 %vm2783_vm2, %v8482_v37  ;;  %7685 = vmatprep.subr.bf16.mxu0 %v7684_v23 }
 0x400   :  { %7056 = vmatprep.mubr.msk.f32.mxu1 %vm2783_vm2, %v8490_v55  ;;  %7639 = vmatpush3.bf16.msra.mxu1 %v8718_v57 }
 0x401   :  { %7657 = vmatprep.subr.bf16.mxu1 %v8804_v51  ;;  %7174 = vmatmul.mubr.msk.f32.gmra.mrb[86].mxu0 %vm2783_vm2, %v8482_v37 }
 0x402   :  { %7176 = vmatprep.mubr.msk.f32.mxu0 %vm2783_vm2, %v8490_v55  ;;  %7687 = vmatpush3.bf16.msra.mxu0 %v7684_v23 }
 0x403   :  { %7057 = vmatmul.mubr.msk.f32.gmra.mrb[184].mxu1 %vm2783_vm2, %v8502_v39 }
 0x404   :  { %7059 = vmatprep.mubr.msk.f32.mxu1 %vm2783_vm2, %v8510_v41 }
 0x405   :  { %7177 = vmatmul.mubr.msk.f32.gmra.mrb[88].mxu0 %vm2783_vm2, %v8502_v39 }
 0x406   :  { %7179 = vmatprep.mubr.msk.f32.mxu0 %vm2783_vm2, %v8510_v41 }
 0x407   :  { %7060 = vmatmul.mubr.msk.f32.gmra.mrb[186].mxu1 %vm2783_vm2, %v8522_v48 }
 0x408   :  { %7062 = vmatprep.mubr.msk.f32.mxu1 %vm2783_vm2, %v8530_v50 }
 0x409   :  { %7180 = vmatmul.mubr.msk.f32.gmra.mrb[90].mxu0 %vm2783_vm2, %v8522_v48 }
 0x40a   :  { %7182 = vmatprep.mubr.msk.f32.mxu0 %vm2783_vm2, %v8530_v50 }
 0x40b   :  { %7063 = vmatmul.mubr.msk.f32.gmra.mrb[188].mxu1 %vm2783_vm2, %v8542_v59 }
 0x40c   :  { %7065 = vmatprep.mubr.msk.f32.mxu1 %vm2783_vm2, %v8550_v61 }
 0x40d   :  { %7183 = vmatmul.mubr.msk.f32.gmra.mrb[92].mxu0 %vm2783_vm2, %v8542_v59 }
 0x40e   :  { %7185 = vmatprep.mubr.msk.f32.mxu0 %vm2783_vm2, %v8550_v61 }
 0x40f   :  { %7066 = vmatmul.mubr.msk.f32.gmra.mrb[190].mxu1 %vm2783_vm2, %v8562_v8 }
 0x410   :  { %7124 = vmatprep.mubr.msk.f32.mxu1 %vm2783_vm2, %v8369_v31 }
 0x411   :  { %7186 = vmatmul.mubr.msk.f32.gmra.mrb[94].mxu0 %vm2783_vm2, %v8562_v8 }
 0x413   :  { %7125 = vmatmul.mubr.msk.f32.vlgmr.msra.gmra.mrb[192].mxu1 %vm2783_vm2, %v8422_v6 }
 0x414   :  { %7659 = vmatpush3.bf16.msra.mxu1 %v8804_v51  ;;  %7127 = vmatprep.mubr.msk.f32.mxu1 %vm2783_vm2, %v8430_v10 }
 0x415   :  { %7661 = vmatprep.subr.bf16.mxu1 %v8826_v2 }
 0x417   :  { %7128 = vmatmul.mubr.msk.f32.gmra.mrb[194].mxu1 %vm2783_vm2, %v8442_v18 }
 0x418   :  { %7663 = vmatpush3.bf16.msra.mxu1 %v8826_v2  ;;  %7130 = vmatprep.mubr.msk.f32.mxu1 %vm2783_vm2, %v8450_v20 }
 0x419   :  { %7665 = vmatprep.subr.bf16.mxu1 %v7664_v15 }
 0x41b   :  { %7131 = vmatmul.mubr.msk.f32.gmra.mrb[196].mxu1 %vm2783_vm2, %v8462_v27 }
 0x41c   :  { %7667 = vmatpush3.bf16.msra.mxu1 %v7664_v15  ;;  %7133 = vmatprep.mubr.msk.f32.mxu1 %vm2783_vm2, %v8470_v29 }
 0x41d   :  { %7669 = vmatprep.subr.bf16.mxu1 %v7668_v24 }
 0x41f   :  { %7134 = vmatmul.mubr.msk.f32.gmra.mrb[198].mxu1 %vm2783_vm2, %v8482_v37 }
 0x420   :  { %7671 = vmatpush3.bf16.msra.mxu1 %v7668_v24  ;;  %7136 = vmatprep.mubr.msk.f32.mxu1 %vm2783_vm2, %v8490_v55 }
 0x423   :  { %7137 = vmatmul.mubr.msk.f32.gmra.mrb[200].mxu1 %vm2783_vm2, %v8502_v39 }
 0x424   :  { %7139 = vmatprep.mubr.msk.f32.mxu1 %vm2783_vm2, %v8510_v41 }
 0x427   :  { %7140 = vmatmul.mubr.msk.f32.gmra.mrb[202].mxu1 %vm2783_vm2, %v8522_v48 }
 0x428   :  { %7142 = vmatprep.mubr.msk.f32.mxu1 %vm2783_vm2, %v8530_v50 }
 0x42b   :  { %7143 = vmatmul.mubr.msk.f32.gmra.mrb[204].mxu1 %vm2783_vm2, %v8542_v59 }
 0x42c   :  { %7145 = vmatprep.mubr.msk.f32.mxu1 %vm2783_vm2, %v8550_v61 }
 0x42f   :  { %7146 = vmatmul.mubr.msk.f32.gmra.mrb[206].mxu1 %vm2783_vm2, %v8562_v8 }
 0x430   :  { %7204 = vmatprep.mubr.msk.f32.mxu1 %vm2783_vm2, %v8369_v31 }
 0x433   :  { %7205 = vmatmul.mubr.msk.f32.vlgmr.msra.gmra.mrb[208].mxu1 %vm2783_vm2, %v8422_v6 }
 0x434   :  { %7207 = vmatprep.mubr.msk.f32.mxu1 %vm2783_vm2, %v8430_v10 }
 0x437   :  { %7208 = vmatmul.mubr.msk.f32.gmra.mrb[210].mxu1 %vm2783_vm2, %v8442_v18 }
 0x438   :  { %7210 = vmatprep.mubr.msk.f32.mxu1 %vm2783_vm2, %v8450_v20 }
 0x43b   :  { %7211 = vmatmul.mubr.msk.f32.gmra.mrb[212].mxu1 %vm2783_vm2, %v8462_v27 }
 0x43c   :  { %7213 = vmatprep.mubr.msk.f32.mxu1 %vm2783_vm2, %v8470_v29 }
 0x43f   :  { %7214 = vmatmul.mubr.msk.f32.gmra.mrb[214].mxu1 %vm2783_vm2, %v8482_v37 }
 0x440   :  { %7216 = vmatprep.mubr.msk.f32.mxu1 %vm2783_vm2, %v8490_v55 }
 0x443   :  { %7217 = vmatmul.mubr.msk.f32.gmra.mrb[216].mxu1 %vm2783_vm2, %v8502_v39 }
 0x444   :  { %7219 = vmatprep.mubr.msk.f32.mxu1 %vm2783_vm2, %v8510_v41 }
 0x447   :  { %7220 = vmatmul.mubr.msk.f32.gmra.mrb[218].mxu1 %vm2783_vm2, %v8522_v48 }
 0x448   :  { %7222 = vmatprep.mubr.msk.f32.mxu1 %vm2783_vm2, %v8530_v50 }
 0x44b   :  { %7223 = vmatmul.mubr.msk.f32.gmra.mrb[220].mxu1 %vm2783_vm2, %v8542_v59 }
 0x44c   :  { %7225 = vmatprep.mubr.msk.f32.mxu1 %vm2783_vm2, %v8550_v61 }
 0x44f   :  { %7226 = vmatmul.mubr.msk.f32.gmra.mrb[222].mxu1 %vm2783_vm2, %v8562_v8 }
 0x466   :  { %v6926_v31 = vpop.f32.mrb[128].mxu1 }
 0x467   :  { %v2898_v6 = vpop.f32.mrb[129].mxu1 }
 0x468   :  { %7244 = vmatprep.mubr.msk.f32.mxu0 %vm2783_vm2, %v2898_v6 }
 0x469   :  { %7245 = vmatmul.mubr.msk.f32.vlgmr.msra.gmra.mrb[96].mxu0 %vm2783_vm2, %v6926_v31 }
 0x46a   :  { %v6929_v10 = vpop.f32.mrb[130].mxu1 }
 0x46b   :  { %v2908_v18 = vpop.f32.mrb[131].mxu1 }
 0x46c   :  { %7247 = vmatprep.mubr.msk.f32.mxu0 %vm2783_vm2, %v2908_v18 }
 0x46d   :  { %7248 = vmatmul.mubr.msk.f32.gmra.mrb[98].mxu0 %vm2783_vm2, %v6929_v10 }
 0x46e   :  { %v6932_v20 = vpop.f32.mrb[132].mxu1 }
 0x46f   :  { %v2918_v27 = vpop.f32.mrb[133].mxu1 }
 0x470   :  { %7250 = vmatprep.mubr.msk.f32.mxu0 %vm2783_vm2, %v2918_v27 }
 0x471   :  { %7251 = vmatmul.mubr.msk.f32.gmra.mrb[100].mxu0 %vm2783_vm2, %v6932_v20 }
 0x472   :  { %v6935_v29 = vpop.f32.mrb[134].mxu1 }
 0x473   :  { %v2928_v37 = vpop.f32.mrb[135].mxu1 }
 0x474   :  { %7253 = vmatprep.mubr.msk.f32.mxu0 %vm2783_vm2, %v2928_v37 }
 0x475   :  { %7254 = vmatmul.mubr.msk.f32.gmra.mrb[102].mxu0 %vm2783_vm2, %v6935_v29 }
 0x476   :  { %v6938_v55 = vpop.f32.mrb[136].mxu1 }
 0x477   :  { %v2938_v39 = vpop.f32.mrb[137].mxu1 }
 0x478   :  { %7256 = vmatprep.mubr.msk.f32.mxu0 %vm2783_vm2, %v2938_v39 }
 0x479   :  { %7257 = vmatmul.mubr.msk.f32.gmra.mrb[104].mxu0 %vm2783_vm2, %v6938_v55 }
 0x47a   :  { %v6941_v41 = vpop.f32.mrb[138].mxu1 }
 0x47b   :  { %v2948_v48 = vpop.f32.mrb[139].mxu1 }
 0x47c   :  { %7259 = vmatprep.mubr.msk.f32.mxu0 %vm2783_vm2, %v2948_v48 }
 0x47d   :  { %7260 = vmatmul.mubr.msk.f32.gmra.mrb[106].mxu0 %vm2783_vm2, %v6941_v41 }
 0x47e   :  { %v6944_v50 = vpop.f32.mrb[140].mxu1 }
 0x47f   :  { %v2958_v59 = vpop.f32.mrb[141].mxu1 }
 0x480   :  { %7262 = vmatprep.mubr.msk.f32.mxu0 %vm2783_vm2, %v2958_v59 }
 0x481   :  { %7263 = vmatmul.mubr.msk.f32.gmra.mrb[108].mxu0 %vm2783_vm2, %v6944_v50 }
 0x482   :  { %v6947_v61 = vpop.f32.mrb[142].mxu1 }
 0x483   :  { %v2968_v8 = vpop.f32.mrb[143].mxu1 }
 0x484   :  { %7265 = vmatprep.mubr.msk.f32.mxu0 %vm2783_vm2, %v2968_v8 }
 0x485   :  { %7266 = vmatmul.mubr.msk.f32.gmra.mrb[110].mxu0 %vm2783_vm2, %v6947_v61 }
 0x486   :  { %v6966_v47 = vpop.f32.mrb[144].mxu1 }
 0x487   :  { %v3043_v57 = vpop.f32.mrb[145].mxu1 }
 0x488   :  { %7268 = vmatprep.mubr.msk.f32.mxu0 %vm2783_vm2, %v3043_v57 }
 0x489   :  { %7269 = vmatmul.mubr.msk.f32.gmra.mrb[112].mxu0 %vm2783_vm2, %v6966_v47 }
 0x48a   :  { %v6969_v25 = vpop.f32.mrb[146].mxu1 }
 0x48b   :  { %v3053_v26 = vpop.f32.mrb[147].mxu1 }
 0x48c   :  { %7271 = vmatprep.mubr.msk.f32.mxu0 %vm2783_vm2, %v3053_v26 }
 0x48d   :  { %7272 = vmatmul.mubr.msk.f32.gmra.mrb[114].mxu0 %vm2783_vm2, %v6969_v25 }
 0x48e   :  { %v6972_v28 = vpop.f32.mrb[148].mxu1 }
 0x48f   :  { %v3063_v30 = vpop.f32.mrb[149].mxu1 }
 0x490   :  { %7274 = vmatprep.mubr.msk.f32.mxu0 %vm2783_vm2, %v3063_v30 }
 0x491   :  { %7275 = vmatmul.mubr.msk.f32.gmra.mrb[116].mxu0 %vm2783_vm2, %v6972_v28 }
 0x492   :  { %v6975_v33 = vpop.f32.mrb[150].mxu1 }
 0x493   :  { %v3073_v34 = vpop.f32.mrb[151].mxu1 }
 0x494   :  { %7277 = vmatprep.mubr.msk.f32.mxu0 %vm2783_vm2, %v3073_v34 }
 0x495   :  { %7278 = vmatmul.mubr.msk.f32.gmra.mrb[118].mxu0 %vm2783_vm2, %v6975_v33 }
 0x496   :  { %v6978_v36 = vpop.f32.mrb[152].mxu1 }
 0x497   :  { %v3083_v53 = vpop.f32.mrb[153].mxu1 }
 0x498   :  { %7280 = vmatprep.mubr.msk.f32.mxu0 %vm2783_vm2, %v3083_v53 }
 0x499   :  { %7281 = vmatmul.mubr.msk.f32.gmra.mrb[120].mxu0 %vm2783_vm2, %v6978_v36 }
 0x49a   :  { %v6981_v62 = vpop.f32.mrb[154].mxu1 }
 0x49b   :  { %v3093_v7 = vpop.f32.mrb[155].mxu1 }
 0x49c   :  { %7283 = vmatprep.mubr.msk.f32.mxu0 %vm2783_vm2, %v3093_v7 }
 0x49d   :  { %7284 = vmatmul.mubr.msk.f32.gmra.mrb[122].mxu0 %vm2783_vm2, %v6981_v62 }
 0x49e   :  { %v6984_v9 = vpop.f32.mrb[156].mxu1 }
 0x49f   :  { %v3103_v16 = vpop.f32.mrb[157].mxu1 }
 0x4a0   :  { %7286 = vmatprep.mubr.msk.f32.mxu0 %vm2783_vm2, %v3103_v16 }
 0x4a1   :  { %7287 = vmatmul.mubr.msk.f32.gmra.mrb[124].mxu0 %vm2783_vm2, %v6984_v9 }
 0x4a2   :  { %v6987_v40 = vpop.f32.mrb[158].mxu1 }
 0x4a3   :  { %v3113_v42 = vpop.f32.mrb[159].mxu1 }
 0x4a4   :  { %7289 = vmatprep.mubr.msk.f32.mxu0 %vm2783_vm2, %v3113_v42 }
 0x4a5   :  { %7290 = vmatmul.mubr.msk.f32.gmra.mrb[126].mxu0 %vm2783_vm2, %v6987_v40 }
 0x4a6   :  { %v7006_v44 = vpop.f32.mrb[160].mxu1  ;;  %v9001_v45 = vpop.f32.mrb[64].mxu0 }
 0x4a7   :  { %v3188_v22 = vpop.f32.mrb[161].mxu1  ;;  %v9003_v46 = vpop.f32.mrb[65].mxu0 }
 0x4a8   :  { %7292 = vmatprep.mubr.msk.f32.mxu0 %vm2783_vm2, %v3188_v22 }
 0x4a9   :  { %7293 = vmatmul.mubr.msk.f32.gmra.mrb[128].mxu0 %vm2783_vm2, %v7006_v44 }
 0x4aa   :  { %v7009_v49 = vpop.f32.mrb[162].mxu1  ;;  %v9007_v51 = vpop.f32.mrb[66].mxu0 }
 0x4ab   :  { %v3198_v52 = vpop.f32.mrb[163].mxu1  ;;  %v9009_v54 = vpop.f32.mrb[67].mxu0 }
 0x4ac   :  { %7295 = vmatprep.mubr.msk.f32.mxu0 %vm2783_vm2, %v3198_v52 }
 0x4ad   :  { %7296 = vmatmul.mubr.msk.f32.gmra.mrb[130].mxu0 %vm2783_vm2, %v7009_v49 }
 0x4ae   :  { %v7012_v32 = vpop.f32.mrb[164].mxu1  ;;  %v9013_v56 = vpop.f32.mrb[68].mxu0 }
 0x4af   :  { %v3208_v58 = vpop.f32.mrb[165].mxu1  ;;  %v9015_v60 = vpop.f32.mrb[69].mxu0 }
 0x4b0   :  { %7298 = vmatprep.mubr.msk.f32.mxu0 %vm2783_vm2, %v3208_v58 }
 0x4b1   :  { %7299 = vmatmul.mubr.msk.f32.gmra.mrb[132].mxu0 %vm2783_vm2, %v7012_v32 }
 0x4b2   :  { %v7015_v63 = vpop.f32.mrb[166].mxu1  ;;  %v9019_v1 = vpop.f32.mrb[70].mxu0 }
 0x4b3   :  { %v3218_v0 = vpop.f32.mrb[167].mxu1  ;;  %v9021_v2 = vpop.f32.mrb[71].mxu0 }
 0x4b4   :  { %7301 = vmatprep.mubr.msk.f32.mxu0 %vm2783_vm2, %v3218_v0 }
 0x4b5   :  { %7302 = vmatmul.mubr.msk.f32.gmra.mrb[134].mxu0 %vm2783_vm2, %v7015_v63 }
 0x4b6   :  { %v7018_v3 = vpop.f32.mrb[168].mxu1  ;;  %v9025_v35 = vpop.f32.mrb[72].mxu0 }
 0x4b7   :  { %v3228_v4 = vpop.f32.mrb[169].mxu1  ;;  %v9027_v5 = vpop.f32.mrb[73].mxu0 }
 0x4b8   :  { %7304 = vmatprep.mubr.msk.f32.mxu0 %vm2783_vm2, %v3228_v4 }
 0x4b9   :  { %7305 = vmatmul.mubr.msk.f32.gmra.mrb[136].mxu0 %vm2783_vm2, %v7018_v3 }
 0x4ba   :  { %v7021_v11 = vpop.f32.mrb[170].mxu1  ;;  %v9031_v12 = vpop.f32.mrb[74].mxu0 }
 0x4bb   :  { %v3238_v43 = vpop.f32.mrb[171].mxu1  ;;  %v9033_v13 = vpop.f32.mrb[75].mxu0 }
 0x4bc   :  { %7307 = vmatprep.mubr.msk.f32.mxu0 %vm2783_vm2, %v3238_v43 }
 0x4bd   :  { %7308 = vmatmul.mubr.msk.f32.gmra.mrb[138].mxu0 %vm2783_vm2, %v7021_v11 }
 0x4be   :  { %v7024_v14 = vpop.f32.mrb[172].mxu1  ;;  %v9037_v15 = vpop.f32.mrb[76].mxu0 }
 0x4bf   :  { %v3248_v17 = vpop.f32.mrb[173].mxu1  ;;  %v9039_v38 = vpop.f32.mrb[77].mxu0 }
 0x4c0   :  { %7310 = vmatprep.mubr.msk.f32.mxu0 %vm2783_vm2, %v3248_v17 }
 0x4c1   :  { %7311 = vmatmul.mubr.msk.f32.gmra.mrb[140].mxu0 %vm2783_vm2, %v7024_v14 }
 0x4c2   :  { %v7027_v19 = vpop.f32.mrb[174].mxu1  ;;  %v9043_v21 = vpop.f32.mrb[78].mxu0 }
 0x4c3   :  { %v3258_v23 = vpop.f32.mrb[175].mxu1  ;;  %v9045_v24 = vpop.f32.mrb[79].mxu0 }
 0x4c4   :  { %7313 = vmatprep.mubr.msk.f32.mxu0 %vm2783_vm2, %v3258_v23 }
 0x4c5   :  { %7314 = vmatmul.mubr.msk.f32.gmra.mrb[142].mxu0 %vm2783_vm2, %v7027_v19 }
 0x4c6   :  { %v7046_v31 = vpop.f32.mrb[176].mxu1 }
 0x4c7   :  { %v3333_v6 = vpop.f32.mrb[177].mxu1 }
 0x4c8   :  { %7316 = vmatprep.mubr.msk.f32.mxu0 %vm2783_vm2, %v3333_v6  ;;  %v9050_v10 = vpop.f32.mrb[80].mxu0  ;;  %v5089_v6 = vld [vmem:[#allocation2] sm:$0xff] }
 0x4c9   :  { %7317 = vmatmul.mubr.msk.f32.gmra.mrb[144].mxu0 %vm2783_vm2, %v7046_v31  ;;  %v9053_v18 = vpop.f32.mrb[81].mxu0  ;;  %v5090_v31 = vld [vmem:[#allocation2 + $0x8] sm:$0xff] }
 0x4ca   :  { %v7049_v20 = vpop.f32.mrb[178].mxu1 }
 0x4cb   :  { %v3343_v27 = vpop.f32.mrb[179].mxu1 }
 0x4cc   :  { %7319 = vmatprep.mubr.msk.f32.mxu0 %vm2783_vm2, %v3343_v27  ;;  %v9056_v29 = vpop.f32.mrb[82].mxu0 }
 0x4cd   :  { %7320 = vmatmul.mubr.msk.f32.gmra.mrb[146].mxu0 %vm2783_vm2, %v7049_v20  ;;  %v9059_v37 = vpop.f32.mrb[83].mxu0 }
 0x4ce   :  { %v7052_v55 = vpop.f32.mrb[180].mxu1 }
 0x4cf   :  { %v3353_v39 = vpop.f32.mrb[181].mxu1 }
 0x4d0   :  { %7322 = vmatprep.mubr.msk.f32.mxu0 %vm2783_vm2, %v3353_v39  ;;  %v9062_v41 = vpop.f32.mrb[84].mxu0 }
 0x4d1   :  { %7323 = vmatmul.mubr.msk.f32.gmra.mrb[148].mxu0 %vm2783_vm2, %v7052_v55  ;;  %v9065_v48 = vpop.f32.mrb[85].mxu0 }
 0x4d2   :  { %v7055_v50 = vpop.f32.mrb[182].mxu1 }
 0x4d3   :  { %v3363_v59 = vpop.f32.mrb[183].mxu1 }
 0x4d4   :  { %7325 = vmatprep.mubr.msk.f32.mxu0 %vm2783_vm2, %v3363_v59  ;;  %v9068_v61 = vpop.f32.mrb[86].mxu0  ;;  %v5093_v59 = vld [vmem:[#allocation2 + $0x20] sm:$0xff] }
 0x4d5   :  { %7326 = vmatmul.mubr.msk.f32.gmra.mrb[150].mxu0 %vm2783_vm2, %v7055_v50  ;;  %v9071_v8 = vpop.f32.mrb[87].mxu0  ;;  %v5094_v50 = vld [vmem:[#allocation2 + $0x28] sm:$0xff] }
 0x4d6   :  { %v7058_v47 = vpop.f32.mrb[184].mxu1 }
 0x4d7   :  { %v3373_v57 = vpop.f32.mrb[185].mxu1 }
 0x4d8   :  { %7328 = vmatprep.mubr.msk.f32.mxu0 %vm2783_vm2, %v3373_v57  ;;  %v9074_v25 = vpop.f32.mrb[88].mxu0 }
 0x4d9   :  { %7329 = vmatmul.mubr.msk.f32.gmra.mrb[152].mxu0 %vm2783_vm2, %v7058_v47  ;;  %v9077_v26 = vpop.f32.mrb[89].mxu0 }
 0x4da   :  { %v7061_v28 = vpop.f32.mrb[186].mxu1 }
 0x4db   :  { %v3383_v30 = vpop.f32.mrb[187].mxu1 }
 0x4dc   :  { %7331 = vmatprep.mubr.msk.f32.mxu0 %vm2783_vm2, %v3383_v30  ;;  %v9080_v33 = vpop.f32.mrb[90].mxu0 }
 0x4dd   :  { %7332 = vmatmul.mubr.msk.f32.gmra.mrb[154].mxu0 %vm2783_vm2, %v7061_v28  ;;  %v9083_v34 = vpop.f32.mrb[91].mxu0 }
 0x4de   :  { %v7064_v36 = vpop.f32.mrb[188].mxu1 }
 0x4df   :  { %v3393_v53 = vpop.f32.mrb[189].mxu1 }
 0x4e0   :  { %7334 = vmatprep.mubr.msk.f32.mxu0 %vm2783_vm2, %v3393_v53  ;;  %v9086_v62 = vpop.f32.mrb[92].mxu0  ;;  %v5097_v53 = vld [vmem:[#allocation2 + $0x40] sm:$0xff] }
 0x4e1   :  { %7335 = vmatmul.mubr.msk.f32.gmra.mrb[156].mxu0 %vm2783_vm2, %v7064_v36  ;;  %v9089_v7 = vpop.f32.mrb[93].mxu0  ;;  %v5098_v36 = vld [vmem:[#allocation2 + $0x48] sm:$0xff] }
 0x4e2   :  { %v7067_v9 = vpop.f32.mrb[190].mxu1 }
 0x4e3   :  { %v3403_v16 = vpop.f32.mrb[191].mxu1 }
 0x4e4   :  { %7337 = vmatprep.mubr.msk.f32.mxu0 %vm2783_vm2, %v3403_v16  ;;  %v9092_v40 = vpop.f32.mrb[94].mxu0 }
 0x4e5   :  { %7338 = vmatmul.mubr.msk.f32.gmra.mrb[158].mxu0 %vm2783_vm2, %v7067_v9  ;;  %v9095_v42 = vpop.f32.mrb[95].mxu0 }
 0x4e6   :  { %7340 = vmatprep.mubr.msk.f32.mxu0 %vm2783_vm2, %v9003_v46  ;;  %v7126_v44 = vpop.f32.mrb[192].mxu1 }
 0x4e7   :  { %v3623_v22 = vpop.f32.mrb[193].mxu1 }
 0x4e9   :  { %7341 = vmatmul.mubr.msk.f32.gmra.mrb[160].mxu0 %vm2783_vm2, %v9001_v45 }
 0x4ea   :  { %7343 = vmatprep.mubr.msk.f32.mxu0 %vm2783_vm2, %v9009_v54  ;;  %v7129_v49 = vpop.f32.mrb[194].mxu1 }
 0x4eb   :  { %v3633_v52 = vpop.f32.mrb[195].mxu1 }
 0x4ed   :  { %7344 = vmatmul.mubr.msk.f32.gmra.mrb[162].mxu0 %vm2783_vm2, %v9007_v51 }
 0x4ee   :  { %7346 = vmatprep.mubr.msk.f32.mxu0 %vm2783_vm2, %v9015_v60  ;;  %v7132_v32 = vpop.f32.mrb[196].mxu1 }
 0x4ef   :  { %v3643_v58 = vpop.f32.mrb[197].mxu1 }
 0x4f1   :  { %7347 = vmatmul.mubr.msk.f32.gmra.mrb[164].mxu0 %vm2783_vm2, %v9013_v56 }
 0x4f2   :  { %7349 = vmatprep.mubr.msk.f32.mxu0 %vm2783_vm2, %v9021_v2  ;;  %v7135_v45 = vpop.f32.mrb[198].mxu1 }
 0x4f3   :  { %v3653_v46 = vpop.f32.mrb[199].mxu1 }
 0x4f5   :  { %7350 = vmatmul.mubr.msk.f32.gmra.mrb[166].mxu0 %vm2783_vm2, %v9019_v1 }
 0x4f6   :  { %7352 = vmatprep.mubr.msk.f32.mxu0 %vm2783_vm2, %v9027_v5  ;;  %v7138_v51 = vpop.f32.mrb[200].mxu1 }
 0x4f7   :  { %v3663_v54 = vpop.f32.mrb[201].mxu1 }
 0x4f9   :  { %7353 = vmatmul.mubr.msk.f32.gmra.mrb[168].mxu0 %vm2783_vm2, %v9025_v35 }
 0x4fa   :  { %7355 = vmatprep.mubr.msk.f32.mxu0 %vm2783_vm2, %v9033_v13  ;;  %v7141_v56 = vpop.f32.mrb[202].mxu1 }
 0x4fb   :  { %v3673_v60 = vpop.f32.mrb[203].mxu1 }
 0x4fd   :  { %7356 = vmatmul.mubr.msk.f32.gmra.mrb[170].mxu0 %vm2783_vm2, %v9031_v12 }
 0x4fe   :  { %7358 = vmatprep.mubr.msk.f32.mxu0 %vm2783_vm2, %v9039_v38  ;;  %v7144_v63 = vpop.f32.mrb[204].mxu1 }
 0x4ff   :  { %v3683_v1 = vpop.f32.mrb[205].mxu1 }
 0x501   :  { %7359 = vmatmul.mubr.msk.f32.gmra.mrb[172].mxu0 %vm2783_vm2, %v9037_v15 }
 0x502   :  { %7361 = vmatprep.mubr.msk.f32.mxu0 %vm2783_vm2, %v9045_v24  ;;  %v7147_v0 = vpop.f32.mrb[206].mxu1 }
 0x503   :  { %v3693_v2 = vpop.f32.mrb[207].mxu1 }
 0x505   :  { %7362 = vmatmul.mubr.msk.f32.gmra.mrb[174].mxu0 %vm2783_vm2, %v9043_v21 }
 0x506   :  { %7364 = vmatprep.mubr.msk.f32.mxu0 %vm2783_vm2, %v3623_v22  ;;  %v9130_v3 = vpop.f32.mrb[208].mxu1 }
 0x507   :  { %v9132_v35 = vpop.f32.mrb[209].mxu1 }
 0x509   :  { %7365 = vmatmul.mubr.msk.f32.gmra.mrb[176].mxu0 %vm2783_vm2, %v7126_v44 }
 0x50a   :  { %7367 = vmatprep.mubr.msk.f32.mxu0 %vm2783_vm2, %v3633_v52  ;;  %v9136_v4 = vpop.f32.mrb[210].mxu1 }
 0x50b   :  { %v9138_v5 = vpop.f32.mrb[211].mxu1 }
 0x50d   :  { %7368 = vmatmul.mubr.msk.f32.gmra.mrb[178].mxu0 %vm2783_vm2, %v7129_v49 }
 0x50e   :  { %7370 = vmatprep.mubr.msk.f32.mxu0 %vm2783_vm2, %v3643_v58  ;;  %v9142_v11 = vpop.f32.mrb[212].mxu1  ;;  %v5101_v58 = vld [vmem:[#allocation2 + $0x60] sm:$0xff] }
 0x50f   :  { %v9144_v12 = vpop.f32.mrb[213].mxu1 }
 0x511   :  { %7371 = vmatmul.mubr.msk.f32.gmra.mrb[180].mxu0 %vm2783_vm2, %v7132_v32  ;;  %v5102_v32 = vld [vmem:[#allocation2 + $0x68] sm:$0xff] }
 0x512   :  { %7373 = vmatprep.mubr.msk.f32.mxu0 %vm2783_vm2, %v3653_v46  ;;  %v9148_v43 = vpop.f32.mrb[214].mxu1 }
 0x513   :  { %v9150_v13 = vpop.f32.mrb[215].mxu1 }
 0x515   :  { %7374 = vmatmul.mubr.msk.f32.gmra.mrb[182].mxu0 %vm2783_vm2, %v7135_v45 }
 0x516   :  { %7376 = vmatprep.mubr.msk.f32.mxu0 %vm2783_vm2, %v3663_v54  ;;  %v9154_v14 = vpop.f32.mrb[216].mxu1 }
 0x517   :  { %v9156_v15 = vpop.f32.mrb[217].mxu1 }
 0x519   :  { %7377 = vmatmul.mubr.msk.f32.gmra.mrb[184].mxu0 %vm2783_vm2, %v7138_v51 }
 0x51a   :  { %7379 = vmatprep.mubr.msk.f32.mxu0 %vm2783_vm2, %v3673_v60  ;;  %v9160_v17 = vpop.f32.mrb[218].mxu1  ;;  %v5103_v60 = vld [vmem:[#allocation2 + $0x70] sm:$0xff] }
 0x51b   :  { %v9162_v38 = vpop.f32.mrb[219].mxu1 }
 0x51d   :  { %7380 = vmatmul.mubr.msk.f32.gmra.mrb[186].mxu0 %vm2783_vm2, %v7141_v56  ;;  %v5104_v56 = vld [vmem:[#allocation2 + $0x78] sm:$0xff] }
 0x51e   :  { %7382 = vmatprep.mubr.msk.f32.mxu0 %vm2783_vm2, %v3683_v1  ;;  %v9166_v19 = vpop.f32.mrb[220].mxu1 }
 0x51f   :  { %v9168_v21 = vpop.f32.mrb[221].mxu1 }
 0x521   :  { %7383 = vmatmul.mubr.msk.f32.gmra.mrb[188].mxu0 %vm2783_vm2, %v7144_v63 }
 0x522   :  { %7385 = vmatprep.mubr.msk.f32.mxu0 %vm2783_vm2, %v3693_v2  ;;  %v9172_v23 = vpop.f32.mrb[222].mxu1 }
 0x523   :  { %v9174_v24 = vpop.f32.mrb[223].mxu1 }
 0x525   :  { %7386 = vmatmul.mubr.msk.f32.gmra.mrb[190].mxu0 %vm2783_vm2, %v7147_v0 }
 0x526   :  { %7388 = vmatprep.mubr.msk.f32.mxu0 %vm2783_vm2, %v9053_v18 }
 0x529   :  { %7389 = vmatmul.mubr.msk.f32.gmra.mrb[192].mxu0 %vm2783_vm2, %v9050_v10 }
 0x52a   :  { %7391 = vmatprep.mubr.msk.f32.mxu0 %vm2783_vm2, %v9059_v37  ;;  %v5091_v37 = vld [vmem:[#allocation2 + $0x10] sm:$0xff] }
 0x52d   :  { %7392 = vmatmul.mubr.msk.f32.gmra.mrb[194].mxu0 %vm2783_vm2, %v9056_v29  ;;  %v5092_v29 = vld [vmem:[#allocation2 + $0x18] sm:$0xff] }
 0x52e   :  { %7394 = vmatprep.mubr.msk.f32.mxu0 %vm2783_vm2, %v9065_v48 }
 0x531   :  { %7395 = vmatmul.mubr.msk.f32.gmra.mrb[196].mxu0 %vm2783_vm2, %v9062_v41 }
 0x532   :  { %7397 = vmatprep.mubr.msk.f32.mxu0 %vm2783_vm2, %v9071_v8 }
 0x535   :  { %7398 = vmatmul.mubr.msk.f32.gmra.mrb[198].mxu0 %vm2783_vm2, %v9068_v61 }
 0x536   :  { %7400 = vmatprep.mubr.msk.f32.mxu0 %vm2783_vm2, %v9077_v26  ;;  %v5095_v26 = vld [vmem:[#allocation2 + $0x30] sm:$0xff] }
 0x539   :  { %7401 = vmatmul.mubr.msk.f32.gmra.mrb[200].mxu0 %vm2783_vm2, %v9074_v25  ;;  %v5096_v25 = vld [vmem:[#allocation2 + $0x38] sm:$0xff] }
 0x53a   :  { %7403 = vmatprep.mubr.msk.f32.mxu0 %vm2783_vm2, %v9083_v34 }
 0x53c   :  { %v7246_v10 = vpop.f32.mrb[96].mxu0 }
 0x53d   :  { %7404 = vmatmul.mubr.msk.f32.gmra.mrb[202].mxu0 %vm2783_vm2, %v9080_v33  ;;  %v5218_v18 = vadd.f32 %v7246_v10, %v5090_v31  ;;  %v4450_v20 = vpop.f32.mrb[97].mxu0 }
 0x53e   :  { %7406 = vmatprep.mubr.msk.f32.mxu0 %vm2783_vm2, %v9089_v7  ;;  %v5217_v27 = vadd.f32 %v5089_v6, %v4450_v20  ;;  %v5110_v6 = vld [vmem:[#allocation2 + $0xa8] sm:$0xff] }
 0x53f   :  { %5346 = vst [vmem:[#allocation5 + $0x8] sm:$0xff] %v5218_v18 }
 0x540   :  { %5345 = vst [vmem:[#allocation5] sm:$0xff] %v5217_v27  ;;  %v7249_v55 = vpop.f32.mrb[98].mxu0  ;;  %v5112_v27 = vld [vmem:[#allocation2 + $0xb8] sm:$0xff] }
 0x541   :  { %7407 = vmatmul.mubr.msk.f32.gmra.mrb[204].mxu0 %vm2783_vm2, %v9086_v62  ;;  %v5220_v39 = vadd.f32 %v7249_v55, %v5092_v29  ;;  %v4460_v41 = vpop.f32.mrb[99].mxu0  ;;  %v5111_v29 = vld [vmem:[#allocation2 + $0xb0] sm:$0xff] }
 0x542   :  { %7409 = vmatprep.mubr.msk.f32.mxu0 %vm2783_vm2, %v9095_v42  ;;  %v5219_v48 = vadd.f32 %v5091_v37, %v4460_v41  ;;  %v5099_v42 = vld [vmem:[#allocation2 + $0x50] sm:$0xff]  ;;  %v5114_v41 = vld [vmem:[#allocation2 + $0xc8] sm:$0xff] }
 0x543   :  { %5348 = vst [vmem:[#allocation5 + $0x18] sm:$0xff] %v5220_v39 }
 0x544   :  { %5347 = vst [vmem:[#allocation5 + $0x10] sm:$0xff] %v5219_v48  ;;  %v7252_v61 = vpop.f32.mrb[100].mxu0 }
 0x545   :  { %7410 = vmatmul.mubr.msk.f32.gmra.mrb[206].mxu0 %vm2783_vm2, %v9092_v40  ;;  %v5222_v8 = vadd.f32 %v7252_v61, %v5094_v50  ;;  %v4470_v47 = vpop.f32.mrb[101].mxu0  ;;  %v5100_v40 = vld [vmem:[#allocation2 + $0x58] sm:$0xff] }
 0x546   :  { %v5221_v57 = vadd.f32 %v5093_v59, %v4470_v47  ;;  %7412 = vmatprep.mubr.msk.f32.mxu0 %vm2783_vm2, %v9132_v35  ;;  %v5105_v35 = vld [vmem:[#allocation2 + $0x80] sm:$0xff] }
 0x547   :  { %5350 = vst [vmem:[#allocation5 + $0x28] sm:$0xff] %v5222_v8  ;;  %v5116_v8 = vld [vmem:[#allocation2 + $0xd8] sm:$0xff] }
 0x548   :  { %5349 = vst [vmem:[#allocation5 + $0x20] sm:$0xff] %v5221_v57  ;;  %v7255_v28 = vpop.f32.mrb[102].mxu0 }
 0x549   :  { %v5224_v30 = vadd.f32 %v7255_v28, %v5096_v25  ;;  %v4480_v33 = vpop.f32.mrb[103].mxu0  ;;  %7413 = vmatmul.mubr.msk.f32.gmra.mrb[208].mxu0 %vm2783_vm2, %v9130_v3  ;;  %v5106_v3 = vld [vmem:[#allocation2 + $0x88] sm:$0xff] }
 0x54a   :  { %v5223_v34 = vadd.f32 %v5095_v26, %v4480_v33  ;;  %7415 = vmatprep.mubr.msk.f32.mxu0 %vm2783_vm2, %v9138_v5  ;;  %v5118_v28 = vld [vmem:[#allocation2 + $0xe8] sm:$0xff] }
 0x54b   :  { %5352 = vst [vmem:[#allocation5 + $0x38] sm:$0xff] %v5224_v30  ;;  %v5117_v30 = vld [vmem:[#allocation2 + $0xe0] sm:$0xff] }
 0x54c   :  { %5351 = vst [vmem:[#allocation5 + $0x30] sm:$0xff] %v5223_v34  ;;  %v7258_v62 = vpop.f32.mrb[104].mxu0 }
 0x54d   :  { %v5226_v7 = vadd.f32 %v7258_v62, %v5098_v36  ;;  %v4490_v9 = vpop.f32.mrb[105].mxu0  ;;  %7416 = vmatmul.mubr.msk.f32.gmra.mrb[210].mxu0 %vm2783_vm2, %v9136_v4  ;;  %v5120_v62 = vld [vmem:[#allocation2 + $0xf8] sm:$0xff] }
 0x54e   :  { %v5225_v16 = vadd.f32 %v5097_v53, %v4490_v9  ;;  %7418 = vmatprep.mubr.msk.f32.mxu0 %vm2783_vm2, %v9144_v12 }
 0x54f   :  { %5354 = vst [vmem:[#allocation5 + $0x48] sm:$0xff] %v5226_v7  ;;  %v5119_v7 = vld [vmem:[#allocation2 + $0xf0] sm:$0xff] }
 0x550   :  { %5353 = vst [vmem:[#allocation5 + $0x40] sm:$0xff] %v5225_v16  ;;  %v7261_v44 = vpop.f32.mrb[106].mxu0 }
 0x551   :  { %v5228_v22 = vadd.f32 %v7261_v44, %v5100_v40  ;;  %v4500_v49 = vpop.f32.mrb[107].mxu0  ;;  %7419 = vmatmul.mubr.msk.f32.gmra.mrb[212].mxu0 %vm2783_vm2, %v9142_v11  ;;  %v5122_v44 = vld [vmem:[#allocation2 + $0x108] sm:$0xff] }
 0x552   :  { %v5227_v52 = vadd.f32 %v5099_v42, %v4500_v49  ;;  %7421 = vmatprep.mubr.msk.f32.mxu0 %vm2783_vm2, %v9150_v13  ;;  %v5107_v13 = vld [vmem:[#allocation2 + $0x90] sm:$0xff] }
 0x553   :  { %5356 = vst [vmem:[#allocation5 + $0x58] sm:$0xff] %v5228_v22  ;;  %v5121_v22 = vld [vmem:[#allocation2 + $0x100] sm:$0xff] }
 0x554   :  { %5355 = vst [vmem:[#allocation5 + $0x50] sm:$0xff] %v5227_v52  ;;  %v7264_v45 = vpop.f32.mrb[108].mxu0 }
 0x555   :  { %v5230_v46 = vadd.f32 %v7264_v45, %v5102_v32  ;;  %v4510_v51 = vpop.f32.mrb[109].mxu0  ;;  %7422 = vmatmul.mubr.msk.f32.gmra.mrb[214].mxu0 %vm2783_vm2, %v9148_v43  ;;  %v5108_v43 = vld [vmem:[#allocation2 + $0x98] sm:$0xff] }
 0x556   :  { %v5229_v54 = vadd.f32 %v5101_v58, %v4510_v51  ;;  %7424 = vmatprep.mubr.msk.f32.mxu0 %vm2783_vm2, %v9156_v15  ;;  %v5124_v45 = vld [vmem:[#allocation2 + $0x118] sm:$0xff] }
 0x557   :  { %5358 = vst [vmem:[#allocation5 + $0x68] sm:$0xff] %v5230_v46  ;;  %v5123_v46 = vld [vmem:[#allocation2 + $0x110] sm:$0xff] }
 0x558   :  { %5357 = vst [vmem:[#allocation5 + $0x60] sm:$0xff] %v5229_v54  ;;  %v7267_v63 = vpop.f32.mrb[110].mxu0 }
 0x559   :  { %v5232_v1 = vadd.f32 %v7267_v63, %v5104_v56  ;;  %v4520_v0 = vpop.f32.mrb[111].mxu0  ;;  %7425 = vmatmul.mubr.msk.f32.gmra.mrb[216].mxu0 %vm2783_vm2, %v9154_v14  ;;  %v5126_v63 = vld [vmem:[#allocation2 + $0x128] sm:$0xff] }
 0x55a   :  { %v5231_v2 = vadd.f32 %v5103_v60, %v4520_v0  ;;  %7427 = vmatprep.mubr.msk.f32.mxu0 %vm2783_vm2, %v9162_v38 }
 0x55b   :  { %5360 = vst [vmem:[#allocation5 + $0x78] sm:$0xff] %v5232_v1  ;;  %v5125_v1 = vld [vmem:[#allocation2 + $0x120] sm:$0xff] }
 0x55c   :  { %5359 = vst [vmem:[#allocation5 + $0x70] sm:$0xff] %v5231_v2  ;;  %v7270_v4 = vpop.f32.mrb[112].mxu0 }
 0x55d   :  { %v5234_v5 = vadd.f32 %v7270_v4, %v5106_v3  ;;  %v4530_v11 = vpop.f32.mrb[113].mxu0  ;;  %7428 = vmatmul.mubr.msk.f32.gmra.mrb[218].mxu0 %vm2783_vm2, %v9160_v17  ;;  %v5109_v17 = vld [vmem:[#allocation2 + $0xa0] sm:$0xff]  ;;  %v5128_v4 = vld [vmem:[#allocation2 + $0x138] sm:$0xff] }
 0x55e   :  { %v5233_v12 = vadd.f32 %v5105_v35, %v4530_v11  ;;  %7430 = vmatprep.mubr.msk.f32.mxu0 %vm2783_vm2, %v9168_v21 }
 0x55f   :  { %5362 = vst [vmem:[#allocation5 + $0x88] sm:$0xff] %v5234_v5  ;;  %v5127_v5 = vld [vmem:[#allocation2 + $0x130] sm:$0xff] }
 0x560   :  { %5361 = vst [vmem:[#allocation5 + $0x80] sm:$0xff] %v5233_v12  ;;  %v7273_v14 = vpop.f32.mrb[114].mxu0 }
 0x561   :  { %v5236_v15 = vadd.f32 %v7273_v14, %v5108_v43  ;;  %v4540_v38 = vpop.f32.mrb[115].mxu0  ;;  %7431 = vmatmul.mubr.msk.f32.gmra.mrb[220].mxu0 %vm2783_vm2, %v9166_v19  ;;  %v5130_v14 = vld [vmem:[#allocation2 + $0x148] sm:$0xff] }
 0x562   :  { %v5235_v31 = vadd.f32 %v5107_v13, %v4540_v38  ;;  %7433 = vmatprep.mubr.msk.f32.mxu0 %vm2783_vm2, %v9174_v24  ;;  %v5113_v24 = vld [vmem:[#allocation2 + $0xc0] sm:$0xff] }
 0x563   :  { %5364 = vst [vmem:[#allocation5 + $0x98] sm:$0xff] %v5236_v15  ;;  %v5129_v15 = vld [vmem:[#allocation2 + $0x140] sm:$0xff] }
 0x564   :  { %5363 = vst [vmem:[#allocation5 + $0x90] sm:$0xff] %v5235_v31  ;;  %v7276_v10 = vpop.f32.mrb[116].mxu0 }
 0x565   :  { %v5238_v18 = vadd.f32 %v7276_v10, %v5110_v6  ;;  %v4550_v21 = vpop.f32.mrb[117].mxu0  ;;  %7434 = vmatmul.mubr.msk.f32.gmra.mrb[222].mxu0 %vm2783_vm2, %v9172_v23  ;;  %v5115_v23 = vld [vmem:[#allocation2 + $0xd0] sm:$0xff]  ;;  %v5132_v10 = vld [vmem:[#allocation2 + $0x158] sm:$0xff] }
 0x566   :  { %v5237_v20 = vadd.f32 %v5109_v17, %v4550_v21 }
 0x567   :  { %5366 = vst [vmem:[#allocation5 + $0xa8] sm:$0xff] %v5238_v18  ;;  %v5131_v18 = vld [vmem:[#allocation2 + $0x150] sm:$0xff] }
 0x568   :  { %5365 = vst [vmem:[#allocation5 + $0xa0] sm:$0xff] %v5237_v20  ;;  %v7279_v19 = vpop.f32.mrb[118].mxu0 }
 0x569   :  { %v5240_v37 = vadd.f32 %v7279_v19, %v5112_v27  ;;  %v4560_v55 = vpop.f32.mrb[119].mxu0  ;;  %v5134_v19 = vld [vmem:[#allocation2 + $0x168] sm:$0xff] }
 0x56a   :  { %v5239_v39 = vadd.f32 %v5111_v29, %v4560_v55 }
 0x56b   :  { %5368 = vst [vmem:[#allocation5 + $0xb8] sm:$0xff] %v5240_v37  ;;  %v5133_v37 = vld [vmem:[#allocation2 + $0x160] sm:$0xff] }
 0x56c   :  { %5367 = vst [vmem:[#allocation5 + $0xb0] sm:$0xff] %v5239_v39  ;;  %v7282_v48 = vpop.f32.mrb[120].mxu0 }
 0x56d   :  { %v5242_v50 = vadd.f32 %v7282_v48, %v5114_v41  ;;  %v4570_v59 = vpop.f32.mrb[121].mxu0  ;;  %v5136_v48 = vld [vmem:[#allocation2 + $0x178] sm:$0xff] }
 0x56e   :  { %v5241_v61 = vadd.f32 %v5113_v24, %v4570_v59 }
 0x56f   :  { %5370 = vst [vmem:[#allocation5 + $0xc8] sm:$0xff] %v5242_v50  ;;  %v5135_v50 = vld [vmem:[#allocation2 + $0x170] sm:$0xff] }
 0x570   :  { %5369 = vst [vmem:[#allocation5 + $0xc0] sm:$0xff] %v5241_v61  ;;  %v7285_v47 = vpop.f32.mrb[122].mxu0 }
 0x571   :  { %v5244_v57 = vadd.f32 %v7285_v47, %v5116_v8  ;;  %v4580_v25 = vpop.f32.mrb[123].mxu0  ;;  %v5138_v47 = vld [vmem:[#allocation2 + $0x188] sm:$0xff] }
 0x572   :  { %v5243_v26 = vadd.f32 %v5115_v23, %v4580_v25 }
 0x573   :  { %5372 = vst [vmem:[#allocation5 + $0xd8] sm:$0xff] %v5244_v57  ;;  %v5137_v57 = vld [vmem:[#allocation2 + $0x180] sm:$0xff] }
 0x574   :  { %5371 = vst [vmem:[#allocation5 + $0xd0] sm:$0xff] %v5243_v26  ;;  %v7288_v33 = vpop.f32.mrb[124].mxu0 }
 0x575   :  { %v5246_v34 = vadd.f32 %v7288_v33, %v5118_v28  ;;  %v4590_v36 = vpop.f32.mrb[125].mxu0  ;;  %v5140_v33 = vld [vmem:[#allocation2 + $0x198] sm:$0xff] }
 0x576   :  { %v5245_v53 = vadd.f32 %v5117_v30, %v4590_v36 }
 0x577   :  { %5374 = vst [vmem:[#allocation5 + $0xe8] sm:$0xff] %v5246_v34  ;;  %v5139_v34 = vld [vmem:[#allocation2 + $0x190] sm:$0xff] }
 0x578   :  { %5373 = vst [vmem:[#allocation5 + $0xe0] sm:$0xff] %v5245_v53  ;;  %v7291_v9 = vpop.f32.mrb[126].mxu0 }
 0x579   :  { %v5248_v16 = vadd.f32 %v7291_v9, %v5120_v62  ;;  %v4600_v40 = vpop.f32.mrb[127].mxu0  ;;  %v5142_v9 = vld [vmem:[#allocation2 + $0x1a8] sm:$0xff] }
 0x57a   :  { %v5247_v42 = vadd.f32 %v5119_v7, %v4600_v40 }
 0x57b   :  { %5376 = vst [vmem:[#allocation5 + $0xf8] sm:$0xff] %v5248_v16  ;;  %v5141_v16 = vld [vmem:[#allocation2 + $0x1a0] sm:$0xff] }
 0x57c   :  { %5375 = vst [vmem:[#allocation5 + $0xf0] sm:$0xff] %v5247_v42  ;;  %v7294_v49 = vpop.f32.mrb[128].mxu0 }
 0x57d   :  { %v5250_v52 = vadd.f32 %v7294_v49, %v5122_v44  ;;  %v4610_v32 = vpop.f32.mrb[129].mxu0  ;;  %v5144_v49 = vld [vmem:[#allocation2 + $0x1b8] sm:$0xff] }
 0x57e   :  { %v5249_v58 = vadd.f32 %v5121_v22, %v4610_v32 }
 0x57f   :  { %5378 = vst [vmem:[#allocation5 + $0x108] sm:$0xff] %v5250_v52  ;;  %v5143_v52 = vld [vmem:[#allocation2 + $0x1b0] sm:$0xff] }
 0x580   :  { %5377 = vst [vmem:[#allocation5 + $0x100] sm:$0xff] %v5249_v58  ;;  %v7297_v51 = vpop.f32.mrb[130].mxu0 }
 0x581   :  { %v5252_v54 = vadd.f32 %v7297_v51, %v5124_v45  ;;  %v4620_v56 = vpop.f32.mrb[131].mxu0  ;;  %v5146_v51 = vld [vmem:[#allocation2 + $0x1c8] sm:$0xff] }
 0x582   :  { %v5251_v60 = vadd.f32 %v5123_v46, %v4620_v56 }
 0x583   :  { %5380 = vst [vmem:[#allocation5 + $0x118] sm:$0xff] %v5252_v54  ;;  %v5145_v54 = vld [vmem:[#allocation2 + $0x1c0] sm:$0xff] }
 0x584   :  { %5379 = vst [vmem:[#allocation5 + $0x110] sm:$0xff] %v5251_v60  ;;  %v7300_v0 = vpop.f32.mrb[132].mxu0 }
 0x585   :  { %v5254_v2 = vadd.f32 %v7300_v0, %v5126_v63  ;;  %v4630_v3 = vpop.f32.mrb[133].mxu0  ;;  %v5148_v0 = vld [vmem:[#allocation2 + $0x1d8] sm:$0xff] }
 0x586   :  { %v5253_v35 = vadd.f32 %v5125_v1, %v4630_v3 }
 0x587   :  { %5382 = vst [vmem:[#allocation5 + $0x128] sm:$0xff] %v5254_v2  ;;  %v5147_v2 = vld [vmem:[#allocation2 + $0x1d0] sm:$0xff] }
 0x588   :  { %5381 = vst [vmem:[#allocation5 + $0x120] sm:$0xff] %v5253_v35  ;;  %v7303_v11 = vpop.f32.mrb[134].mxu0 }
 0x589   :  { %v5256_v12 = vadd.f32 %v7303_v11, %v5128_v4  ;;  %v4640_v43 = vpop.f32.mrb[135].mxu0  ;;  %v5150_v11 = vld [vmem:[#allocation2 + $0x1e8] sm:$0xff] }
 0x58a   :  { %v5255_v13 = vadd.f32 %v5127_v5, %v4640_v43 }
 0x58b   :  { %5384 = vst [vmem:[#allocation5 + $0x138] sm:$0xff] %v5256_v12  ;;  %v5149_v12 = vld [vmem:[#allocation2 + $0x1e0] sm:$0xff] }
 0x58c   :  { %5383 = vst [vmem:[#allocation5 + $0x130] sm:$0xff] %v5255_v13  ;;  %v7306_v38 = vpop.f32.mrb[136].mxu0 }
 0x58d   :  { %v5258_v31 = vadd.f32 %v7306_v38, %v5130_v14  ;;  %v4650_v6 = vpop.f32.mrb[137].mxu0  ;;  %v5152_v38 = vld [vmem:[#allocation2 + $0x1f8] sm:$0xff] }
 0x58e   :  { %v5257_v17 = vadd.f32 %v5129_v15, %v4650_v6 }
 0x58f   :  { %5386 = vst [vmem:[#allocation5 + $0x148] sm:$0xff] %v5258_v31  ;;  %v5151_v31 = vld [vmem:[#allocation2 + $0x1f0] sm:$0xff] }
 0x590   :  { %5385 = vst [vmem:[#allocation5 + $0x140] sm:$0xff] %v5257_v17  ;;  %v7309_v21 = vpop.f32.mrb[138].mxu0 }
 0x591   :  { %v5260_v20 = vadd.f32 %v7309_v21, %v5132_v10  ;;  %v4660_v27 = vpop.f32.mrb[139].mxu0  ;;  %v5154_v21 = vld [vmem:[#allocation2 + $0x208] sm:$0xff] }
 0x592   :  { %v5259_v29 = vadd.f32 %v5131_v18, %v4660_v27 }
 0x593   :  { %5388 = vst [vmem:[#allocation5 + $0x158] sm:$0xff] %v5260_v20  ;;  %v5153_v20 = vld [vmem:[#allocation2 + $0x200] sm:$0xff] }
 0x594   :  { %5387 = vst [vmem:[#allocation5 + $0x150] sm:$0xff] %v5259_v29  ;;  %v7312_v55 = vpop.f32.mrb[140].mxu0 }
 0x595   :  { %v5262_v39 = vadd.f32 %v7312_v55, %v5134_v19  ;;  %v4670_v41 = vpop.f32.mrb[141].mxu0  ;;  %v5156_v55 = vld [vmem:[#allocation2 + $0x218] sm:$0xff] }
 0x596   :  { %v5261_v24 = vadd.f32 %v5133_v37, %v4670_v41 }
 0x597   :  { %5390 = vst [vmem:[#allocation5 + $0x168] sm:$0xff] %v5262_v39  ;;  %v5155_v39 = vld [vmem:[#allocation2 + $0x210] sm:$0xff] }
 0x598   :  { %5389 = vst [vmem:[#allocation5 + $0x160] sm:$0xff] %v5261_v24  ;;  %v7315_v59 = vpop.f32.mrb[142].mxu0 }
 0x599   :  { %v5264_v61 = vadd.f32 %v7315_v59, %v5136_v48  ;;  %v4680_v8 = vpop.f32.mrb[143].mxu0  ;;  %v5158_v59 = vld [vmem:[#allocation2 + $0x228] sm:$0xff] }
 0x59a   :  { %v5263_v23 = vadd.f32 %v5135_v50, %v4680_v8 }
 0x59b   :  { %5392 = vst [vmem:[#allocation5 + $0x178] sm:$0xff] %v5264_v61  ;;  %v5157_v61 = vld [vmem:[#allocation2 + $0x220] sm:$0xff] }
 0x59c   :  { %5391 = vst [vmem:[#allocation5 + $0x170] sm:$0xff] %v5263_v23  ;;  %v7318_v25 = vpop.f32.mrb[144].mxu0 }
 0x59d   :  { %v5266_v26 = vadd.f32 %v7318_v25, %v5138_v47  ;;  %v4690_v28 = vpop.f32.mrb[145].mxu0  ;;  %v5160_v25 = vld [vmem:[#allocation2 + $0x238] sm:$0xff] }
 0x59e   :  { %v5265_v30 = vadd.f32 %v5137_v57, %v4690_v28 }
 0x59f   :  { %5394 = vst [vmem:[#allocation5 + $0x188] sm:$0xff] %v5266_v26  ;;  %v5159_v26 = vld [vmem:[#allocation2 + $0x230] sm:$0xff] }
 0x5a0   :  { %5393 = vst [vmem:[#allocation5 + $0x180] sm:$0xff] %v5265_v30  ;;  %v7321_v36 = vpop.f32.mrb[146].mxu0 }
 0x5a1   :  { %v5268_v53 = vadd.f32 %v7321_v36, %v5140_v33  ;;  %v4700_v62 = vpop.f32.mrb[147].mxu0  ;;  %v5162_v36 = vld [vmem:[#allocation2 + $0x248] sm:$0xff] }
 0x5a2   :  { %v5267_v7 = vadd.f32 %v5139_v34, %v4700_v62 }
 0x5a3   :  { %5396 = vst [vmem:[#allocation5 + $0x198] sm:$0xff] %v5268_v53  ;;  %v5161_v53 = vld [vmem:[#allocation2 + $0x240] sm:$0xff] }
 0x5a4   :  { %5395 = vst [vmem:[#allocation5 + $0x190] sm:$0xff] %v5267_v7  ;;  %v7324_v40 = vpop.f32.mrb[148].mxu0 }
 0x5a5   :  { %v5270_v42 = vadd.f32 %v7324_v40, %v5142_v9  ;;  %v4710_v44 = vpop.f32.mrb[149].mxu0  ;;  %v5164_v40 = vld [vmem:[#allocation2 + $0x258] sm:$0xff] }
 0x5a6   :  { %v5269_v22 = vadd.f32 %v5141_v16, %v4710_v44 }
 0x5a7   :  { %5398 = vst [vmem:[#allocation5 + $0x1a8] sm:$0xff] %v5270_v42  ;;  %v5163_v42 = vld [vmem:[#allocation2 + $0x250] sm:$0xff] }
 0x5a8   :  { %5397 = vst [vmem:[#allocation5 + $0x1a0] sm:$0xff] %v5269_v22  ;;  %v7327_v32 = vpop.f32.mrb[150].mxu0 }
 0x5a9   :  { %v5272_v58 = vadd.f32 %v7327_v32, %v5144_v49  ;;  %v4720_v45 = vpop.f32.mrb[151].mxu0  ;;  %v5166_v32 = vld [vmem:[#allocation2 + $0x268] sm:$0xff] }
 0x5aa   :  { %v5271_v46 = vadd.f32 %v5143_v52, %v4720_v45 }
 0x5ab   :  { %5400 = vst [vmem:[#allocation5 + $0x1b8] sm:$0xff] %v5272_v58  ;;  %v5165_v58 = vld [vmem:[#allocation2 + $0x260] sm:$0xff] }
 0x5ac   :  { %5399 = vst [vmem:[#allocation5 + $0x1b0] sm:$0xff] %v5271_v46  ;;  %v7330_v56 = vpop.f32.mrb[152].mxu0 }
 0x5ad   :  { %v5274_v60 = vadd.f32 %v7330_v56, %v5146_v51  ;;  %v4730_v63 = vpop.f32.mrb[153].mxu0  ;;  %v5168_v56 = vld [vmem:[#allocation2 + $0x278] sm:$0xff] }
 0x5ae   :  { %v5273_v1 = vadd.f32 %v5145_v54, %v4730_v63 }
 0x5af   :  { %5402 = vst [vmem:[#allocation5 + $0x1c8] sm:$0xff] %v5274_v60  ;;  %v5167_v60 = vld [vmem:[#allocation2 + $0x270] sm:$0xff] }
 0x5b0   :  { %5401 = vst [vmem:[#allocation5 + $0x1c0] sm:$0xff] %v5273_v1  ;;  %v7333_v3 = vpop.f32.mrb[154].mxu0 }
 0x5b1   :  { %v5276_v35 = vadd.f32 %v7333_v3, %v5148_v0  ;;  %v4740_v4 = vpop.f32.mrb[155].mxu0  ;;  %v5170_v3 = vld [vmem:[#allocation2 + $0x288] sm:$0xff] }
 0x5b2   :  { %v5275_v5 = vadd.f32 %v5147_v2, %v4740_v4 }
 0x5b3   :  { %5404 = vst [vmem:[#allocation5 + $0x1d8] sm:$0xff] %v5276_v35  ;;  %v5169_v35 = vld [vmem:[#allocation2 + $0x280] sm:$0xff] }
 0x5b4   :  { %5403 = vst [vmem:[#allocation5 + $0x1d0] sm:$0xff] %v5275_v5  ;;  %v7336_v43 = vpop.f32.mrb[156].mxu0 }
 0x5b5   :  { %v5278_v13 = vadd.f32 %v7336_v43, %v5150_v11  ;;  %v4750_v14 = vpop.f32.mrb[157].mxu0  ;;  %v5172_v43 = vld [vmem:[#allocation2 + $0x298] sm:$0xff] }
 0x5b6   :  { %v5277_v15 = vadd.f32 %v5149_v12, %v4750_v14 }
 0x5b7   :  { %5406 = vst [vmem:[#allocation5 + $0x1e8] sm:$0xff] %v5278_v13  ;;  %v5171_v13 = vld [vmem:[#allocation2 + $0x290] sm:$0xff] }
 0x5b8   :  { %5405 = vst [vmem:[#allocation5 + $0x1e0] sm:$0xff] %v5277_v15  ;;  %v7339_v6 = vpop.f32.mrb[158].mxu0 }
 0x5b9   :  { %v5280_v17 = vadd.f32 %v7339_v6, %v5152_v38  ;;  %v4760_v10 = vpop.f32.mrb[159].mxu0  ;;  %v5174_v6 = vld [vmem:[#allocation2 + $0x2a8] sm:$0xff] }
 0x5ba   :  { %v5279_v18 = vadd.f32 %v5151_v31, %v4760_v10 }
 0x5bb   :  { %5408 = vst [vmem:[#allocation5 + $0x1f8] sm:$0xff] %v5280_v17  ;;  %v5173_v17 = vld [vmem:[#allocation2 + $0x2a0] sm:$0xff] }
 0x5bc   :  { %5407 = vst [vmem:[#allocation5 + $0x1f0] sm:$0xff] %v5279_v18  ;;  %v7342_v27 = vpop.f32.mrb[160].mxu0 }
 0x5bd   :  { %v5282_v29 = vadd.f32 %v7342_v27, %v5154_v21  ;;  %v4770_v19 = vpop.f32.mrb[161].mxu0  ;;  %v5176_v27 = vld [vmem:[#allocation2 + $0x2b8] sm:$0xff] }
 0x5be   :  { %v5281_v37 = vadd.f32 %v5153_v20, %v4770_v19 }
 0x5bf   :  { %5410 = vst [vmem:[#allocation5 + $0x208] sm:$0xff] %v5282_v29  ;;  %v5175_v29 = vld [vmem:[#allocation2 + $0x2b0] sm:$0xff] }
 0x5c0   :  { %5409 = vst [vmem:[#allocation5 + $0x200] sm:$0xff] %v5281_v37  ;;  %v7345_v41 = vpop.f32.mrb[162].mxu0 }
 0x5c1   :  { %v5284_v24 = vadd.f32 %v7345_v41, %v5156_v55  ;;  %v4780_v48 = vpop.f32.mrb[163].mxu0  ;;  %v5178_v41 = vld [vmem:[#allocation2 + $0x2c8] sm:$0xff] }
 0x5c2   :  { %v5283_v50 = vadd.f32 %v5155_v39, %v4780_v48 }
 0x5c3   :  { %5412 = vst [vmem:[#allocation5 + $0x218] sm:$0xff] %v5284_v24  ;;  %v5177_v24 = vld [vmem:[#allocation2 + $0x2c0] sm:$0xff] }
 0x5c4   :  { %5411 = vst [vmem:[#allocation5 + $0x210] sm:$0xff] %v5283_v50  ;;  %v7348_v8 = vpop.f32.mrb[164].mxu0 }
 0x5c5   :  { %v5286_v23 = vadd.f32 %v7348_v8, %v5158_v59  ;;  %v4790_v47 = vpop.f32.mrb[165].mxu0  ;;  %v5180_v8 = vld [vmem:[#allocation2 + $0x2d8] sm:$0xff] }
 0x5c6   :  { %v5285_v57 = vadd.f32 %v5157_v61, %v4790_v47 }
 0x5c7   :  { %5414 = vst [vmem:[#allocation5 + $0x228] sm:$0xff] %v5286_v23  ;;  %v5179_v23 = vld [vmem:[#allocation2 + $0x2d0] sm:$0xff] }
 0x5c8   :  { %5413 = vst [vmem:[#allocation5 + $0x220] sm:$0xff] %v5285_v57  ;;  %v7351_v28 = vpop.f32.mrb[166].mxu0 }
 0x5c9   :  { %v5288_v30 = vadd.f32 %v7351_v28, %v5160_v25  ;;  %v4800_v33 = vpop.f32.mrb[167].mxu0  ;;  %v5182_v28 = vld [vmem:[#allocation2 + $0x2e8] sm:$0xff] }
 0x5ca   :  { %v5287_v34 = vadd.f32 %v5159_v26, %v4800_v33 }
 0x5cb   :  { %5416 = vst [vmem:[#allocation5 + $0x238] sm:$0xff] %v5288_v30  ;;  %v5181_v30 = vld [vmem:[#allocation2 + $0x2e0] sm:$0xff] }
 0x5cc   :  { %5415 = vst [vmem:[#allocation5 + $0x230] sm:$0xff] %v5287_v34  ;;  %v7354_v62 = vpop.f32.mrb[168].mxu0 }
 0x5cd   :  { %v5290_v7 = vadd.f32 %v7354_v62, %v5162_v36  ;;  %v4810_v9 = vpop.f32.mrb[169].mxu0  ;;  %v5184_v62 = vld [vmem:[#allocation2 + $0x2f8] sm:$0xff] }
 0x5ce   :  { %v5289_v16 = vadd.f32 %v5161_v53, %v4810_v9 }
 0x5cf   :  { %5418 = vst [vmem:[#allocation5 + $0x248] sm:$0xff] %v5290_v7  ;;  %v5183_v7 = vld [vmem:[#allocation2 + $0x2f0] sm:$0xff] }
 0x5d0   :  { %5417 = vst [vmem:[#allocation5 + $0x240] sm:$0xff] %v5289_v16  ;;  %v7357_v44 = vpop.f32.mrb[170].mxu0 }
 0x5d1   :  { %v5292_v22 = vadd.f32 %v7357_v44, %v5164_v40  ;;  %v4820_v49 = vpop.f32.mrb[171].mxu0  ;;  %v5186_v44 = vld [vmem:[#allocation2 + $0x308] sm:$0xff] }
 0x5d2   :  { %v5291_v52 = vadd.f32 %v5163_v42, %v4820_v49 }
 0x5d3   :  { %5420 = vst [vmem:[#allocation5 + $0x258] sm:$0xff] %v5292_v22  ;;  %v5185_v22 = vld [vmem:[#allocation2 + $0x300] sm:$0xff] }
 0x5d4   :  { %5419 = vst [vmem:[#allocation5 + $0x250] sm:$0xff] %v5291_v52  ;;  %v7360_v45 = vpop.f32.mrb[172].mxu0 }
 0x5d5   :  { %v5294_v46 = vadd.f32 %v7360_v45, %v5166_v32  ;;  %v4830_v51 = vpop.f32.mrb[173].mxu0  ;;  %v5188_v45 = vld [vmem:[#allocation2 + $0x318] sm:$0xff] }
 0x5d6   :  { %v5293_v54 = vadd.f32 %v5165_v58, %v4830_v51 }
 0x5d7   :  { %5422 = vst [vmem:[#allocation5 + $0x268] sm:$0xff] %v5294_v46  ;;  %v5187_v46 = vld [vmem:[#allocation2 + $0x310] sm:$0xff] }
 0x5d8   :  { %5421 = vst [vmem:[#allocation5 + $0x260] sm:$0xff] %v5293_v54  ;;  %v7363_v63 = vpop.f32.mrb[174].mxu0 }
 0x5d9   :  { %v5296_v1 = vadd.f32 %v7363_v63, %v5168_v56  ;;  %v4840_v0 = vpop.f32.mrb[175].mxu0  ;;  %v5190_v63 = vld [vmem:[#allocation2 + $0x328] sm:$0xff] }
 0x5da   :  { %v5295_v2 = vadd.f32 %v5167_v60, %v4840_v0 }
 0x5db   :  { %5424 = vst [vmem:[#allocation5 + $0x278] sm:$0xff] %v5296_v1  ;;  %v5189_v1 = vld [vmem:[#allocation2 + $0x320] sm:$0xff] }
 0x5dc   :  { %5423 = vst [vmem:[#allocation5 + $0x270] sm:$0xff] %v5295_v2  ;;  %v7366_v4 = vpop.f32.mrb[176].mxu0 }
 0x5dd   :  { %v5298_v5 = vadd.f32 %v7366_v4, %v5170_v3  ;;  %v4850_v11 = vpop.f32.mrb[177].mxu0  ;;  %v5192_v4 = vld [vmem:[#allocation2 + $0x338] sm:$0xff] }
 0x5de   :  { %v5297_v12 = vadd.f32 %v5169_v35, %v4850_v11 }
 0x5df   :  { %5426 = vst [vmem:[#allocation5 + $0x288] sm:$0xff] %v5298_v5  ;;  %v5191_v5 = vld [vmem:[#allocation2 + $0x330] sm:$0xff] }
 0x5e0   :  { %5425 = vst [vmem:[#allocation5 + $0x280] sm:$0xff] %v5297_v12  ;;  %v7369_v14 = vpop.f32.mrb[178].mxu0 }
 0x5e1   :  { %v5300_v15 = vadd.f32 %v7369_v14, %v5172_v43  ;;  %v4860_v38 = vpop.f32.mrb[179].mxu0  ;;  %v5194_v14 = vld [vmem:[#allocation2 + $0x348] sm:$0xff] }
 0x5e2   :  { %v5299_v31 = vadd.f32 %v5171_v13, %v4860_v38 }
 0x5e3   :  { %5428 = vst [vmem:[#allocation5 + $0x298] sm:$0xff] %v5300_v15  ;;  %v5193_v15 = vld [vmem:[#allocation2 + $0x340] sm:$0xff] }
 0x5e4   :  { %5427 = vst [vmem:[#allocation5 + $0x290] sm:$0xff] %v5299_v31  ;;  %v7372_v10 = vpop.f32.mrb[180].mxu0 }
 0x5e5   :  { %v5302_v18 = vadd.f32 %v7372_v10, %v5174_v6  ;;  %v4870_v21 = vpop.f32.mrb[181].mxu0  ;;  %v5196_v10 = vld [vmem:[#allocation2 + $0x358] sm:$0xff] }
 0x5e6   :  { %v5301_v20 = vadd.f32 %v5173_v17, %v4870_v21 }
 0x5e7   :  { %5430 = vst [vmem:[#allocation5 + $0x2a8] sm:$0xff] %v5302_v18  ;;  %v5195_v18 = vld [vmem:[#allocation2 + $0x350] sm:$0xff] }
 0x5e8   :  { %5429 = vst [vmem:[#allocation5 + $0x2a0] sm:$0xff] %v5301_v20  ;;  %v7375_v19 = vpop.f32.mrb[182].mxu0 }
 0x5e9   :  { %v5304_v37 = vadd.f32 %v7375_v19, %v5176_v27  ;;  %v4880_v55 = vpop.f32.mrb[183].mxu0  ;;  %v5198_v19 = vld [vmem:[#allocation2 + $0x368] sm:$0xff] }
 0x5ea   :  { %v5303_v39 = vadd.f32 %v5175_v29, %v4880_v55 }
 0x5eb   :  { %5432 = vst [vmem:[#allocation5 + $0x2b8] sm:$0xff] %v5304_v37  ;;  %v5197_v37 = vld [vmem:[#allocation2 + $0x360] sm:$0xff] }
 0x5ec   :  { %5431 = vst [vmem:[#allocation5 + $0x2b0] sm:$0xff] %v5303_v39  ;;  %v7378_v48 = vpop.f32.mrb[184].mxu0 }
 0x5ed   :  { %v5306_v50 = vadd.f32 %v7378_v48, %v5178_v41  ;;  %v4890_v59 = vpop.f32.mrb[185].mxu0  ;;  %v5200_v48 = vld [vmem:[#allocation2 + $0x378] sm:$0xff] }
 0x5ee   :  { %v5305_v61 = vadd.f32 %v5177_v24, %v4890_v59 }
 0x5ef   :  { %5434 = vst [vmem:[#allocation5 + $0x2c8] sm:$0xff] %v5306_v50  ;;  %v5199_v50 = vld [vmem:[#allocation2 + $0x370] sm:$0xff] }
 0x5f0   :  { %5433 = vst [vmem:[#allocation5 + $0x2c0] sm:$0xff] %v5305_v61  ;;  %v7381_v47 = vpop.f32.mrb[186].mxu0 }
 0x5f1   :  { %v5308_v57 = vadd.f32 %v7381_v47, %v5180_v8  ;;  %v4900_v25 = vpop.f32.mrb[187].mxu0  ;;  %v5202_v47 = vld [vmem:[#allocation2 + $0x388] sm:$0xff] }
 0x5f2   :  { %v5307_v26 = vadd.f32 %v5179_v23, %v4900_v25 }
 0x5f3   :  { %5436 = vst [vmem:[#allocation5 + $0x2d8] sm:$0xff] %v5308_v57  ;;  %v5201_v57 = vld [vmem:[#allocation2 + $0x380] sm:$0xff] }
 0x5f4   :  { %5435 = vst [vmem:[#allocation5 + $0x2d0] sm:$0xff] %v5307_v26  ;;  %v7384_v33 = vpop.f32.mrb[188].mxu0 }
 0x5f5   :  { %v5310_v34 = vadd.f32 %v7384_v33, %v5182_v28  ;;  %v4910_v36 = vpop.f32.mrb[189].mxu0  ;;  %v5204_v33 = vld [vmem:[#allocation2 + $0x398] sm:$0xff] }
 0x5f6   :  { %v5309_v53 = vadd.f32 %v5181_v30, %v4910_v36 }
 0x5f7   :  { %5438 = vst [vmem:[#allocation5 + $0x2e8] sm:$0xff] %v5310_v34  ;;  %v5203_v34 = vld [vmem:[#allocation2 + $0x390] sm:$0xff] }
 0x5f8   :  { %5437 = vst [vmem:[#allocation5 + $0x2e0] sm:$0xff] %v5309_v53  ;;  %v7387_v9 = vpop.f32.mrb[190].mxu0 }
 0x5f9   :  { %v5312_v16 = vadd.f32 %v7387_v9, %v5184_v62  ;;  %v4920_v40 = vpop.f32.mrb[191].mxu0  ;;  %v5206_v9 = vld [vmem:[#allocation2 + $0x3a8] sm:$0xff] }
 0x5fa   :  { %v5311_v42 = vadd.f32 %v5183_v7, %v4920_v40 }
 0x5fb   :  { %5440 = vst [vmem:[#allocation5 + $0x2f8] sm:$0xff] %v5312_v16  ;;  %v5205_v16 = vld [vmem:[#allocation2 + $0x3a0] sm:$0xff] }
 0x5fc   :  { %5439 = vst [vmem:[#allocation5 + $0x2f0] sm:$0xff] %v5311_v42  ;;  %v7390_v49 = vpop.f32.mrb[192].mxu0 }
 0x5fd   :  { %v5314_v52 = vadd.f32 %v7390_v49, %v5186_v44  ;;  %v4930_v32 = vpop.f32.mrb[193].mxu0  ;;  %v5208_v49 = vld [vmem:[#allocation2 + $0x3b8] sm:$0xff] }
 0x5fe   :  { %v5313_v58 = vadd.f32 %v5185_v22, %v4930_v32 }
 0x5ff   :  { %5442 = vst [vmem:[#allocation5 + $0x308] sm:$0xff] %v5314_v52  ;;  %v5207_v52 = vld [vmem:[#allocation2 + $0x3b0] sm:$0xff] }
 0x600   :  { %5441 = vst [vmem:[#allocation5 + $0x300] sm:$0xff] %v5313_v58  ;;  %v7393_v51 = vpop.f32.mrb[194].mxu0 }
 0x601   :  { %v5316_v54 = vadd.f32 %v7393_v51, %v5188_v45  ;;  %v4940_v56 = vpop.f32.mrb[195].mxu0  ;;  %v5210_v51 = vld [vmem:[#allocation2 + $0x3c8] sm:$0xff] }
 0x602   :  { %v5315_v60 = vadd.f32 %v5187_v46, %v4940_v56 }
 0x603   :  { %5444 = vst [vmem:[#allocation5 + $0x318] sm:$0xff] %v5316_v54  ;;  %v5209_v54 = vld [vmem:[#allocation2 + $0x3c0] sm:$0xff] }
 0x604   :  { %5443 = vst [vmem:[#allocation5 + $0x310] sm:$0xff] %v5315_v60  ;;  %v7396_v0 = vpop.f32.mrb[196].mxu0 }
 0x605   :  { %v5318_v2 = vadd.f32 %v7396_v0, %v5190_v63  ;;  %v4950_v3 = vpop.f32.mrb[197].mxu0  ;;  %v5212_v0 = vld [vmem:[#allocation2 + $0x3d8] sm:$0xff] }
 0x606   :  { %v5317_v35 = vadd.f32 %v5189_v1, %v4950_v3 }
 0x607   :  { %5446 = vst [vmem:[#allocation5 + $0x328] sm:$0xff] %v5318_v2  ;;  %v5211_v2 = vld [vmem:[#allocation2 + $0x3d0] sm:$0xff] }
 0x608   :  { %5445 = vst [vmem:[#allocation5 + $0x320] sm:$0xff] %v5317_v35  ;;  %v7399_v11 = vpop.f32.mrb[198].mxu0 }
 0x609   :  { %v5320_v12 = vadd.f32 %v7399_v11, %v5192_v4  ;;  %v4960_v43 = vpop.f32.mrb[199].mxu0  ;;  %v5214_v11 = vld [vmem:[#allocation2 + $0x3e8] sm:$0xff] }
 0x60a   :  { %v5319_v13 = vadd.f32 %v5191_v5, %v4960_v43 }
 0x60b   :  { %5448 = vst [vmem:[#allocation5 + $0x338] sm:$0xff] %v5320_v12  ;;  %v5213_v12 = vld [vmem:[#allocation2 + $0x3e0] sm:$0xff] }
 0x60c   :  { %5447 = vst [vmem:[#allocation5 + $0x330] sm:$0xff] %v5319_v13  ;;  %v7402_v38 = vpop.f32.mrb[200].mxu0 }
 0x60d   :  { %v5322_v31 = vadd.f32 %v7402_v38, %v5194_v14  ;;  %v4970_v6 = vpop.f32.mrb[201].mxu0  ;;  %v5216_v38 = vld [vmem:[#allocation2 + $0x3f8] sm:$0xff] }
 0x60e   :  { %v5321_v17 = vadd.f32 %v5193_v15, %v4970_v6 }
 0x60f   :  { %5450 = vst [vmem:[#allocation5 + $0x348] sm:$0xff] %v5322_v31  ;;  %v5215_v31 = vld [vmem:[#allocation2 + $0x3f0] sm:$0xff] }
 0x610   :  { %5449 = vst [vmem:[#allocation5 + $0x340] sm:$0xff] %v5321_v17  ;;  %v7405_v21 = vpop.f32.mrb[202].mxu0 }
 0x611   :  { %v5324_v20 = vadd.f32 %v7405_v21, %v5196_v10  ;;  %v4980_v27 = vpop.f32.mrb[203].mxu0 }
 0x612   :  { %v5323_v29 = vadd.f32 %v5195_v18, %v4980_v27 }
 0x613   :  { %5452 = vst [vmem:[#allocation5 + $0x358] sm:$0xff] %v5324_v20 }
 0x614   :  { %5451 = vst [vmem:[#allocation5 + $0x350] sm:$0xff] %v5323_v29  ;;  %v7408_v55 = vpop.f32.mrb[204].mxu0 }
 0x615   :  { %v5326_v39 = vadd.f32 %v7408_v55, %v5198_v19  ;;  %v4990_v41 = vpop.f32.mrb[205].mxu0 }
 0x616   :  { %v5325_v24 = vadd.f32 %v5197_v37, %v4990_v41 }
 0x617   :  { %5454 = vst [vmem:[#allocation5 + $0x368] sm:$0xff] %v5326_v39 }
 0x618   :  { %5453 = vst [vmem:[#allocation5 + $0x360] sm:$0xff] %v5325_v24  ;;  %v7411_v59 = vpop.f32.mrb[206].mxu0 }
 0x619   :  { %v5328_v61 = vadd.f32 %v7411_v59, %v5200_v48  ;;  %v5000_v8 = vpop.f32.mrb[207].mxu0 }
 0x61a   :  { %v5327_v23 = vadd.f32 %v5199_v50, %v5000_v8 }
 0x61b   :  { %5456 = vst [vmem:[#allocation5 + $0x378] sm:$0xff] %v5328_v61 }
 0x61c   :  { %5455 = vst [vmem:[#allocation5 + $0x370] sm:$0xff] %v5327_v23  ;;  %v7414_v25 = vpop.f32.mrb[208].mxu0 }
 0x61d   :  { %v5330_v26 = vadd.f32 %v7414_v25, %v5202_v47  ;;  %v5010_v28 = vpop.f32.mrb[209].mxu0 }
 0x61e   :  { %v5329_v30 = vadd.f32 %v5201_v57, %v5010_v28 }
 0x61f   :  { %5458 = vst [vmem:[#allocation5 + $0x388] sm:$0xff] %v5330_v26 }
 0x620   :  { %5457 = vst [vmem:[#allocation5 + $0x380] sm:$0xff] %v5329_v30  ;;  %v7417_v36 = vpop.f32.mrb[210].mxu0 }
 0x621   :  { %v5332_v53 = vadd.f32 %v7417_v36, %v5204_v33  ;;  %v5020_v62 = vpop.f32.mrb[211].mxu0 }
 0x622   :  { %v5331_v7 = vadd.f32 %v5203_v34, %v5020_v62 }
 0x623   :  { %5460 = vst [vmem:[#allocation5 + $0x398] sm:$0xff] %v5332_v53 }
 0x624   :  { %5459 = vst [vmem:[#allocation5 + $0x390] sm:$0xff] %v5331_v7  ;;  %v7420_v40 = vpop.f32.mrb[212].mxu0 }
 0x625   :  { %v5334_v42 = vadd.f32 %v7420_v40, %v5206_v9  ;;  %v5030_v44 = vpop.f32.mrb[213].mxu0 }
 0x626   :  { %v5333_v22 = vadd.f32 %v5205_v16, %v5030_v44 }
 0x627   :  { %5462 = vst [vmem:[#allocation5 + $0x3a8] sm:$0xff] %v5334_v42 }
 0x628   :  { %5461 = vst [vmem:[#allocation5 + $0x3a0] sm:$0xff] %v5333_v22  ;;  %v7423_v32 = vpop.f32.mrb[214].mxu0 }
 0x629   :  { %v5336_v58 = vadd.f32 %v7423_v32, %v5208_v49  ;;  %v5040_v45 = vpop.f32.mrb[215].mxu0 }
 0x62a   :  { %v5335_v46 = vadd.f32 %v5207_v52, %v5040_v45 }
 0x62b   :  { %5464 = vst [vmem:[#allocation5 + $0x3b8] sm:$0xff] %v5336_v58 }
 0x62c   :  { %5463 = vst [vmem:[#allocation5 + $0x3b0] sm:$0xff] %v5335_v46  ;;  %v7426_v56 = vpop.f32.mrb[216].mxu0 }
 0x62d   :  { %v5338_v60 = vadd.f32 %v7426_v56, %v5210_v51  ;;  %v5050_v63 = vpop.f32.mrb[217].mxu0 }
 0x62e   :  { %v5337_v1 = vadd.f32 %v5209_v54, %v5050_v63 }
 0x62f   :  { %5466 = vst [vmem:[#allocation5 + $0x3c8] sm:$0xff] %v5338_v60 }
 0x630   :  { %5465 = vst [vmem:[#allocation5 + $0x3c0] sm:$0xff] %v5337_v1  ;;  %v7429_v3 = vpop.f32.mrb[218].mxu0 }
 0x631   :  { %v5340_v35 = vadd.f32 %v7429_v3, %v5212_v0  ;;  %v5060_v4 = vpop.f32.mrb[219].mxu0 }
 0x632   :  { %v5339_v5 = vadd.f32 %v5211_v2, %v5060_v4 }
 0x633   :  { %5468 = vst [vmem:[#allocation5 + $0x3d8] sm:$0xff] %v5340_v35 }
 0x634   :  { %5467 = vst [vmem:[#allocation5 + $0x3d0] sm:$0xff] %v5339_v5  ;;  %v7432_v43 = vpop.f32.mrb[220].mxu0 }
 0x635   :  { %v5342_v13 = vadd.f32 %v7432_v43, %v5214_v11  ;;  %v5070_v14 = vpop.f32.mrb[221].mxu0 }
 0x636   :  { %v5341_v15 = vadd.f32 %v5213_v12, %v5070_v14 }
 0x637   :  { %5470 = vst [vmem:[#allocation5 + $0x3e8] sm:$0xff] %v5342_v13 }
 0x638   :  { %5469 = vst [vmem:[#allocation5 + $0x3e0] sm:$0xff] %v5341_v15  ;;  %v7435_v6 = vpop.f32.mrb[222].mxu0 }
 0x639   :  { %v5344_v17 = vadd.f32 %v7435_v6, %v5216_v38  ;;  %v5080_v10 = vpop.f32.mrb[223].mxu0 }
 0x63a   :  { %v5343_v18 = vadd.f32 %v5215_v31, %v5080_v10 }
 0x63b   :  { %5472 = vst [vmem:[#allocation5 + $0x3f8] sm:$0xff] %v5344_v17 }
 0x63c   :  { %5471 = vst [vmem:[#allocation5 + $0x3f0] sm:$0xff] %v5343_v18 }
 0x63d   :  { %7725 = shalt.err (!%p7722_p12)
}
 0x63e   :  { %s7726_s8 = scalar_lea.hbm %s9267_s11, 16384 }
 0x63f   :  { %p7727_p13 = scmp.ne.s32.totalorder %s9267_s11, %s7726_s8  ;;  %p7730_p0 = scmp.lt.u32.totalorder %s7726_s8, %s9267_s11 }
 0x641   :  { %p7732_p1 = pnand %p7730_p0, %p7727_p13 }
 0x643   :  { %7735 = shalt.err (!%p7732_p1)
}
 0x644   :  { %5484 = dma.vmem_to_hbm [thread:$0]  %s5479_s10, 16384, %s9267_s11, [#allocation4], %s7741_s27, %s7741_s27, %s7742_s28  }
 0x645   :  { %7738 = dma.done.wait [#allocation4], 16384  }
 0x646   :  { %7739 = vsyncadd [#allocation4], 4294950912 }
 0x647   :  { %5488 = vsyncpa [#allocation3], 1 }
 0x648   :  { %5489 = vsyncpa [#allocation4], 1 }

</bundles_post_ra>
